<compile_context>
chip_gen: v7x
topology: tpu7x:2x2x1
jax: 0.10.0
libtpu: 0.0.40
codegen_flags: <defaults>
</compile_context>

<pallas_src>
import math
import functools

import jax
import jax.numpy as jnp
from jax.experimental import pallas as pl
from jax.experimental.pallas import tpu as pltpu


def _attention_kernel(x_ref, mask_ref, gamma_ref, beta_ref,
                      wq_ref, bq_ref, wk_ref, bk_ref, wv_ref, bv_ref,
                      wproj_ref, bproj_ref, o_ref, *, num_heads, eps=1e-5):
    """Full AttentionBlock forward for the WHOLE batch in one invocation.

    x_ref:    (B, C, N)  input in native NCHW-flattened layout (N = H*W)
    mask_ref: (H, C)     head mask, mask[h, c] = 1.0 iff c // head_dim == h
    gamma/beta: (1, C)   LayerNorm affine
    wq/wk/wv: (C, C)     projection weights, stored (in, out)
    bq/bk/bv: (1, C)
    wproj:    (C, C)
    bproj:    (1, C)
    o_ref:    (B, C, N)  output, same layout as input
    """
    B, C, N = x_ref.shape
    head_dim = C // num_heads
    scale = math.sqrt(1.0 / head_dim)

    # ---- fused input transpose: (B, C, N) -> (B, N, C) -> (B*N, C) ----
    x = jnp.transpose(x_ref[...], (0, 2, 1)).reshape(B * N, C)

    # ---- LayerNorm over channels (f32 statistics, eps matches nn.LayerNorm) ----
    mean = jnp.mean(x, axis=-1, keepdims=True)
    centered = x - mean
    var = jnp.mean(centered * centered, axis=-1, keepdims=True)
    xn = centered * jax.lax.rsqrt(var + eps)
    xn = xn * gamma_ref[...] + beta_ref[...]                      # (B*N, C)

    # ---- Q / K / V projections: all B*N tokens per MXU dispatch ----
    q = jnp.dot(xn, wq_ref[...], preferred_element_type=jnp.float32) + bq_ref[...]
    k = jnp.dot(xn, wk_ref[...], preferred_element_type=jnp.float32) + bk_ref[...]
    v = jnp.dot(xn, wv_ref[...], preferred_element_type=jnp.float32) + bv_ref[...]
    q = q.reshape(B, N, C)
    k = k.reshape(B, N, C)
    v = v.reshape(B, N, C)

    # ---- Multi-head attention without per-head slicing / concatenation ----
    # Masking q's channels per head makes the per-head contraction (K=4) part
    # of one dense batched contraction over all C channels, so the whole
    # score computation is a single B-batched MXU einsum.
    mask = mask_ref[...]                                          # (H, C)
    q_rep = (q[:, None, :, :] * mask[None, :, None, :])           # (B, H, N, C)
    q_rep = q_rep.reshape(B, num_heads * N, C)                    # (B, H*N, C)

    s = jnp.einsum("bxc,bmc->bxm", q_rep, k,
                   preferred_element_type=jnp.float32) * scale    # (B, H*N, N)

    # numerically stable softmax over the key axis
    s = s - jnp.max(s, axis=-1, keepdims=True)
    p = jnp.exp(s)
    p = p * pl.reciprocal(jnp.sum(p, axis=-1, keepdims=True), approx=True)
    # TODO(synk): attn_drop / proj_drop are inference-mode identities (no RNG dropout here)

    o_full = jnp.einsum("bxm,bmc->bxc", p, v,
                        preferred_element_type=jnp.float32)       # (B, H*N, C)
    # Each output channel c keeps only its own head's rows; the masked sum is
    # exactly (attn @ v).transpose(1, 2).reshape(B, N, C) of the reference.
    attn_out = (o_full.reshape(B, num_heads, N, C)
                * mask[None, :, None, :]).sum(axis=1)             # (B, N, C)

    # ---- output projection over all B*N tokens ----
    y = jnp.dot(attn_out.reshape(B * N, C), wproj_ref[...],
                preferred_element_type=jnp.float32) + bproj_ref[...]

    # ---- fused output transpose: (B*N, C) -> (B, C, N) ----
    o_ref[...] = jnp.transpose(y.reshape(B, N, C), (0, 2, 1)).astype(o_ref.dtype)


@functools.partial(jax.jit, static_argnames=("num_heads",))
def attention_block(x_nchw, params, num_heads):
    """AttentionBlock forward. x_nchw: (B, C, H, W) float32."""
    B, C, H, W = x_nchw.shape
    N = H * W
    head_dim = C // num_heads

    # Free reshape only (no XLA transpose): kernel consumes native layout.
    x_bcn = x_nchw.reshape(B, C, N)

    gamma = params["gamma"].reshape(1, C)
    beta = params["beta"].reshape(1, C)
    wqkv = params["wqkv"]                       # (C, 3C), columns = [q | k | v]
    bqkv = params["bqkv"]                       # (3C,)
    wq, wk, wv = wqkv[:, :C], wqkv[:, C:2 * C], wqkv[:, 2 * C:]
    bq = bqkv[:C].reshape(1, C)
    bk = bqkv[C:2 * C].reshape(1, C)
    bv = bqkv[2 * C:].reshape(1, C)
    wproj = params["wproj"]                     # (C, C)
    bproj = params["bproj"].reshape(1, C)

    # head-selection mask: mask[h, c] = 1.0 iff channel c belongs to head h
    head_mask = (jnp.arange(C, dtype=jnp.int32)[None, :] // head_dim
                 == jnp.arange(num_heads, dtype=jnp.int32)[:, None]
                 ).astype(jnp.float32)          # (H, C)

    kernel = functools.partial(_attention_kernel, num_heads=num_heads)

    def full(shape):
        return pl.BlockSpec(shape, lambda i, _n=len(shape): (0,) * _n)

    out_bcn = pl.pallas_call(
        kernel,
        out_shape=jax.ShapeDtypeStruct((B, C, N), jnp.float32),
        grid=(1,),                              # single step: B folded into M
        in_specs=[
            full((B, C, N)),                    # x
            full((num_heads, C)),               # head mask
            full((1, C)), full((1, C)),         # gamma, beta
            full((C, C)), full((1, C)),         # wq, bq
            full((C, C)), full((1, C)),         # wk, bk
            full((C, C)), full((1, C)),         # wv, bv
            full((C, C)), full((1, C)),         # wproj, bproj
        ],
        out_specs=full((B, C, N)),
        compiler_params=pltpu.CompilerParams(
            dimension_semantics=("arbitrary",)),
    )(x_bcn, head_mask, gamma, beta, wq, bq, wk, bk, wv, bv, wproj, bproj)

    # Free reshape only.
    return out_bcn.reshape(B, C, H, W)


def init_params(key, in_channels):
    """Deterministic synthetic parameter init (shapes match the nn.Module)."""
    C = in_channels
    k1, k2, k3, k4 = jax.random.split(key, 4)
    # PyTorch Linear stores weight as (out, in); we store transposed (in, out).
    wqkv = jax.random.normal(k1, (C, 3 * C), jnp.float32) * (1.0 / math.sqrt(C))
    bqkv = jax.random.normal(k2, (3 * C,), jnp.float32) * 0.02
    wproj = jax.random.normal(k3, (C, C), jnp.float32) * (1.0 / math.sqrt(C))
    bproj = jax.random.normal(k4, (C,), jnp.float32) * 0.02
    return {
        "gamma": jnp.ones((C,), jnp.float32),
        "beta": jnp.zeros((C,), jnp.float32),
        "wqkv": wqkv,
        "bqkv": bqkv,
        "wproj": wproj,
        "bproj": bproj,
    }


def reference_forward(x_nchw, params, num_heads):
    """Pure-JAX reference mirroring the PyTorch forward (eval mode)."""
    B, C, H, W = x_nchw.shape
    N = H * W
    x = jnp.transpose(x_nchw.reshape(B, C, N), (0, 2, 1))          # (B, N, C)
    mean = jnp.mean(x, -1, keepdims=True)
    var = jnp.mean((x - mean) ** 2, -1, keepdims=True)
    xn = (x - mean) / jnp.sqrt(var + 1e-5) * params["gamma"] + params["beta"]
    qkv = xn @ params["wqkv"] + params["bqkv"]                     # (B, N, 3C)
    hd = C // num_heads
    qkv = qkv.reshape(B, N, 3, num_heads, hd).transpose(2, 0, 3, 1, 4)
    q, k, v = qkv[0], qkv[1], qkv[2]                               # (B, h, N, d)
    attn = jnp.einsum("bhnd,bhmd->bhnm", q, k) * math.sqrt(1.0 / hd)
    attn = jax.nn.softmax(attn, axis=-1)
    o = jnp.einsum("bhnm,bhmd->bhnd", attn, v)
    o = o.transpose(0, 2, 1, 3).reshape(B, N, C)
    o = o @ params["wproj"] + params["bproj"]
    return jnp.transpose(o, (0, 2, 1)).reshape(B, C, H, W)


if __name__ == "__main__":
    B, C, H, W = 2, 32, 8, 8          # C divisible by num_heads=8 -> head_dim=4
    num_heads = 8

    key = jax.random.PRNGKey(0)
    kx, kp = jax.random.split(key)
    x = jax.random.normal(kx, (B, C, H, W), jnp.float32)
    params = init_params(kp, C)

    out = jax.block_until_ready(attention_block(x, params, num_heads))
    ref = reference_forward(x, params, num_heads)

    assert out.shape == (B, C, H, W)
    err = float(jnp.max(jnp.abs(out - ref)))
    # Tolerance accounts for the EUP approximate reciprocal in the softmax
    # denominator; everything else accumulates in f32.
    assert err < 2e-3, err
    print("KERNEL_OK")
</pallas_src>

<mosaic_0001>
module attributes {stable_mosaic.version = 11 : i64} {
  func.func @_attention_kernel(%arg0: i32, %arg1: memref<2x32x64xf32, #tpu.memory_space<vmem>>, %arg2: memref<8x32xf32, #tpu.memory_space<vmem>>, %arg3: memref<1x32xf32, #tpu.memory_space<vmem>>, %arg4: memref<1x32xf32, #tpu.memory_space<vmem>>, %arg5: memref<32x32xf32, #tpu.memory_space<vmem>>, %arg6: memref<1x32xf32, #tpu.memory_space<vmem>>, %arg7: memref<32x32xf32, #tpu.memory_space<vmem>>, %arg8: memref<1x32xf32, #tpu.memory_space<vmem>>, %arg9: memref<32x32xf32, #tpu.memory_space<vmem>>, %arg10: memref<1x32xf32, #tpu.memory_space<vmem>>, %arg11: memref<32x32xf32, #tpu.memory_space<vmem>>, %arg12: memref<1x32xf32, #tpu.memory_space<vmem>>, %arg13: memref<2x32x64xf32, #tpu.memory_space<vmem>>) attributes {dimension_semantics = [#tpu.dimension_semantics<arbitrary>], iteration_bounds = array<i64: 1>, scalar_prefetch = 0 : i64, scratch_operands = 0 : i64, tpu.core_type = #tpu.core_type<tc>, window_params = [{pipeline_mode = #tpu.pipeline_mode<synchronous>, transform_indices = @transform_0, window_bounds = array<i64: 2, 32, 64>}, {pipeline_mode = #tpu.pipeline_mode<synchronous>, transform_indices = @transform_1, window_bounds = array<i64: 8, 32>}, {pipeline_mode = #tpu.pipeline_mode<synchronous>, transform_indices = @transform_2, window_bounds = array<i64: 1, 32>}, {pipeline_mode = #tpu.pipeline_mode<synchronous>, transform_indices = @transform_3, window_bounds = array<i64: 1, 32>}, {pipeline_mode = #tpu.pipeline_mode<synchronous>, transform_indices = @transform_4, window_bounds = array<i64: 32, 32>}, {pipeline_mode = #tpu.pipeline_mode<synchronous>, transform_indices = @transform_5, window_bounds = array<i64: 1, 32>}, {pipeline_mode = #tpu.pipeline_mode<synchronous>, transform_indices = @transform_6, window_bounds = array<i64: 32, 32>}, {pipeline_mode = #tpu.pipeline_mode<synchronous>, transform_indices = @transform_7, window_bounds = array<i64: 1, 32>}, {pipeline_mode = #tpu.pipeline_mode<synchronous>, transform_indices = @transform_8, window_bounds = array<i64: 32, 32>}, {pipeline_mode = #tpu.pipeline_mode<synchronous>, transform_indices = @transform_9, window_bounds = array<i64: 1, 32>}, {pipeline_mode = #tpu.pipeline_mode<synchronous>, transform_indices = @transform_10, window_bounds = array<i64: 32, 32>}, {pipeline_mode = #tpu.pipeline_mode<synchronous>, transform_indices = @transform_11, window_bounds = array<i64: 1, 32>}, {pipeline_mode = #tpu.pipeline_mode<synchronous>, transform_indices = @transform_12, window_bounds = array<i64: 2, 32, 64>}]} {
    %c0 = arith.constant 0 : index
    %c0_0 = arith.constant 0 : index
    %c0_1 = arith.constant 0 : index
    %0 = vector.load %arg1[%c0, %c0_0, %c0_1] : memref<2x32x64xf32, #tpu.memory_space<vmem>>, vector<2x32x64xf32>
    %1 = tpu.transpose %0, [0, 2, 1] : vector<2x32x64xf32> -> vector<2x64x32xf32>
    %2 = vector.shape_cast %1 : vector<2x64x32xf32> to vector<128x32xf32>
    %cst = arith.constant dense<0.000000e+00> : vector<128xf32>
    %3 = vector.multi_reduction <add>, %2, %cst [1] : vector<128x32xf32> to vector<128xf32>
    %4 = vector.shape_cast %3 : vector<128xf32> to vector<128x1xf32>
    %cst_2 = arith.constant 3.200000e+01 : f32
    %5 = vector.broadcast %cst_2 : f32 to vector<128x1xf32>
    %6 = arith.divf %4, %5 : vector<128x1xf32>
    %7 = vector.broadcast %6 : vector<128x1xf32> to vector<128x32xf32>
    %8 = arith.subf %2, %7 : vector<128x32xf32>
    %9 = arith.mulf %8, %8 : vector<128x32xf32>
    %cst_3 = arith.constant dense<0.000000e+00> : vector<128xf32>
    %10 = vector.multi_reduction <add>, %9, %cst_3 [1] : vector<128x32xf32> to vector<128xf32>
    %11 = vector.shape_cast %10 : vector<128xf32> to vector<128x1xf32>
    %cst_4 = arith.constant 3.200000e+01 : f32
    %12 = vector.broadcast %cst_4 : f32 to vector<128x1xf32>
    %13 = arith.divf %11, %12 : vector<128x1xf32>
    %cst_5 = arith.constant 9.99999974E-6 : f32
    %14 = vector.broadcast %cst_5 : f32 to vector<128x1xf32>
    %15 = arith.addf %13, %14 : vector<128x1xf32>
    %16 = math.rsqrt %15 : vector<128x1xf32>
    %17 = vector.broadcast %16 : vector<128x1xf32> to vector<128x32xf32>
    %18 = arith.mulf %8, %17 : vector<128x32xf32>
    %c0_6 = arith.constant 0 : index
    %c0_7 = arith.constant 0 : index
    %19 = vector.load %arg3[%c0_6, %c0_7] : memref<1x32xf32, #tpu.memory_space<vmem>>, vector<1x32xf32>
    %20 = vector.broadcast %19 : vector<1x32xf32> to vector<128x32xf32>
    %21 = arith.mulf %18, %20 : vector<128x32xf32>
    %c0_8 = arith.constant 0 : index
    %c0_9 = arith.constant 0 : index
    %22 = vector.load %arg4[%c0_8, %c0_9] : memref<1x32xf32, #tpu.memory_space<vmem>>, vector<1x32xf32>
    %23 = vector.broadcast %22 : vector<1x32xf32> to vector<128x32xf32>
    %24 = arith.addf %21, %23 : vector<128x32xf32>
    %c0_10 = arith.constant 0 : index
    %c0_11 = arith.constant 0 : index
    %25 = vector.load %arg5[%c0_10, %c0_11] : memref<32x32xf32, #tpu.memory_space<vmem>>, vector<32x32xf32>
    %cst_12 = arith.constant dense<0.000000e+00> : vector<128x32xf32>
    %26 = tpu.matmul %24, %25, %cst_12 {dimension_numbers = #tpu.dot_dimension_numbers<[1], [0], [0], [1], [0, 0, 1, 1], [], []>} : vector<128x32xf32>, vector<32x32xf32>, vector<128x32xf32> -> vector<128x32xf32>
    %c0_13 = arith.constant 0 : index
    %c0_14 = arith.constant 0 : index
    %27 = vector.load %arg6[%c0_13, %c0_14] : memref<1x32xf32, #tpu.memory_space<vmem>>, vector<1x32xf32>
    %28 = vector.broadcast %27 : vector<1x32xf32> to vector<128x32xf32>
    %29 = arith.addf %26, %28 : vector<128x32xf32>
    %c0_15 = arith.constant 0 : index
    %c0_16 = arith.constant 0 : index
    %30 = vector.load %arg7[%c0_15, %c0_16] : memref<32x32xf32, #tpu.memory_space<vmem>>, vector<32x32xf32>
    %cst_17 = arith.constant dense<0.000000e+00> : vector<128x32xf32>
    %31 = tpu.matmul %24, %30, %cst_17 {dimension_numbers = #tpu.dot_dimension_numbers<[1], [0], [0], [1], [0, 0, 1, 1], [], []>} : vector<128x32xf32>, vector<32x32xf32>, vector<128x32xf32> -> vector<128x32xf32>
    %c0_18 = arith.constant 0 : index
    %c0_19 = arith.constant 0 : index
    %32 = vector.load %arg8[%c0_18, %c0_19] : memref<1x32xf32, #tpu.memory_space<vmem>>, vector<1x32xf32>
    %33 = vector.broadcast %32 : vector<1x32xf32> to vector<128x32xf32>
    %34 = arith.addf %31, %33 : vector<128x32xf32>
    %c0_20 = arith.constant 0 : index
    %c0_21 = arith.constant 0 : index
    %35 = vector.load %arg9[%c0_20, %c0_21] : memref<32x32xf32, #tpu.memory_space<vmem>>, vector<32x32xf32>
    %cst_22 = arith.constant dense<0.000000e+00> : vector<128x32xf32>
    %36 = tpu.matmul %24, %35, %cst_22 {dimension_numbers = #tpu.dot_dimension_numbers<[1], [0], [0], [1], [0, 0, 1, 1], [], []>} : vector<128x32xf32>, vector<32x32xf32>, vector<128x32xf32> -> vector<128x32xf32>
    %c0_23 = arith.constant 0 : index
    %c0_24 = arith.constant 0 : index
    %37 = vector.load %arg10[%c0_23, %c0_24] : memref<1x32xf32, #tpu.memory_space<vmem>>, vector<1x32xf32>
    %38 = vector.broadcast %37 : vector<1x32xf32> to vector<128x32xf32>
    %39 = arith.addf %36, %38 : vector<128x32xf32>
    %40 = vector.shape_cast %29 : vector<128x32xf32> to vector<2x64x32xf32>
    %41 = vector.shape_cast %34 : vector<128x32xf32> to vector<2x64x32xf32>
    %42 = vector.shape_cast %39 : vector<128x32xf32> to vector<2x64x32xf32>
    %c0_25 = arith.constant 0 : index
    %c0_26 = arith.constant 0 : index
    %43 = vector.load %arg2[%c0_25, %c0_26] : memref<8x32xf32, #tpu.memory_space<vmem>>, vector<8x32xf32>
    %44 = vector.shape_cast %40 : vector<2x64x32xf32> to vector<2x1x64x32xf32>
    %45 = vector.shape_cast %43 : vector<8x32xf32> to vector<1x8x1x32xf32>
    %46 = vector.broadcast %44 : vector<2x1x64x32xf32> to vector<2x8x64x32xf32>
    %47 = vector.broadcast %45 : vector<1x8x1x32xf32> to vector<2x8x64x32xf32>
    %48 = arith.mulf %46, %47 : vector<2x8x64x32xf32>
    %49 = vector.shape_cast %48 : vector<2x8x64x32xf32> to vector<2x512x32xf32>
    "tpu.trace_start"() <{level = 10 : i32, message = "bxc,bmc->bxm"}> : () -> ()
    %cst_27 = arith.constant dense<0.000000e+00> : vector<2x512x64xf32>
    %50 = tpu.matmul %49, %41, %cst_27 {dimension_numbers = #tpu.dot_dimension_numbers<[2], [2], [1], [1], [0, 0, 0, 1, 1, 1], [0], [0]>} : vector<2x512x32xf32>, vector<2x64x32xf32>, vector<2x512x64xf32> -> vector<2x512x64xf32>
    "tpu.trace_stop"() : () -> ()
    %cst_28 = arith.constant 5.000000e-01 : f32
    %51 = vector.broadcast %cst_28 : f32 to vector<2x512x64xf32>
    %52 = arith.mulf %50, %51 : vector<2x512x64xf32>
    %cst_29 = arith.constant dense<0xFF800000> : vector<2x512xf32>
    %53 = vector.multi_reduction <maximumf>, %52, %cst_29 [2] : vector<2x512x64xf32> to vector<2x512xf32>
    %54 = vector.shape_cast %53 : vector<2x512xf32> to vector<2x512x1xf32>
    %55 = vector.broadcast %54 : vector<2x512x1xf32> to vector<2x512x64xf32>
    %56 = arith.subf %52, %55 : vector<2x512x64xf32>
    %57 = math.exp %56 : vector<2x512x64xf32>
    %cst_30 = arith.constant dense<0.000000e+00> : vector<2x512xf32>
    %58 = vector.multi_reduction <add>, %57, %cst_30 [2] : vector<2x512x64xf32> to vector<2x512xf32>
    %59 = vector.shape_cast %58 : vector<2x512xf32> to vector<2x512x1xf32>
    %60 = tpu.reciprocal %59 {approx = true} : vector<2x512x1xf32> -> vector<2x512x1xf32>
    %61 = vector.broadcast %60 : vector<2x512x1xf32> to vector<2x512x64xf32>
    %62 = arith.mulf %57, %61 : vector<2x512x64xf32>
    "tpu.trace_start"() <{level = 10 : i32, message = "bxm,bmc->bxc"}> : () -> ()
    %cst_31 = arith.constant dense<0.000000e+00> : vector<2x512x32xf32>
    %63 = tpu.matmul %62, %42, %cst_31 {dimension_numbers = #tpu.dot_dimension_numbers<[2], [1], [1], [2], [0, 0, 0, 1, 1, 2], [0], [0]>} : vector<2x512x64xf32>, vector<2x64x32xf32>, vector<2x512x32xf32> -> vector<2x512x32xf32>
    "tpu.trace_stop"() : () -> ()
    %64 = vector.shape_cast %63 : vector<2x512x32xf32> to vector<2x8x64x32xf32>
    %65 = vector.shape_cast %43 : vector<8x32xf32> to vector<1x8x1x32xf32>
    %66 = vector.broadcast %65 : vector<1x8x1x32xf32> to vector<2x8x64x32xf32>
    %67 = arith.mulf %64, %66 : vector<2x8x64x32xf32>
    %cst_32 = arith.constant dense<0.000000e+00> : vector<2x64x32xf32>
    %68 = vector.multi_reduction <add>, %67, %cst_32 [1] : vector<2x8x64x32xf32> to vector<2x64x32xf32>
    %69 = vector.shape_cast %68 : vector<2x64x32xf32> to vector<128x32xf32>
    %c0_33 = arith.constant 0 : index
    %c0_34 = arith.constant 0 : index
    %70 = vector.load %arg11[%c0_33, %c0_34] : memref<32x32xf32, #tpu.memory_space<vmem>>, vector<32x32xf32>
    %cst_35 = arith.constant dense<0.000000e+00> : vector<128x32xf32>
    %71 = tpu.matmul %69, %70, %cst_35 {dimension_numbers = #tpu.dot_dimension_numbers<[1], [0], [0], [1], [0, 0, 1, 1], [], []>} : vector<128x32xf32>, vector<32x32xf32>, vector<128x32xf32> -> vector<128x32xf32>
    %c0_36 = arith.constant 0 : index
    %c0_37 = arith.constant 0 : index
    %72 = vector.load %arg12[%c0_36, %c0_37] : memref<1x32xf32, #tpu.memory_space<vmem>>, vector<1x32xf32>
    %73 = vector.broadcast %72 : vector<1x32xf32> to vector<128x32xf32>
    %74 = arith.addf %71, %73 : vector<128x32xf32>
    %75 = vector.shape_cast %74 : vector<128x32xf32> to vector<2x64x32xf32>
    %76 = tpu.transpose %75, [0, 2, 1] : vector<2x64x32xf32> -> vector<2x32x64xf32>
    %c0_38 = arith.constant 0 : index
    %c0_39 = arith.constant 0 : index
    %c0_40 = arith.constant 0 : index
    %77 = vector.load %arg13[%c0_38, %c0_39, %c0_40] : memref<2x32x64xf32, #tpu.memory_space<vmem>>, vector<2x32x64xf32>
    tpu.vector_store %arg13[%c0_38, %c0_39, %c0_40], %76 {strides = array<i32>} : memref<2x32x64xf32, #tpu.memory_space<vmem>>, vector<2x32x64xf32>,
    return
  }
  func.func @transform_0(%arg0: i32) -> (i32, i32, i32) {
    %c0_i32 = arith.constant 0 : i32
    %c0_i32_0 = arith.constant 0 : i32
    %c0_i32_1 = arith.constant 0 : i32
    %c0_i32_2 = arith.constant 0 : i32
    return %c0_i32, %c0_i32_0, %c0_i32_1 : i32, i32, i32
  }
  func.func @transform_1(%arg0: i32) -> (i32, i32) {
    %c0_i32 = arith.constant 0 : i32
    %c0_i32_0 = arith.constant 0 : i32
    %c0_i32_1 = arith.constant 0 : i32
    return %c0_i32, %c0_i32_0 : i32, i32
  }
  func.func @transform_2(%arg0: i32) -> (i32, i32) {
    %c0_i32 = arith.constant 0 : i32
    %c0_i32_0 = arith.constant 0 : i32
    %c0_i32_1 = arith.constant 0 : i32
    return %c0_i32, %c0_i32_0 : i32, i32
  }
  func.func @transform_3(%arg0: i32) -> (i32, i32) {
    %c0_i32 = arith.constant 0 : i32
    %c0_i32_0 = arith.constant 0 : i32
    %c0_i32_1 = arith.constant 0 : i32
    return %c0_i32, %c0_i32_0 : i32, i32
  }
  func.func @transform_4(%arg0: i32) -> (i32, i32) {
    %c0_i32 = arith.constant 0 : i32
    %c0_i32_0 = arith.constant 0 : i32
    %c0_i32_1 = arith.constant 0 : i32
    return %c0_i32, %c0_i32_0 : i32, i32
  }
  func.func @transform_5(%arg0: i32) -> (i32, i32) {
    %c0_i32 = arith.constant 0 : i32
    %c0_i32_0 = arith.constant 0 : i32
    %c0_i32_1 = arith.constant 0 : i32
    return %c0_i32, %c0_i32_0 : i32, i32
  }
  func.func @transform_6(%arg0: i32) -> (i32, i32) {
    %c0_i32 = arith.constant 0 : i32
    %c0_i32_0 = arith.constant 0 : i32
    %c0_i32_1 = arith.constant 0 : i32
    return %c0_i32, %c0_i32_0 : i32, i32
  }
  func.func @transform_7(%arg0: i32) -> (i32, i32) {
    %c0_i32 = arith.constant 0 : i32
    %c0_i32_0 = arith.constant 0 : i32
    %c0_i32_1 = arith.constant 0 : i32
    return %c0_i32, %c0_i32_0 : i32, i32
  }
  func.func @transform_8(%arg0: i32) -> (i32, i32) {
    %c0_i32 = arith.constant 0 : i32
    %c0_i32_0 = arith.constant 0 : i32
    %c0_i32_1 = arith.constant 0 : i32
    return %c0_i32, %c0_i32_0 : i32, i32
  }
  func.func @transform_9(%arg0: i32) -> (i32, i32) {
    %c0_i32 = arith.constant 0 : i32
    %c0_i32_0 = arith.constant 0 : i32
    %c0_i32_1 = arith.constant 0 : i32
    return %c0_i32, %c0_i32_0 : i32, i32
  }
  func.func @transform_10(%arg0: i32) -> (i32, i32) {
    %c0_i32 = arith.constant 0 : i32
    %c0_i32_0 = arith.constant 0 : i32
    %c0_i32_1 = arith.constant 0 : i32
    return %c0_i32, %c0_i32_0 : i32, i32
  }
  func.func @transform_11(%arg0: i32) -> (i32, i32) {
    %c0_i32 = arith.constant 0 : i32
    %c0_i32_0 = arith.constant 0 : i32
    %c0_i32_1 = arith.constant 0 : i32
    return %c0_i32, %c0_i32_0 : i32, i32
  }
  func.func @transform_12(%arg0: i32) -> (i32, i32, i32) {
    %c0_i32 = arith.constant 0 : i32
    %c0_i32_0 = arith.constant 0 : i32
    %c0_i32_1 = arith.constant 0 : i32
    %c0_i32_2 = arith.constant 0 : i32
    return %c0_i32, %c0_i32_0, %c0_i32_1 : i32, i32, i32
  }
}

</mosaic_0001>

<bundles_post_ra>
// kernel: attention_block.1
= control target key start
LH: loop header
LB: loop body
LE: loop exit
PB: predicated region body
PF: predicated region fallthrough
CT: control target
= control target key end

     0   :  { %vm113_vm0 = vcmask 261120   ;;  %vm2434_vm2 = vcmask 523264   ;;  %s11224_s0 = inlined_call_operand.vmem [shape: f32[2,32,64], index: 0, kind: input, shape index: {}]   ;;  %s11225_s4 = inlined_call_operand.vmem [shape: f32[32,32], index: 4, kind: input, shape index: {}]   ;;  %s11226_s6 = inlined_call_operand.vmem [shape: f32[32,32], index: 6, kind: input, shape index: {}]   ;;  %s11227_s8 = inlined_call_operand.vmem [shape: f32[32,32], index: 8, kind: input, shape index: {}]   ;;  %s11228_s2 = inlined_call_operand.vmem [shape: f32[1,32], index: 2, kind: input, shape index: {}]   ;;  %s11229_s3 = inlined_call_operand.vmem [shape: f32[1,32], index: 3, kind: input, shape index: {}]   ;;  %s11230_s1 = inlined_call_operand.vmem [shape: f32[8,32], index: 1, kind: input, shape index: {}]   ;;  %s11231_s7 = inlined_call_operand.vmem [shape: f32[1,32], index: 7, kind: input, shape index: {}]   ;;  %s11232_s5 = inlined_call_operand.vmem [shape: f32[1,32], index: 5, kind: input, shape index: {}]   ;;  %s11233_s9 = inlined_call_operand.vmem [shape: f32[1,32], index: 9, kind: input, shape index: {}]   ;;  %s11234_s10 = inlined_call_operand.vmem [shape: f32[32,32], index: 10, kind: input, shape index: {}]   ;;  %s11235_s11 = inlined_call_operand.vmem [shape: f32[1,32], index: 11, kind: input, shape index: {}]   ;;  %s11236_s12 = inlined_call_operand.vmem [shape: f32[2,32,64], index: 12, kind: output, shape index: {}]  }
   0x1   :  { %v41_v0 = vld [vmem:[%s11224_s0] sm:$0xff]  ;;  %v42_v2 = vld [vmem:[%s11224_s0 + $0x8] sm:$0xff]  ;;  %v43_v4 = vld [vmem:[%s11224_s0 + $0x10] sm:$0xff] }
   0x2   :  { %49 = vxpose.xlu0.b32.start [1/4] (short) (narrow) %v41_v0, 64  ;;  %v45_v1 = vld [vmem:[%s11224_s0 + $0x20] sm:$0xff]  ;;  %v46_v3 = vld [vmem:[%s11224_s0 + $0x28] sm:$0xff]  ;;  %v47_v5 = vld [vmem:[%s11224_s0 + $0x30] sm:$0xff] }
   0x3   :  { %81 = vxpose.xlu1.b32.start [1/4] (short) (narrow) %v45_v1, 64  ;;  %v44_v6 = vld [vmem:[%s11224_s0 + $0x18] sm:$0xff]  ;;  %vm8039_vm1 = vmpackc.low %vm113_vm0, %vm113_vm0 }
   0x4   :  { %v48_v7 = vld [vmem:[%s11224_s0 + $0x38] sm:$0xff] }
   0x6   :  { %50 = vxpose.xlu0.b32.cont [2/4] (short) (narrow) %v42_v2, 64 }
   0x7   :  { %82 = vxpose.xlu1.b32.cont [2/4] (short) (narrow) %v46_v3, 64 }
   0xa   :  { %51 = vxpose.xlu0.b32.cont [3/4] (short) (narrow) %v43_v4, 64 }
   0xb   :  { %83 = vxpose.xlu1.b32.cont [3/4] (short) (narrow) %v47_v5, 64 }
   0xe   :  { %52 = vxpose.xlu0.b32.end [4/4] (short) (narrow) %v44_v6, 64 }
   0xf   :  { %84 = vxpose.xlu1.b32.end [4/4] (short) (narrow) %v48_v7, 64 }
  0x82   :  { %v65_v8 = vpop.trf.xlu0 }
  0x83   :  { %v114_v9 = vsel %vm113_vm0, %v65_v8, 0.0  ;;  %v7681_v10 = vpop.trf.xlu1 }
  0x84   :  { %115 = vadd.xlane.f32.xlu0 %v114_v9  ;;  %v138_v27 = vsel %vm113_vm0, %v7681_v10, 0.0 }
  0x86   :  { %v66_v11 = vpop.trf.xlu0 }
  0x87   :  { %v117_v12 = vsel %vm113_vm0, %v66_v11, 0.0  ;;  %v7684_v13 = vpop.trf.xlu1 }
  0x88   :  { %118 = vadd.xlane.f32.xlu1 %v117_v12  ;;  %v141_v32 = vsel %vm113_vm0, %v7684_v13, 0.0 }
  0x8a   :  { %v67_v14 = vpop.trf.xlu0 }
  0x8b   :  { %v120_v15 = vsel %vm113_vm0, %v67_v14, 0.0  ;;  %v7687_v16 = vpop.trf.xlu1 }
  0x8c   :  { %121 = vadd.xlane.f32.xlu1 %v120_v15  ;;  %v144_v31 = vsel %vm113_vm0, %v7687_v16, 0.0 }
  0x8e   :  { %v68_v17 = vpop.trf.xlu0 }
  0x8f   :  { %v123_v18 = vsel %vm113_vm0, %v68_v17, 0.0  ;;  %v7690_v20 = vpop.trf.xlu1 }
  0x90   :  { %124 = vadd.xlane.f32.xlu1 %v123_v18  ;;  %v147_v35 = vsel %vm113_vm0, %v7690_v20, 0.0 }
  0x92   :  { %v69_v19 = vpop.trf.xlu0 }
  0x93   :  { %v126_v21 = vsel %vm113_vm0, %v69_v19, 0.0  ;;  %v7694_v24 = vpop.trf.xlu1 }
  0x94   :  { %127 = vadd.xlane.f32.xlu0 %v126_v21  ;;  %v150_v34 = vsel %vm113_vm0, %v7694_v24, 0.0 }
  0x96   :  { %v70_v22 = vpop.trf.xlu0 }
  0x97   :  { %v129_v23 = vsel %vm113_vm0, %v70_v22, 0.0  ;;  %v7701_v29 = vpop.trf.xlu1 }
  0x98   :  { %130 = vadd.xlane.f32.xlu1 %v129_v23  ;;  %v153_v37 = vsel %vm113_vm0, %v7701_v29, 0.0 }
  0x9a   :  { %v71_v25 = vpop.trf.xlu0 }
  0x9b   :  { %v132_v26 = vsel %vm113_vm0, %v71_v25, 0.0  ;;  %v7709_v33 = vpop.trf.xlu1 }
  0x9c   :  { %133 = vadd.xlane.f32.xlu0 %v132_v26  ;;  %v156_v36 = vsel %vm113_vm0, %v7709_v33, 0.0 }
  0x9e   :  { %v7699_v28 = vpop.trf.xlu0 }
  0x9f   :  { %v135_v30 = vsel %vm113_vm0, %v7699_v28, 0.0  ;;  %v7719_v38 = vpop.trf.xlu1 }
  0xa0   :  { %139 = vadd.xlane.f32.xlu0 %v138_v27  ;;  %136 = vadd.xlane.f32.xlu1 %v135_v30  ;;  %v159_v39 = vsel %vm113_vm0, %v7719_v38, 0.0 }
  0xa4   :  { %145 = vadd.xlane.f32.xlu0 %v144_v31  ;;  %142 = vadd.xlane.f32.xlu1 %v141_v32 }
  0xa8   :  { %151 = vadd.xlane.f32.xlu0 %v150_v34  ;;  %148 = vadd.xlane.f32.xlu1 %v147_v35  ;;  %v369_v35 = vld [vmem:[%s11225_s4] sm:$0xff] }
  0xac   :  { %157 = vadd.xlane.f32.xlu0 %v156_v36  ;;  %154 = vadd.xlane.f32.xlu1 %v153_v37 }
  0xb0   :  { %160 = vadd.xlane.f32.xlu1 %v159_v39 }
 0x111   :  { %v116_v40 = vpop.xlane.xlu0 %115 }
 0x112   :  { %v163_v41 = vmul.f32 0.03125, %v116_v40 }
 0x114   :  { %v7723_v42 = vsub.f32 %v65_v8, %v163_v41  ;;  %v574_v41 = vld [vmem:[%s11226_s6 + $0x8] sm:$0xff] }
 0x115   :  { %v119_v43 = vpop.xlane.xlu1 %118 }
 0x116   :  { %v164_v44 = vmul.f32 0.03125, %v119_v43  ;;  %v195_v45 = vmul.f32 %v7723_v42, %v7723_v42 }
 0x118   :  { %v7727_v46 = vsub.f32 %v66_v11, %v164_v44  ;;  %v211_v47 = vsel %vm113_vm0, %v195_v45, 0.0 }
 0x119   :  { %v122_v48 = vpop.xlane.xlu1 %121  ;;  %212 = vadd.xlane.f32.xlu0 %v211_v47 }
 0x11a   :  { %v165_v49 = vmul.f32 0.03125, %v122_v48  ;;  %v196_v50 = vmul.f32 %v7727_v46, %v7727_v46 }
 0x11c   :  { %v7732_v51 = vsub.f32 %v67_v14, %v165_v49  ;;  %v214_v52 = vsel %vm113_vm0, %v196_v50, 0.0 }
 0x11d   :  { %v125_v53 = vpop.xlane.xlu1 %124  ;;  %215 = vadd.xlane.f32.xlu1 %v214_v52 }
 0x11e   :  { %v166_v54 = vmul.f32 0.03125, %v125_v53  ;;  %v197_v55 = vmul.f32 %v7732_v51, %v7732_v51  ;;  %v371_v53 = vld [vmem:[%s11225_s4 + $0x10] sm:$0xff] }
 0x120   :  { %v7737_v56 = vsub.f32 %v68_v17, %v166_v54  ;;  %v217_v57 = vsel %vm113_vm0, %v197_v55, 0.0 }
 0x121   :  { %218 = vadd.xlane.f32.xlu0 %v217_v57  ;;  %v128_v58 = vpop.xlane.xlu0 %127 }
 0x122   :  { %v167_v59 = vmul.f32 0.03125, %v128_v58  ;;  %v198_v60 = vmul.f32 %v7737_v56, %v7737_v56  ;;  %v575_v58 = vld [vmem:[%s11226_s6 + $0x10] sm:$0xff] }
 0x124   :  { %v7742_v61 = vsub.f32 %v69_v19, %v167_v59  ;;  %v220_v62 = vsel %vm113_vm0, %v198_v60, 0.0  ;;  %v576_v59 = vld [vmem:[%s11226_s6 + $0x18] sm:$0xff] }
 0x125   :  { %v131_v63 = vpop.xlane.xlu1 %130  ;;  %221 = vadd.xlane.f32.xlu1 %v220_v62  ;;  %v6943_v62 = vpack.c.bf16 %v576_v59, %v575_v58 }
 0x126   :  { %v168_v0 = vmul.f32 0.03125, %v131_v63  ;;  %v199_v1 = vmul.f32 %v7742_v61, %v7742_v61 }
 0x128   :  { %v7747_v2 = vsub.f32 %v70_v22, %v168_v0  ;;  %v223_v3 = vsel %vm113_vm0, %v199_v1, 0.0 }
 0x129   :  { %224 = vadd.xlane.f32.xlu0 %v223_v3  ;;  %v134_v4 = vpop.xlane.xlu0 %133 }
 0x12a   :  { %v169_v5 = vmul.f32 0.03125, %v134_v4  ;;  %v200_v6 = vmul.f32 %v7747_v2, %v7747_v2 }
 0x12c   :  { %v7752_v7 = vsub.f32 %v71_v25, %v169_v5  ;;  %v226_v8 = vsel %vm113_vm0, %v200_v6, 0.0 }
 0x12d   :  { %227 = vadd.xlane.f32.xlu1 %v226_v8  ;;  %v137_v9 = vpop.xlane.xlu1 %136  ;;  %v140_v11 = vpop.xlane.xlu0 %139 }
 0x12e   :  { %v170_v12 = vmul.f32 0.03125, %v137_v9  ;;  %v171_v14 = vmul.f32 0.03125, %v140_v11  ;;  %v201_v15 = vmul.f32 %v7752_v7, %v7752_v7 }
 0x130   :  { %v7758_v17 = vsub.f32 %v7699_v28, %v170_v12  ;;  %v7761_v18 = vsub.f32 %v7681_v10, %v171_v14  ;;  %v229_v19 = vsel %vm113_vm0, %v201_v15, 0.0  ;;  %v729_v14 = vld [vmem:[%s11227_s8] sm:$0xff] }
 0x131   :  { %v143_v21 = vpop.xlane.xlu1 %142  ;;  %230 = vadd.xlane.f32.xlu0 %v229_v19  ;;  %v146_v22 = vpop.xlane.xlu0 %145 }
 0x132   :  { %v172_v23 = vmul.f32 0.03125, %v143_v21  ;;  %v173_v25 = vmul.f32 0.03125, %v146_v22  ;;  %v202_v26 = vmul.f32 %v7758_v17, %v7758_v17  ;;  %v203_v27 = vmul.f32 %v7761_v18, %v7761_v18 }
 0x134   :  { %v7769_v30 = vsub.f32 %v7684_v13, %v172_v23  ;;  %v7772_v28 = vsub.f32 %v7687_v16, %v173_v25  ;;  %v232_v10 = vsel %vm113_vm0, %v202_v26, 0.0  ;;  %v235_v31 = vsel %vm113_vm0, %v203_v27, 0.0  ;;  %v370_v13 = vld [vmem:[%s11225_s4 + $0x8] sm:$0xff]  ;;  %v573_v16 = vld [vmem:[%s11226_s6] sm:$0xff] }
 0x135   :  { %233 = vadd.xlane.f32.xlu1 %v232_v10  ;;  %v149_v32 = vpop.xlane.xlu1 %148  ;;  %236 = vadd.xlane.f32.xlu0 %v235_v31  ;;  %v152_v34 = vpop.xlane.xlu0 %151  ;;  %v6931_v43 = vpack.c.bf16 %v370_v13, %v369_v35  ;;  %v6939_v44 = vpack.c.bf16 %v574_v41, %v573_v16  ;;  %v7845_v16 = vld [vmem:[%s11228_s2] ss:$0 sm:$0xff] }
 0x136   :  { %v174_v36 = vmul.f32 0.03125, %v149_v32  ;;  %v175_v37 = vmul.f32 0.03125, %v152_v34  ;;  %v204_v39 = vmul.f32 %v7769_v30, %v7769_v30  ;;  %v205_v40 = vmul.f32 %v7772_v28, %v7772_v28 }
 0x137   :  { %6932 = vmatprep.subr.bf16.mxu0 %v6931_v43  ;;  %6940 = vmatprep.subr.bf16.mxu1 %v6939_v44 }
 0x138   :  { %v7793_v45 = vsub.f32 %v7690_v20, %v174_v36  ;;  %v7796_v47 = vsub.f32 %v7694_v24, %v175_v37  ;;  %v238_v48 = vsel %vm113_vm0, %v204_v39, 0.0  ;;  %v241_v49 = vsel %vm113_vm0, %v205_v40, 0.0  ;;  %v372_v20 = vld [vmem:[%s11225_s4 + $0x18] sm:$0xff]  ;;  %6934 = vmatpush3.bf16.msra.mxu0 %v6931_v43  ;;  %6942 = vmatpush3.bf16.msra.mxu1 %v6939_v44  ;;  %v7851_v40 = vld [vmem:[%s11229_s3] ss:$0 sm:$0xff] }
 0x139   :  { %239 = vadd.xlane.f32.xlu1 %v238_v48  ;;  %v155_v50 = vpop.xlane.xlu1 %154  ;;  %242 = vadd.xlane.f32.xlu0 %v241_v49  ;;  %v158_v52 = vpop.xlane.xlu0 %157  ;;  %v6935_v60 = vpack.c.bf16 %v372_v20, %v371_v53  ;;  %v732_v53 = vld [vmem:[%s11227_s8 + $0x18] sm:$0xff] }
 0x13a   :  { %v176_v54 = vmul.f32 0.03125, %v155_v50  ;;  %v177_v55 = vmul.f32 0.03125, %v158_v52  ;;  %v206_v24 = vmul.f32 %v7793_v45, %v7793_v45  ;;  %v207_v57 = vmul.f32 %v7796_v47, %v7796_v47  ;;  %6944 = vmatprep.subr.bf16.mxu1 %v6943_v62 }
 0x13b   :  { %6936 = vmatprep.subr.bf16.mxu0 %v6935_v60 }
 0x13c   :  { %v7817_v63 = vsub.f32 %v7701_v29, %v176_v54  ;;  %v7820_v0 = vsub.f32 %v7709_v33, %v177_v55  ;;  %v244_v1 = vsel %vm113_vm0, %v206_v24, 0.0  ;;  %v247_v3 = vsel %vm113_vm0, %v207_v57, 0.0  ;;  %6938 = vmatpush3.bf16.msra.mxu0 %v6935_v60  ;;  %6946 = vmatpush3.bf16.msra.mxu1 %v6943_v62 }
 0x13d   :  { %245 = vadd.xlane.f32.xlu1 %v244_v1  ;;  %v161_v4 = vpop.xlane.xlu1 %160  ;;  %248 = vadd.xlane.f32.xlu0 %v247_v3 }
 0x13e   :  { %v178_v5 = vmul.f32 0.03125, %v161_v4  ;;  %v208_v6 = vmul.f32 %v7817_v63, %v7817_v63  ;;  %v209_v8 = vmul.f32 %v7820_v0, %v7820_v0 }
 0x140   :  { %v7829_v29 = vsub.f32 %v7719_v38, %v178_v5  ;;  %v250_v33 = vsel %vm113_vm0, %v208_v6, 0.0  ;;  %v253_v9 = vsel %vm113_vm0, %v209_v8, 0.0  ;;  %v730_v38 = vld [vmem:[%s11227_s8 + $0x8] sm:$0xff] }
 0x141   :  { %251 = vadd.xlane.f32.xlu1 %v250_v33  ;;  %254 = vadd.xlane.f32.xlu0 %v253_v9  ;;  %v6947_v15 = vpack.c.bf16 %v730_v38, %v729_v14 }
 0x142   :  { %v210_v11 = vmul.f32 %v7829_v29, %v7829_v29 }
 0x143   :  { %6948 = vmatprep.subr.bf16.mxu0 %v6947_v15 }
 0x144   :  { %v256_v12 = vsel %vm113_vm0, %v210_v11, 0.0 }
 0x145   :  { %257 = vadd.xlane.f32.xlu1 %v256_v12 }
 0x1a6   :  { %v213_v19 = vpop.xlane.xlu0 %212 }
 0x1a7   :  { %v259_v21 = vmul.f32 0.03125, %v213_v19 }
 0x1a9   :  { %v275_v22 = vadd.f32 1e-05, %v259_v21 }
 0x1aa   :  { %v216_v23 = vpop.xlane.xlu1 %215 }
 0x1ab   :  { %7046 = vrsqrt.f32 %v275_v22  ;;  %v260_v25 = vmul.f32 0.03125, %v216_v23 }
 0x1ad   :  { %v276_v26 = vadd.f32 1e-05, %v260_v25 }
 0x1ae   :  { %v219_v27 = vpop.xlane.xlu0 %218 }
 0x1af   :  { %7048 = vrsqrt.f32 %v276_v26  ;;  %v261_v10 = vmul.f32 0.03125, %v219_v27 }
 0x1b1   :  { %v277_v31 = vadd.f32 1e-05, %v261_v10 }
 0x1b2   :  { %v222_v32 = vpop.xlane.xlu1 %221 }
 0x1b3   :  { %7050 = vrsqrt.f32 %v277_v31  ;;  %v262_v34 = vmul.f32 0.03125, %v222_v32 }
 0x1b5   :  { %v7047_v35 = vpop.eup %7046  ;;  %v278_v13 = vadd.f32 1e-05, %v262_v34 }
 0x1b6   :  { %v225_v36 = vpop.xlane.xlu0 %224  ;;  %v307_v37 = vmul.f32 %v7047_v35, %v7723_v42  ;;  %v731_v42 = vld [vmem:[%s11227_s8 + $0x10] sm:$0xff] }
 0x1b7   :  { %7052 = vrsqrt.f32 %v278_v13  ;;  %v263_v39 = vmul.f32 0.03125, %v225_v36  ;;  %v6951_v58 = vpack.c.bf16 %v732_v53, %v731_v42 }
 0x1b8   :  { %v330_v41 = vmul.f32 %v7845_v16, %v307_v37 }
 0x1b9   :  { %v7049_v43 = vpop.eup %7048  ;;  %v279_v44 = vadd.f32 1e-05, %v263_v39 }
 0x1ba   :  { %v228_v48 = vpop.xlane.xlu1 %227  ;;  %v7855_v49 = vadd.f32 %v7851_v40, %v330_v41  ;;  %v308_v50 = vmul.f32 %v7049_v43, %v7727_v46 }
 0x1bb   :  { %7054 = vrsqrt.f32 %v279_v44  ;;  %v264_v52 = vmul.f32 0.03125, %v228_v48 }
 0x1bc   :  { %6363 = vmatprep.mubr.msk.f32.mxu0 %vm113_vm0, %v7855_v49  ;;  %6395 = vmatprep.mubr.msk.f32.mxu1 %vm113_vm0, %v7855_v49  ;;  %v331_v20 = vmul.f32 %v7845_v16, %v308_v50 }
 0x1bd   :  { %v7051_v54 = vpop.eup %7050  ;;  %v280_v46 = vadd.f32 1e-05, %v264_v52 }
 0x1be   :  { %v231_v55 = vpop.xlane.xlu0 %230  ;;  %v7870_v24 = vadd.f32 %v7851_v40, %v331_v20  ;;  %v309_v57 = vmul.f32 %v7051_v54, %v7732_v51 }
 0x1bf   :  { %7056 = vrsqrt.f32 %v280_v46  ;;  %v265_v59 = vmul.f32 0.03125, %v231_v55 }
 0x1c0   :  { %6364 = vmatmul.mubr.msk.f32.vlgmr.msra.gmra.mrb[0].mxu0 %vm113_vm0, %v7870_v24  ;;  %6396 = vmatmul.mubr.msk.f32.vlgmr.msra.gmra.mrb[0].mxu1 %vm113_vm0, %v7870_v24  ;;  %v332_v60 = vmul.f32 %v7845_v16, %v309_v57 }
 0x1c1   :  { %v7053_v62 = vpop.eup %7052  ;;  %v281_v1 = vadd.f32 1e-05, %v265_v59  ;;  %6950 = vmatpush3.bf16.msra.mxu0 %v6947_v15 }
 0x1c2   :  { %v234_v3 = vpop.xlane.xlu1 %233  ;;  %v237_v4 = vpop.xlane.xlu0 %236  ;;  %v7879_v5 = vadd.f32 %v7851_v40, %v332_v60  ;;  %v310_v51 = vmul.f32 %v7053_v62, %v7737_v56  ;;  %6952 = vmatprep.subr.bf16.mxu0 %v6951_v58 }
 0x1c3   :  { %7058 = vrsqrt.f32 %v281_v1  ;;  %v266_v6 = vmul.f32 0.03125, %v234_v3  ;;  %v267_v8 = vmul.f32 0.03125, %v237_v4 }
 0x1c4   :  { %6366 = vmatprep.mubr.msk.f32.mxu0 %vm113_vm0, %v7879_v5  ;;  %6398 = vmatprep.mubr.msk.f32.mxu1 %vm113_vm0, %v7879_v5  ;;  %v333_v33 = vmul.f32 %v7845_v16, %v310_v51 }
 0x1c5   :  { %v7055_v9 = vpop.eup %7054  ;;  %v282_v11 = vadd.f32 1e-05, %v266_v6  ;;  %v283_v12 = vadd.f32 1e-05, %v267_v8  ;;  %6954 = vmatpush3.bf16.msra.mxu0 %v6951_v58 }
 0x1c6   :  { %v240_v14 = vpop.xlane.xlu1 %239  ;;  %v243_v38 = vpop.xlane.xlu0 %242  ;;  %v7888_v56 = vadd.f32 %v7851_v40, %v333_v33  ;;  %v311_v15 = vmul.f32 %v7055_v9, %v7742_v61 }
 0x1c7   :  { %7060 = vrsqrt.f32 %v282_v11  ;;  %v268_v19 = vmul.f32 0.03125, %v240_v14  ;;  %v269_v21 = vmul.f32 0.03125, %v243_v38 }
 0x1c8   :  { %7062 = vrsqrt.f32 %v283_v12  ;;  %6367 = vmatmul.mubr.msk.f32.gmra.mrb[2].mxu0 %vm113_vm0, %v7888_v56  ;;  %6399 = vmatmul.mubr.msk.f32.gmra.mrb[2].mxu1 %vm113_vm0, %v7888_v56  ;;  %v334_v22 = vmul.f32 %v7845_v16, %v311_v15 }
 0x1c9   :  { %v7057_v23 = vpop.eup %7056  ;;  %v284_v25 = vadd.f32 1e-05, %v268_v19  ;;  %v285_v26 = vadd.f32 1e-05, %v269_v21 }
 0x1ca   :  { %v246_v27 = vpop.xlane.xlu1 %245  ;;  %v249_v10 = vpop.xlane.xlu0 %248  ;;  %v7897_v31 = vadd.f32 %v7851_v40, %v334_v22  ;;  %v312_v61 = vmul.f32 %v7057_v23, %v7747_v2 }
 0x1cb   :  { %7064 = vrsqrt.f32 %v284_v25  ;;  %v270_v32 = vmul.f32 0.03125, %v246_v27  ;;  %v271_v34 = vmul.f32 0.03125, %v249_v10 }
 0x1cc   :  { %7066 = vrsqrt.f32 %v285_v26  ;;  %6369 = vmatprep.mubr.msk.f32.mxu0 %vm113_vm0, %v7897_v31  ;;  %6401 = vmatprep.mubr.msk.f32.mxu1 %vm113_vm0, %v7897_v31  ;;  %v335_v35 = vmul.f32 %v7845_v16, %v312_v61 }
 0x1cd   :  { %v7059_v13 = vpop.eup %7058  ;;  %v286_v36 = vadd.f32 1e-05, %v270_v32  ;;  %v287_v37 = vadd.f32 1e-05, %v271_v34 }
 0x1ce   :  { %v252_v39 = vpop.xlane.xlu1 %251  ;;  %v255_v41 = vpop.xlane.xlu0 %254  ;;  %v7906_v43 = vadd.f32 %v7851_v40, %v335_v35  ;;  %v313_v2 = vmul.f32 %v7059_v13, %v7752_v7 }
 0x1cf   :  { %7068 = vrsqrt.f32 %v286_v36  ;;  %v272_v44 = vmul.f32 0.03125, %v252_v39  ;;  %v273_v48 = vmul.f32 0.03125, %v255_v41 }
 0x1d0   :  { %7070 = vrsqrt.f32 %v287_v37  ;;  %6370 = vmatmul.mubr.msk.f32.gmra.mrb[4].mxu0 %vm113_vm0, %v7906_v43  ;;  %6402 = vmatmul.mubr.msk.f32.gmra.mrb[4].mxu1 %vm113_vm0, %v7906_v43  ;;  %v336_v50 = vmul.f32 %v7845_v16, %v313_v2 }
 0x1d1   :  { %v7061_v52 = vpop.eup %7060  ;;  %v288_v42 = vadd.f32 1e-05, %v272_v44  ;;  %v289_v53 = vadd.f32 1e-05, %v273_v48  ;;  %v8017_v48 = vld [vmem:[%s11231_s7] ss:$0 sm:$0xff] }
 0x1d2   :  { %v7063_v20 = vpop.eup %7062  ;;  %v258_v54 = vpop.xlane.xlu1 %257  ;;  %v7915_v46 = vadd.f32 %v7851_v40, %v336_v50  ;;  %v314_v7 = vmul.f32 %v7061_v52, %v7758_v17  ;;  %v8026_v52 = vld [vmem:[%s11232_s5] ss:$0 sm:$0xff] }
 0x1d3   :  { %7072 = vrsqrt.f32 %v288_v42  ;;  %v274_v55 = vmul.f32 0.03125, %v258_v54  ;;  %v315_v57 = vmul.f32 %v7063_v20, %v7761_v18 }
 0x1d4   :  { %7074 = vrsqrt.f32 %v289_v53  ;;  %6372 = vmatprep.mubr.msk.f32.mxu0 %vm113_vm0, %v7915_v46  ;;  %6404 = vmatprep.mubr.msk.f32.mxu1 %vm113_vm0, %v7915_v46  ;;  %v337_v58 = vmul.f32 %v7845_v16, %v314_v7 }
 0x1d5   :  { %v7065_v59 = vpop.eup %7064  ;;  %v290_v60 = vadd.f32 1e-05, %v274_v55  ;;  %v338_v62 = vmul.f32 %v7845_v16, %v315_v57 }
 0x1d6   :  { %v7067_v1 = vpop.eup %7066  ;;  %v360_v17 = vadd.f32 %v7851_v40, %v337_v58  ;;  %v316_v3 = vmul.f32 %v7065_v59, %v7769_v30 }
 0x1d7   :  { %7076 = vrsqrt.f32 %v290_v60  ;;  %v361_v18 = vadd.f32 %v7851_v40, %v338_v62  ;;  %v317_v4 = vmul.f32 %v7067_v1, %v7772_v28 }
 0x1d8   :  { %6373 = vmatmul.mubr.msk.f32.gmra.mrb[6].mxu0 %vm113_vm0, %v360_v17  ;;  %6405 = vmatmul.mubr.msk.f32.gmra.mrb[6].mxu1 %vm113_vm0, %v360_v17  ;;  %v339_v51 = vmul.f32 %v7845_v16, %v316_v3 }
 0x1d9   :  { %v7069_v6 = vpop.eup %7068  ;;  %6375 = vmatprep.mubr.msk.f32.mxu0 %vm113_vm0, %v361_v18  ;;  %6407 = vmatprep.mubr.msk.f32.mxu1 %vm113_vm0, %v361_v18  ;;  %v340_v8 = vmul.f32 %v7845_v16, %v317_v4 }
 0x1da   :  { %v7071_v33 = vpop.eup %7070  ;;  %v362_v30 = vadd.f32 %v7851_v40, %v339_v51  ;;  %v318_v9 = vmul.f32 %v7069_v6, %v7793_v45 }
 0x1db   :  { %v363_v28 = vadd.f32 %v7851_v40, %v340_v8  ;;  %v319_v11 = vmul.f32 %v7071_v33, %v7796_v47 }
 0x1dc   :  { %6376 = vmatmul.mubr.msk.f32.gmra.mrb[8].mxu0 %vm113_vm0, %v362_v30  ;;  %6408 = vmatmul.mubr.msk.f32.gmra.mrb[8].mxu1 %vm113_vm0, %v362_v30  ;;  %v341_v12 = vmul.f32 %v7845_v16, %v318_v9 }
 0x1dd   :  { %v7073_v14 = vpop.eup %7072  ;;  %6378 = vmatprep.mubr.msk.f32.mxu0 %vm113_vm0, %v363_v28  ;;  %6410 = vmatprep.mubr.msk.f32.mxu1 %vm113_vm0, %v363_v28  ;;  %v342_v38 = vmul.f32 %v7845_v16, %v319_v11 }
 0x1de   :  { %v7075_v15 = vpop.eup %7074  ;;  %v364_v45 = vadd.f32 %v7851_v40, %v341_v12  ;;  %v320_v19 = vmul.f32 %v7073_v14, %v7817_v63 }
 0x1df   :  { %v365_v47 = vadd.f32 %v7851_v40, %v342_v38  ;;  %v321_v21 = vmul.f32 %v7075_v15, %v7820_v0 }
 0x1e0   :  { %6379 = vmatmul.mubr.msk.f32.gmra.mrb[10].mxu0 %vm113_vm0, %v364_v45  ;;  %6411 = vmatmul.mubr.msk.f32.gmra.mrb[10].mxu1 %vm113_vm0, %v364_v45  ;;  %v343_v22 = vmul.f32 %v7845_v16, %v320_v19 }
 0x1e1   :  { %v7077_v23 = vpop.eup %7076  ;;  %6381 = vmatprep.mubr.msk.f32.mxu0 %vm113_vm0, %v365_v47  ;;  %6413 = vmatprep.mubr.msk.f32.mxu1 %vm113_vm0, %v365_v47  ;;  %v344_v25 = vmul.f32 %v7845_v16, %v321_v21 }
 0x1e2   :  { %v366_v26 = vadd.f32 %v7851_v40, %v343_v22  ;;  %v322_v63 = vmul.f32 %v7077_v23, %v7829_v29  ;;  %v7590_v29 = vmov 1966171168  }
 0x1e3   :  { %v367_v27 = vadd.f32 %v7851_v40, %v344_v25 }
 0x1e4   :  { %6382 = vmatmul.mubr.msk.f32.gmra.mrb[12].mxu0 %vm113_vm0, %v366_v26  ;;  %6414 = vmatmul.mubr.msk.f32.gmra.mrb[12].mxu1 %vm113_vm0, %v366_v26  ;;  %v345_v0 = vmul.f32 %v7845_v16, %v322_v63  ;;  %v889_v16 = vunpack.c.l.s4 %v7590_v29 }
 0x1e5   :  { %6384 = vmatprep.mubr.msk.f32.mxu0 %vm113_vm0, %v367_v27  ;;  %6416 = vmatprep.mubr.msk.f32.mxu1 %vm113_vm0, %v367_v27 }
 0x1e6   :  { %v368_v10 = vadd.f32 %v7851_v40, %v345_v0  ;;  %v891_v40 = vlaneseq }
 0x1e8   :  { %6385 = vmatmul.mubr.msk.f32.gmra.mrb[14].mxu0 %vm113_vm0, %v368_v10  ;;  %6417 = vmatmul.mubr.msk.f32.gmra.mrb[14].mxu1 %vm113_vm0, %v368_v10 }
 0x1e9   :  { %6427 = vmatprep.mubr.msk.f32.mxu0 %vm113_vm0, %v7855_v49  ;;  %v890_v49 = vunpack.c.0.s8 %v889_v16 }
 0x1ec   :  { %6428 = vmatmul.mubr.msk.f32.vlgmr.msra.gmra.mrb[16].mxu0 %vm113_vm0, %v7870_v24  ;;  %v892_v24 = vshrl.u32 %v891_v40, 7 }
 0x1ed   :  { %6430 = vmatprep.mubr.msk.f32.mxu0 %vm113_vm0, %v7879_v5  ;;  %v885_v5 = vld [vmem:[%s11230_s1] sm:$0xff] }
 0x1ee   :  { %v7996_v35 = vsub.s32 0, %v892_v24 }
 0x1f0   :  { %6431 = vmatmul.mubr.msk.f32.gmra.mrb[18].mxu0 %vm113_vm0, %v7888_v56  ;;  %v7992_v56 = vsub.s32 %v890_v49, %v892_v24 }
 0x1f1   :  { %6433 = vmatprep.mubr.msk.f32.mxu0 %vm113_vm0, %v7897_v31  ;;  %v887_v31 = vcombine.high %v885_v5, %v885_v5 }
 0x1f2   :  { %v8012_v44 = vrot.slane %v885_v5, %v7992_v56 }
 0x1f3   :  { %v901_v61 = vrot.slane %v887_v31, %v7992_v56 }
 0x1f4   :  { %6434 = vmatmul.mubr.msk.f32.gmra.mrb[20].mxu0 %vm113_vm0, %v7906_v43  ;;  %v8021_v50 = vrot.slane %v8012_v44, %v7992_v56 }
 0x1f5   :  { %6436 = vmatprep.mubr.msk.f32.mxu0 %vm113_vm0, %v7915_v46  ;;  %v917_v32 = vrot.slane %v901_v61, %v7992_v56  ;;  %v903_v34 = vcombine.high %v901_v61, %v901_v61 }
 0x1f6   :  { %v8030_v20 = vrot.slane %v8021_v50, %v7996_v35 }
 0x1f7   :  { %v931_v13 = vrot.slane %v903_v34, %v7992_v56  ;;  %v8000_v36 = vrot.slane %v917_v32, %v7996_v35  ;;  %v933_v39 = vcombine.high %v917_v32, %v917_v32 }
 0x1f8   :  { %6437 = vmatmul.mubr.msk.f32.gmra.mrb[22].mxu0 %vm113_vm0, %v360_v17  ;;  %11465 = vst [vmem:[#allocation6_spill] sm:$0xff] %v8030_v20 }
 0x1f9   :  { %6439 = vmatprep.mubr.msk.f32.mxu0 %vm113_vm0, %v361_v18  ;;  %11461 = vst [vmem:[#allocation2_spill] sm:$0xff] %v8000_v36  ;;  %v8003_v37 = vrot.slane %v931_v13, %v7996_v35  ;;  %v8006_v41 = vrot.slane %v933_v39, %v7996_v35  ;;  %v935_v43 = vcombine.high %v931_v13, %v931_v13 }
 0x1fb   :  { %11462 = vst [vmem:[#allocation3_spill] sm:$0xff] %v8003_v37  ;;  %11463 = vst [vmem:[#allocation4_spill] sm:$0xff] %v8006_v41  ;;  %v8009_v2 = vrot.slane %v935_v43, %v7996_v35 }
 0x1fc   :  { %6440 = vmatmul.mubr.msk.f32.gmra.mrb[24].mxu0 %vm113_vm0, %v362_v30 }
 0x1fd   :  { %6442 = vmatprep.mubr.msk.f32.mxu0 %vm113_vm0, %v363_v28  ;;  %11464 = vst [vmem:[#allocation5_spill] sm:$0xff] %v8009_v2 }
 0x200   :  { %6443 = vmatmul.mubr.msk.f32.gmra.mrb[26].mxu0 %vm113_vm0, %v364_v45 }
 0x201   :  { %6445 = vmatprep.mubr.msk.f32.mxu0 %vm113_vm0, %v365_v47 }
 0x204   :  { %6446 = vmatmul.mubr.msk.f32.gmra.mrb[28].mxu0 %vm113_vm0, %v366_v26 }
 0x205   :  { %6448 = vmatprep.mubr.msk.f32.mxu0 %vm113_vm0, %v367_v27 }
 0x208   :  { %6449 = vmatmul.mubr.msk.f32.gmra.mrb[30].mxu0 %vm113_vm0, %v368_v10 }
 0x293   :  { %v6365_v42 = vpop.f32.mrb[0].mxu0  ;;  %v6397_v53 = vpop.f32.mrb[0].mxu1 }
 0x294   :  { %v656_v54 = vadd.f32 %v6397_v53, %v8017_v48  ;;  %v494_v46 = vpop.f32.mrb[1].mxu0  ;;  %v650_v7 = vpop.f32.mrb[1].mxu1  ;;  %v8078_v0 = vadd.f32 %v6365_v42, %v8026_v52 }
 0x295   :  { %v8034_v55 = vadd.f32 %v8026_v52, %v494_v46  ;;  %v651_v57 = vadd.f32 %v8017_v48, %v650_v7 }
 0x296   :  { %v977_v42 = vmul.f32 %v8030_v20, %v8078_v0 }
 0x297   :  { %v6955_v59 = vpack.c.bf16 %v656_v54, %v651_v57  ;;  %v976_v60 = vmul.f32 %v8030_v20, %v8034_v55 }
 0x299   :  { %6957 = vmatprep.subr.msk.bf16.mxu1 %vm8039_vm1, %v6955_v59  ;;  %6467 = vmatprep.mubr.msk.f32.mxu1 %vm113_vm0, %v976_v60 }
 0x29a   :  { %6960 = vmatpush3.bf16.xpose.msk.msra.mxu1 %vm8039_vm1, %v6955_v59 }
 0x29b   :  { %v6368_v62 = vpop.f32.mrb[2].mxu0  ;;  %v6400_v1 = vpop.f32.mrb[2].mxu1 }
 0x29c   :  { %v666_v17 = vadd.f32 %v6400_v1, %v8017_v48  ;;  %v504_v3 = vpop.f32.mrb[3].mxu0  ;;  %v660_v18 = vpop.f32.mrb[3].mxu1  ;;  %v8098_v34 = vadd.f32 %v6368_v62, %v8026_v52  ;;  %v902_v1 = vcombine.high %v8012_v44, %v8012_v44 }
 0x29d   :  { %v661_v4 = vadd.f32 %v8017_v48, %v660_v18  ;;  %v8083_v49 = vadd.f32 %v8026_v52, %v504_v3 }
 0x29f   :  { %v6961_v51 = vpack.c.bf16 %v666_v17, %v661_v4  ;;  %v978_v59 = vmul.f32 %v8030_v20, %v8083_v49 }
 0x2a1   :  { %6963 = vmatprep.subr.msk.bf16.mxu1 %vm8039_vm1, %v6961_v51 }
 0x2a2   :  { %6966 = vmatpush3.bf16.xpose.msk.msra.mxu1 %vm8039_vm1, %v6961_v51  ;;  %v979_v51 = vmul.f32 %v8030_v20, %v8098_v34 }
 0x2a3   :  { %v6371_v6 = vpop.f32.mrb[4].mxu0  ;;  %v6403_v8 = vpop.f32.mrb[4].mxu1 }
 0x2a4   :  { %v676_v33 = vadd.f32 %v6403_v8, %v8017_v48  ;;  %v514_v30 = vpop.f32.mrb[5].mxu0  ;;  %v670_v9 = vpop.f32.mrb[5].mxu1  ;;  %v8122_v17 = vadd.f32 %v6371_v6, %v8026_v52 }
 0x2a5   :  { %v671_v28 = vadd.f32 %v8017_v48, %v670_v9  ;;  %v8103_v53 = vadd.f32 %v8026_v52, %v514_v30 }
 0x2a7   :  { %v6967_v11 = vpack.c.bf16 %v676_v33, %v671_v28  ;;  %v980_v44 = vmul.f32 %v8030_v20, %v8103_v53 }
 0x2a9   :  { %6969 = vmatprep.subr.msk.bf16.mxu1 %vm8039_vm1, %v6967_v11 }
 0x2aa   :  { %6972 = vmatpush3.bf16.xpose.msk.msra.mxu1 %vm8039_vm1, %v6967_v11 }
 0x2ab   :  { %v8062_v12 = vpop.f32.mrb[6].mxu0  ;;  %v6406_v14 = vpop.f32.mrb[6].mxu1 }
 0x2ac   :  { %v686_v38 = vadd.f32 %v6406_v14, %v8017_v48  ;;  %v524_v15 = vpop.f32.mrb[7].mxu0  ;;  %v680_v45 = vpop.f32.mrb[7].mxu1  ;;  %v8143_v14 = vld [vmem:[%s11233_s9] ss:$0 sm:$0xff] }
 0x2ad   :  { %v681_v19 = vadd.f32 %v8017_v48, %v680_v45  ;;  %v8127_v8 = vadd.f32 %v8026_v52, %v524_v15  ;;  %v8153_v15 = vadd.f32 %v8062_v12, %v8026_v52 }
 0x2af   :  { %v6973_v47 = vpack.c.bf16 %v686_v38, %v681_v19  ;;  %v8066_v21 = vpop.f32.mrb[8].mxu0  ;;  %v6409_v22 = vpop.f32.mrb[8].mxu1  ;;  %v8149_v38 = vrot.slane %v902_v1, %v7992_v56  ;;  %v981_v19 = vmul.f32 %v8030_v20, %v8122_v17 }
 0x2b0   :  { %v696_v23 = vadd.f32 %v6409_v22, %v8017_v48  ;;  %v534_v25 = vpop.f32.mrb[9].mxu0  ;;  %v690_v26 = vpop.f32.mrb[9].mxu1 }
 0x2b1   :  { %v8070_v63 = vadd.f32 %v8026_v52, %v534_v25  ;;  %v691_v27 = vadd.f32 %v8017_v48, %v690_v26  ;;  %6975 = vmatprep.subr.msk.bf16.mxu1 %vm8039_vm1, %v6973_v47  ;;  %v8164_v56 = vrot.slane %v8149_v38, %v7996_v35 }
 0x2b2   :  { %6978 = vmatpush3.bf16.xpose.msk.msra.mxu1 %vm8039_vm1, %v6973_v47 }
 0x2b3   :  { %v6979_v10 = vpack.c.bf16 %v696_v23, %v691_v27  ;;  %v6380_v29 = vpop.f32.mrb[10].mxu0  ;;  %v6412_v16 = vpop.f32.mrb[10].mxu1  ;;  %v1040_v40 = vmul.f32 %v8030_v20, %v8070_v63  ;;  %v982_v23 = vmul.f32 %v8030_v20, %v8127_v8  ;;  %11468 = vst [vmem:[#allocation7_spill] sm:$0xff] %v8164_v56  ;;  %v983_v27 = vmul.f32 %v8030_v20, %v8153_v15 }
 0x2b4   :  { %v8086_v24 = vadd.f32 %v6380_v29, %v8026_v52  ;;  %v706_v5 = vadd.f32 %v6412_v16, %v8017_v48  ;;  %v8089_v31 = vpop.f32.mrb[11].mxu0  ;;  %v700_v61 = vpop.f32.mrb[11].mxu1  ;;  %v984_v16 = vmul.f32 %v8164_v56, %v8034_v55  ;;  %v988_v1 = vmul.f32 %v8164_v56, %v8103_v53 }
 0x2b5   :  { %v701_v32 = vadd.f32 %v8017_v48, %v700_v61  ;;  %6981 = vmatprep.subr.msk.bf16.mxu0 %vm8039_vm1, %v6979_v10  ;;  %6579 = vmatprep.mubr.msk.f32.mxu0 %vm113_vm0, %v1040_v40  ;;  %v8215_v58 = vadd.f32 %v8026_v52, %v8089_v31 }
 0x2b6   :  { %6984 = vmatpush3.bf16.xpose.msk.msra.mxu0 %vm8039_vm1, %v6979_v10 }
 0x2b7   :  { %v6985_v13 = vpack.c.bf16 %v706_v5, %v701_v32  ;;  %v6383_v39 = vpop.f32.mrb[12].mxu0  ;;  %v6415_v43 = vpop.f32.mrb[12].mxu1  ;;  %v985_v32 = vmul.f32 %v8164_v56, %v8078_v0 }
 0x2b8   :  { %v8106_v54 = vadd.f32 %v6383_v39, %v8026_v52  ;;  %v716_v46 = vadd.f32 %v6415_v43, %v8017_v48  ;;  %v554_v7 = vpop.f32.mrb[13].mxu0  ;;  %v710_v57 = vpop.f32.mrb[13].mxu1  ;;  %v986_v43 = vmul.f32 %v8164_v56, %v8083_v49 }
 0x2b9   :  { %v8112_v60 = vadd.f32 %v8026_v52, %v554_v7  ;;  %v711_v62 = vadd.f32 %v8017_v48, %v710_v57  ;;  %6468 = vmatmul.mubr.msk.f32.vlgmr.msra.gmra.mrb[16].mxu1 %vm113_vm0, %v977_v42  ;;  %6987 = vmatprep.subr.msk.bf16.mxu0 %vm8039_vm1, %v6985_v13  ;;  %v987_v57 = vmul.f32 %v8164_v56, %v8098_v34 }
 0x2ba   :  { %6470 = vmatprep.mubr.msk.f32.mxu1 %vm113_vm0, %v978_v59 }
 0x2bb   :  { %v6991_v3 = vpack.c.bf16 %v716_v46, %v711_v62  ;;  %v6386_v18 = vpop.f32.mrb[14].mxu0  ;;  %v6418_v4 = vpop.f32.mrb[14].mxu1 }
 0x2bc   :  { %v8130_v33 = vadd.f32 %v6386_v18, %v8026_v52  ;;  %v726_v30 = vadd.f32 %v6418_v4, %v8017_v48  ;;  %v564_v9 = vpop.f32.mrb[15].mxu0  ;;  %v720_v28 = vpop.f32.mrb[15].mxu1  ;;  %v8203_v4 = vadd.f32 %v8066_v21, %v8026_v52 }
 0x2bd   :  { %v8136_v6 = vadd.f32 %v8026_v52, %v564_v9  ;;  %v721_v11 = vadd.f32 %v8017_v48, %v720_v28  ;;  %6471 = vmatmul.mubr.msk.f32.gmra.mrb[18].mxu1 %vm113_vm0, %v979_v51 }
 0x2be   :  { %6473 = vmatprep.mubr.msk.f32.mxu1 %vm113_vm0, %v980_v44  ;;  %6990 = vmatpush3.bf16.xpose.msk.msra.mxu0 %vm8039_vm1, %v6985_v13  ;;  %v990_v44 = vmul.f32 %v8164_v56, %v8127_v8 }
 0x2bf   :  { %v6997_v48 = vpack.c.bf16 %v726_v30, %v721_v11  ;;  %v6429_v45 = vpop.f32.mrb[16].mxu0  ;;  %6993 = vmatprep.subr.msk.bf16.mxu0 %vm8039_vm1, %v6991_v3 }
 0x2c0   :  { %v812_v47 = vadd.f32 %v6429_v45, %v8143_v14  ;;  %v806_v22 = vpop.f32.mrb[17].mxu0 }
 0x2c1   :  { %v807_v12 = vadd.f32 %v8143_v14, %v806_v22  ;;  %6474 = vmatmul.mubr.msk.f32.gmra.mrb[20].mxu1 %vm113_vm0, %v981_v19  ;;  %v991_v19 = vmul.f32 %v8164_v56, %v8153_v15 }
 0x2c2   :  { %6476 = vmatprep.mubr.msk.f32.mxu1 %vm113_vm0, %v982_v23 }
 0x2c3   :  { %v7003_v25 = vpack.c.bf16 %v812_v47, %v807_v12  ;;  %v6432_v26 = vpop.f32.mrb[18].mxu0  ;;  %v1041_v47 = vmul.f32 %v8030_v20, %v8203_v4  ;;  %v1042_v12 = vmul.f32 %v8030_v20, %v8215_v58 }
 0x2c4   :  { %v822_v10 = vadd.f32 %v6432_v26, %v8143_v14  ;;  %v816_v29 = vpop.f32.mrb[19].mxu0 }
 0x2c5   :  { %v817_v40 = vadd.f32 %v8143_v14, %v816_v29  ;;  %6477 = vmatmul.mubr.msk.f32.gmra.mrb[22].mxu1 %vm113_vm0, %v983_v27  ;;  %7004 = vmatprep.subr.bf16.mxu1 %v7003_v25 }
 0x2c6   :  { %6479 = vmatprep.mubr.msk.f32.mxu1 %vm113_vm0, %v984_v16  ;;  %6996 = vmatpush3.bf16.xpose.msk.msra.mxu0 %vm8039_vm1, %v6991_v3  ;;  %v932_v3 = vcombine.high %v8021_v50, %v8021_v50  ;;  %v989_v50 = vmul.f32 %v8164_v56, %v8122_v17 }
 0x2c7   :  { %v7007_v5 = vpack.c.bf16 %v822_v10, %v817_v40  ;;  %7006 = vmatpush3.bf16.msra.mxu1 %v7003_v25  ;;  %v6435_v61 = vpop.f32.mrb[20].mxu0  ;;  %6999 = vmatprep.subr.msk.bf16.mxu0 %vm8039_vm1, %v6997_v48  ;;  %v1043_v10 = vmul.f32 %v8030_v20, %v8086_v24 }
 0x2c8   :  { %v832_v13 = vadd.f32 %v6435_v61, %v8143_v14  ;;  %v826_v39 = vpop.f32.mrb[21].mxu0  ;;  %v8211_v11 = vrot.slane %v932_v3, %v7996_v35  ;;  %v1044_v61 = vmul.f32 %v8030_v20, %v8112_v60 }
 0x2c9   :  { %v827_v42 = vadd.f32 %v8143_v14, %v826_v39  ;;  %6480 = vmatmul.mubr.msk.f32.gmra.mrb[24].mxu1 %vm113_vm0, %v985_v32  ;;  %7008 = vmatprep.subr.bf16.mxu1 %v7007_v5 }
 0x2ca   :  { %6482 = vmatprep.mubr.msk.f32.mxu1 %vm113_vm0, %v986_v43  ;;  %11469 = vst [vmem:[#allocation8_spill] sm:$0xff] %v8211_v11  ;;  %v992_v31 = vmul.f32 %v8211_v11, %v8034_v55  ;;  %v993_v27 = vmul.f32 %v8211_v11, %v8078_v0  ;;  %v994_v40 = vmul.f32 %v8211_v11, %v8083_v49 }
 0x2cb   :  { %v7011_v46 = vpack.c.bf16 %v832_v13, %v827_v42  ;;  %7010 = vmatpush3.bf16.msra.mxu1 %v7007_v5  ;;  %v6438_v7 = vpop.f32.mrb[22].mxu0  ;;  %v995_v39 = vmul.f32 %v8211_v11, %v8098_v34  ;;  %v1045_v43 = vmul.f32 %v8030_v20, %v8106_v54  ;;  %v997_v3 = vmul.f32 %v8211_v11, %v8122_v17 }
 0x2cc   :  { %v842_v59 = vadd.f32 %v6438_v7, %v8143_v14  ;;  %v836_v62 = vpop.f32.mrb[23].mxu0  ;;  %v996_v7 = vmul.f32 %v8211_v11, %v8103_v53 }
 0x2cd   :  { %v837_v18 = vadd.f32 %v8143_v14, %v836_v62  ;;  %6483 = vmatmul.mubr.msk.f32.gmra.mrb[26].mxu1 %vm113_vm0, %v987_v57  ;;  %7012 = vmatprep.subr.bf16.mxu1 %v7011_v46  ;;  %v934_v57 = vcombine.high %v8149_v38, %v8149_v38  ;;  %v1046_v62 = vmul.f32 %v8030_v20, %v8136_v6 }
 0x2ce   :  { %6485 = vmatprep.mubr.msk.f32.mxu1 %vm113_vm0, %v988_v1  ;;  %7002 = vmatpush3.bf16.xpose.msk.msra.mxu0 %vm8039_vm1, %v6997_v48  ;;  %v998_v38 = vmul.f32 %v8211_v11, %v8127_v8 }
 0x2cf   :  { %v7015_v51 = vpack.c.bf16 %v842_v59, %v837_v18  ;;  %7014 = vmatpush3.bf16.msra.mxu1 %v7011_v46  ;;  %v6441_v30 = vpop.f32.mrb[24].mxu0  ;;  %v8271_v18 = vrot.slane %v934_v57, %v7996_v35  ;;  %v1049_v35 = vmul.f32 %v8164_v56, %v8203_v4  ;;  %v1015_v57 = vmul.f32 %v8000_v36, %v8153_v15 }
 0x2d0   :  { %v852_v9 = vadd.f32 %v6441_v30, %v8143_v14  ;;  %v846_v28 = vpop.f32.mrb[25].mxu0  ;;  %v999_v30 = vmul.f32 %v8211_v11, %v8153_v15 }
 0x2d1   :  { %v847_v21 = vadd.f32 %v8143_v14, %v846_v28  ;;  %6486 = vmatmul.mubr.msk.f32.gmra.mrb[28].mxu1 %vm113_vm0, %v989_v50  ;;  %7016 = vmatprep.subr.bf16.mxu1 %v7015_v51  ;;  %11470 = vst [vmem:[#allocation9_spill] sm:$0xff] %v8271_v18  ;;  %v1000_v50 = vmul.f32 %v8271_v18, %v8034_v55 }
 0x2d2   :  { %6488 = vmatprep.mubr.msk.f32.mxu1 %vm113_vm0, %v990_v44  ;;  %v1001_v28 = vmul.f32 %v8271_v18, %v8078_v0  ;;  %v1051_v44 = vmul.f32 %v8164_v56, %v8086_v24 }
 0x2d3   :  { %v7019_v48 = vpack.c.bf16 %v852_v9, %v847_v21  ;;  %7018 = vmatpush3.bf16.msra.mxu1 %v7015_v51  ;;  %v6444_v45 = vpop.f32.mrb[26].mxu0  ;;  %v1048_v51 = vmul.f32 %v8164_v56, %v8070_v63  ;;  %v1050_v9 = vmul.f32 %v8164_v56, %v8215_v58  ;;  %v1002_v21 = vmul.f32 %v8271_v18, %v8083_v49 }
 0x2d4   :  { %v862_v22 = vadd.f32 %v6444_v45, %v8143_v14  ;;  %v856_v52 = vpop.f32.mrb[27].mxu0  ;;  %v1003_v45 = vmul.f32 %v8271_v18, %v8098_v34 }
 0x2d5   :  { %v857_v23 = vadd.f32 %v8143_v14, %v856_v52  ;;  %6489 = vmatmul.mubr.msk.f32.gmra.mrb[30].mxu1 %vm113_vm0, %v991_v19  ;;  %6580 = vmatmul.mubr.msk.f32.vlgmr.msra.gmra.mrb[32].mxu0 %vm113_vm0, %v1041_v47  ;;  %v1053_v19 = vmul.f32 %v8164_v56, %v8106_v54  ;;  %v1004_v47 = vmul.f32 %v8271_v18, %v8103_v53 }
 0x2d6   :  { %7020 = vmatprep.subr.bf16.mxu0 %v7019_v48  ;;  %6491 = vmatprep.mubr.msk.f32.mxu1 %vm113_vm0, %v992_v31  ;;  %v1005_v52 = vmul.f32 %v8271_v18, %v8122_v17  ;;  %v1055_v31 = vmul.f32 %v8164_v56, %v8130_v33 }
 0x2d7   :  { %v7023_v25 = vpack.c.bf16 %v862_v22, %v857_v23  ;;  %6582 = vmatprep.mubr.msk.f32.mxu0 %vm113_vm0, %v1042_v12  ;;  %7022 = vmatpush3.bf16.msra.mxu0 %v7019_v48  ;;  %v6447_v26 = vpop.f32.mrb[28].mxu0  ;;  %v1052_v48 = vmul.f32 %v8164_v56, %v8112_v60  ;;  %v1054_v22 = vmul.f32 %v8164_v56, %v8136_v6 }
 0x2d8   :  { %v872_v29 = vadd.f32 %v6447_v26, %v8143_v14  ;;  %v866_v16 = vpop.f32.mrb[29].mxu0  ;;  %v1006_v23 = vmul.f32 %v8271_v18, %v8127_v8  ;;  %v1056_v12 = vmul.f32 %v8211_v11, %v8070_v63  ;;  %v1057_v26 = vmul.f32 %v8211_v11, %v8203_v4 }
 0x2d9   :  { %v867_v5 = vadd.f32 %v8143_v14, %v866_v16  ;;  %6492 = vmatmul.mubr.msk.f32.gmra.mrb[32].mxu1 %vm113_vm0, %v993_v27  ;;  %6583 = vmatmul.mubr.msk.f32.gmra.mrb[34].mxu0 %vm113_vm0, %v1043_v10  ;;  %v1008_v27 = vmul.f32 %v8000_v36, %v8034_v55  ;;  %v1058_v10 = vmul.f32 %v8211_v11, %v8215_v58 }
 0x2da   :  { %7024 = vmatprep.subr.bf16.mxu0 %v7023_v25  ;;  %6494 = vmatprep.mubr.msk.f32.mxu1 %vm113_vm0, %v994_v40  ;;  %v1059_v16 = vmul.f32 %v8211_v11, %v8086_v24  ;;  %v1010_v40 = vmul.f32 %v8000_v36, %v8083_v49 }
 0x2db   :  { %v7027_v32 = vpack.c.bf16 %v872_v29, %v867_v5  ;;  %6585 = vmatprep.mubr.msk.f32.mxu0 %vm113_vm0, %v1044_v61  ;;  %7026 = vmatpush3.bf16.msra.mxu0 %v7023_v25  ;;  %v6450_v13 = vpop.f32.mrb[30].mxu0  ;;  %v1007_v25 = vmul.f32 %v8271_v18, %v8153_v15  ;;  %v1009_v29 = vmul.f32 %v8000_v36, %v8078_v0 }
 0x2dc   :  { %v882_v42 = vadd.f32 %v6450_v13, %v8143_v14  ;;  %v876_v46 = vpop.f32.mrb[31].mxu0  ;;  %v1060_v5 = vmul.f32 %v8211_v11, %v8112_v60  ;;  %v1011_v61 = vmul.f32 %v8000_v36, %v8098_v34  ;;  %v1012_v13 = vmul.f32 %v8000_v36, %v8103_v53 }
 0x2dd   :  { %v877_v59 = vadd.f32 %v8143_v14, %v876_v46  ;;  %6495 = vmatmul.mubr.msk.f32.gmra.mrb[34].mxu1 %vm113_vm0, %v995_v39  ;;  %6586 = vmatmul.mubr.msk.f32.gmra.mrb[36].mxu0 %vm113_vm0, %v1045_v43  ;;  %v1047_v14 = vmul.f32 %v8030_v20, %v8130_v33  ;;  %v1062_v39 = vmul.f32 %v8211_v11, %v8136_v6 }
 0x2de   :  { %7028 = vmatprep.subr.bf16.mxu0 %v7027_v32  ;;  %6497 = vmatprep.mubr.msk.f32.mxu1 %vm113_vm0, %v996_v7  ;;  %v1013_v43 = vmul.f32 %v8000_v36, %v8122_v17  ;;  %v1014_v46 = vmul.f32 %v8000_v36, %v8127_v8  ;;  %v1064_v7 = vmul.f32 %v8271_v18, %v8070_v63 }
 0x2df   :  { %v7031_v1 = vpack.c.bf16 %v882_v42, %v877_v59  ;;  %6588 = vmatprep.mubr.msk.f32.mxu0 %vm113_vm0, %v1046_v62  ;;  %7030 = vmatpush3.bf16.msra.mxu0 %v7027_v32  ;;  %v1061_v32 = vmul.f32 %v8211_v11, %v8106_v54  ;;  %v1063_v42 = vmul.f32 %v8211_v11, %v8130_v33 }
 0x2e0   :  { %v1065_v59 = vmul.f32 %v8271_v18, %v8203_v4  ;;  %v1016_v62 = vmul.f32 %v8003_v37, %v8034_v55 }
 0x2e1   :  { %6498 = vmatmul.mubr.msk.f32.gmra.mrb[36].mxu1 %vm113_vm0, %v997_v3  ;;  %6589 = vmatmul.mubr.msk.f32.gmra.mrb[38].mxu0 %vm113_vm0, %v1047_v14  ;;  %v1017_v3 = vmul.f32 %v8003_v37, %v8078_v0  ;;  %v1067_v14 = vmul.f32 %v8271_v18, %v8086_v24 }
 0x2e2   :  { %7032 = vmatprep.subr.bf16.mxu0 %v7031_v1  ;;  %6500 = vmatprep.mubr.msk.f32.mxu1 %vm113_vm0, %v998_v38  ;;  %v1018_v38 = vmul.f32 %v8003_v37, %v8083_v49 }
 0x2e3   :  { %6591 = vmatprep.mubr.msk.f32.mxu0 %vm113_vm0, %v1048_v51  ;;  %7034 = vmatpush3.bf16.msra.mxu0 %v7031_v1  ;;  %v1066_v1 = vmul.f32 %v8271_v18, %v8215_v58  ;;  %v1068_v51 = vmul.f32 %v8271_v18, %v8112_v60 }
 0x2e5   :  { %6501 = vmatmul.mubr.msk.f32.gmra.mrb[38].mxu1 %vm113_vm0, %v999_v30  ;;  %6592 = vmatmul.mubr.msk.f32.gmra.mrb[40].mxu0 %vm113_vm0, %v1049_v35  ;;  %v1019_v30 = vmul.f32 %v8003_v37, %v8098_v34  ;;  %v1069_v35 = vmul.f32 %v8271_v18, %v8106_v54 }
 0x2e6   :  { %6503 = vmatprep.mubr.msk.f32.mxu1 %vm113_vm0, %v1000_v50  ;;  %6594 = vmatprep.mubr.msk.f32.mxu0 %vm113_vm0, %v1050_v9  ;;  %v1020_v50 = vmul.f32 %v8003_v37, %v8103_v53  ;;  %v1070_v9 = vmul.f32 %v8271_v18, %v8136_v6 }
 0x2e9   :  { %6504 = vmatmul.mubr.msk.f32.gmra.mrb[40].mxu1 %vm113_vm0, %v1001_v28  ;;  %6595 = vmatmul.mubr.msk.f32.gmra.mrb[42].mxu0 %vm113_vm0, %v1051_v44  ;;  %v1021_v28 = vmul.f32 %v8003_v37, %v8122_v17  ;;  %v1071_v44 = vmul.f32 %v8271_v18, %v8130_v33 }
 0x2ea   :  { %6506 = vmatprep.mubr.msk.f32.mxu1 %vm113_vm0, %v1002_v21  ;;  %6597 = vmatprep.mubr.msk.f32.mxu0 %vm113_vm0, %v1052_v48  ;;  %v1022_v21 = vmul.f32 %v8003_v37, %v8127_v8  ;;  %v1072_v48 = vmul.f32 %v8000_v36, %v8070_v63 }
 0x2ed   :  { %6507 = vmatmul.mubr.msk.f32.gmra.mrb[42].mxu1 %vm113_vm0, %v1003_v45  ;;  %6598 = vmatmul.mubr.msk.f32.gmra.mrb[44].mxu0 %vm113_vm0, %v1053_v19  ;;  %v1023_v45 = vmul.f32 %v8003_v37, %v8153_v15  ;;  %v1073_v19 = vmul.f32 %v8000_v36, %v8203_v4 }
 0x2ee   :  { %6509 = vmatprep.mubr.msk.f32.mxu1 %vm113_vm0, %v1004_v47  ;;  %6600 = vmatprep.mubr.msk.f32.mxu0 %vm113_vm0, %v1054_v22  ;;  %v1024_v47 = vmul.f32 %v8006_v41, %v8034_v55  ;;  %v1074_v22 = vmul.f32 %v8000_v36, %v8215_v58 }
 0x2f1   :  { %6510 = vmatmul.mubr.msk.f32.gmra.mrb[44].mxu1 %vm113_vm0, %v1005_v52  ;;  %6601 = vmatmul.mubr.msk.f32.gmra.mrb[46].mxu0 %vm113_vm0, %v1055_v31  ;;  %v1025_v52 = vmul.f32 %v8006_v41, %v8078_v0  ;;  %v1075_v31 = vmul.f32 %v8000_v36, %v8086_v24 }
 0x2f2   :  { %6512 = vmatprep.mubr.msk.f32.mxu1 %vm113_vm0, %v1006_v23  ;;  %6603 = vmatprep.mubr.msk.f32.mxu0 %vm113_vm0, %v1056_v12  ;;  %v1026_v23 = vmul.f32 %v8006_v41, %v8083_v49  ;;  %v1076_v12 = vmul.f32 %v8000_v36, %v8112_v60 }
 0x2f5   :  { %6513 = vmatmul.mubr.msk.f32.gmra.mrb[46].mxu1 %vm113_vm0, %v1007_v25  ;;  %6604 = vmatmul.mubr.msk.f32.gmra.mrb[48].mxu0 %vm113_vm0, %v1057_v26  ;;  %v1027_v25 = vmul.f32 %v8006_v41, %v8098_v34  ;;  %v1077_v26 = vmul.f32 %v8000_v36, %v8106_v54 }
 0x2f6   :  { %6515 = vmatprep.mubr.msk.f32.mxu1 %vm113_vm0, %v1008_v27  ;;  %6606 = vmatprep.mubr.msk.f32.mxu0 %vm113_vm0, %v1058_v10  ;;  %v1028_v27 = vmul.f32 %v8006_v41, %v8103_v53  ;;  %v1078_v10 = vmul.f32 %v8000_v36, %v8136_v6 }
 0x2f9   :  { %6516 = vmatmul.mubr.msk.f32.gmra.mrb[48].mxu1 %vm113_vm0, %v1009_v29  ;;  %6607 = vmatmul.mubr.msk.f32.gmra.mrb[50].mxu0 %vm113_vm0, %v1059_v16  ;;  %v1029_v29 = vmul.f32 %v8006_v41, %v8122_v17  ;;  %v1079_v16 = vmul.f32 %v8000_v36, %v8130_v33 }
 0x2fa   :  { %6518 = vmatprep.mubr.msk.f32.mxu1 %vm113_vm0, %v1010_v40  ;;  %6609 = vmatprep.mubr.msk.f32.mxu0 %vm113_vm0, %v1060_v5  ;;  %v1030_v40 = vmul.f32 %v8006_v41, %v8127_v8  ;;  %v1080_v5 = vmul.f32 %v8003_v37, %v8070_v63 }
 0x2fd   :  { %6519 = vmatmul.mubr.msk.f32.gmra.mrb[50].mxu1 %vm113_vm0, %v1011_v61  ;;  %6610 = vmatmul.mubr.msk.f32.gmra.mrb[52].mxu0 %vm113_vm0, %v1061_v32  ;;  %v1031_v61 = vmul.f32 %v8006_v41, %v8153_v15  ;;  %v1081_v32 = vmul.f32 %v8003_v37, %v8203_v4 }
 0x2fe   :  { %6521 = vmatprep.mubr.msk.f32.mxu1 %vm113_vm0, %v1012_v13  ;;  %6612 = vmatprep.mubr.msk.f32.mxu0 %vm113_vm0, %v1062_v39  ;;  %v1032_v13 = vmul.f32 %v8009_v2, %v8034_v55  ;;  %v1082_v39 = vmul.f32 %v8003_v37, %v8215_v58  ;;  %v1034_v55 = vmul.f32 %v8009_v2, %v8083_v49 }
 0x2ff   :  { %v1036_v49 = vmul.f32 %v8009_v2, %v8103_v53  ;;  %v1038_v53 = vmul.f32 %v8009_v2, %v8127_v8  ;;  %v1090_v8 = vmul.f32 %v8006_v41, %v8215_v58 }
 0x301   :  { %6522 = vmatmul.mubr.msk.f32.gmra.mrb[52].mxu1 %vm113_vm0, %v1013_v43  ;;  %6613 = vmatmul.mubr.msk.f32.gmra.mrb[54].mxu0 %vm113_vm0, %v1063_v42  ;;  %v1033_v43 = vmul.f32 %v8009_v2, %v8078_v0  ;;  %v1083_v42 = vmul.f32 %v8003_v37, %v8086_v24  ;;  %v1035_v0 = vmul.f32 %v8009_v2, %v8098_v34 }
 0x302   :  { %6524 = vmatprep.mubr.msk.f32.mxu1 %vm113_vm0, %v1014_v46  ;;  %6615 = vmatprep.mubr.msk.f32.mxu0 %vm113_vm0, %v1064_v7  ;;  %v1084_v46 = vmul.f32 %v8003_v37, %v8112_v60  ;;  %v1085_v7 = vmul.f32 %v8003_v37, %v8106_v54  ;;  %v1037_v34 = vmul.f32 %v8009_v2, %v8122_v17 }
 0x303   :  { %v1039_v17 = vmul.f32 %v8009_v2, %v8153_v15  ;;  %v1093_v15 = vmul.f32 %v8006_v41, %v8106_v54 }
 0x305   :  { %6525 = vmatmul.mubr.msk.f32.gmra.mrb[54].mxu1 %vm113_vm0, %v1015_v57  ;;  %6616 = vmatmul.mubr.msk.f32.gmra.mrb[56].mxu0 %vm113_vm0, %v1065_v59  ;;  %v1086_v57 = vmul.f32 %v8003_v37, %v8136_v6  ;;  %v1087_v59 = vmul.f32 %v8003_v37, %v8130_v33 }
 0x306   :  { %6527 = vmatprep.mubr.msk.f32.mxu1 %vm113_vm0, %v1016_v62  ;;  %6618 = vmatprep.mubr.msk.f32.mxu0 %vm113_vm0, %v1066_v1  ;;  %v1088_v62 = vmul.f32 %v8006_v41, %v8070_v63  ;;  %v1089_v1 = vmul.f32 %v8006_v41, %v8203_v4 }
 0x309   :  { %6528 = vmatmul.mubr.msk.f32.gmra.mrb[56].mxu1 %vm113_vm0, %v1017_v3  ;;  %6619 = vmatmul.mubr.msk.f32.gmra.mrb[58].mxu0 %vm113_vm0, %v1067_v14  ;;  %v1091_v3 = vmul.f32 %v8006_v41, %v8086_v24  ;;  %v1092_v14 = vmul.f32 %v8006_v41, %v8112_v60 }
 0x30a   :  { %6530 = vmatprep.mubr.msk.f32.mxu1 %vm113_vm0, %v1018_v38  ;;  %6621 = vmatprep.mubr.msk.f32.mxu0 %vm113_vm0, %v1068_v51  ;;  %v1094_v38 = vmul.f32 %v8006_v41, %v8136_v6  ;;  %v1095_v51 = vmul.f32 %v8006_v41, %v8130_v33 }
 0x30d   :  { %6531 = vmatmul.mubr.msk.f32.gmra.mrb[58].mxu1 %vm113_vm0, %v1019_v30  ;;  %6622 = vmatmul.mubr.msk.f32.gmra.mrb[60].mxu0 %vm113_vm0, %v1069_v35  ;;  %v1096_v30 = vmul.f32 %v8009_v2, %v8070_v63  ;;  %v1097_v35 = vmul.f32 %v8009_v2, %v8203_v4  ;;  %v1100_v63 = vmul.f32 %v8009_v2, %v8112_v60 }
 0x30e   :  { %6533 = vmatprep.mubr.msk.f32.mxu1 %vm113_vm0, %v1020_v50  ;;  %6624 = vmatprep.mubr.msk.f32.mxu0 %vm113_vm0, %v1070_v9  ;;  %v1098_v50 = vmul.f32 %v8009_v2, %v8215_v58  ;;  %v1099_v9 = vmul.f32 %v8009_v2, %v8086_v24  ;;  %v1101_v4 = vmul.f32 %v8009_v2, %v8106_v54 }
 0x30f   :  { %v1102_v58 = vmul.f32 %v8009_v2, %v8136_v6  ;;  %v1103_v24 = vmul.f32 %v8009_v2, %v8130_v33 }
 0x311   :  { %6534 = vmatmul.mubr.msk.f32.gmra.mrb[60].mxu1 %vm113_vm0, %v1021_v28  ;;  %6625 = vmatmul.mubr.msk.f32.gmra.mrb[62].mxu0 %vm113_vm0, %v1071_v44 }
 0x312   :  { %6536 = vmatprep.mubr.msk.f32.mxu1 %vm113_vm0, %v1022_v21  ;;  %6627 = vmatprep.mubr.msk.f32.mxu0 %vm113_vm0, %v1072_v48 }
 0x315   :  { %6537 = vmatmul.mubr.msk.f32.gmra.mrb[62].mxu1 %vm113_vm0, %v1023_v45  ;;  %6628 = vmatmul.mubr.msk.f32.gmra.mrb[64].mxu0 %vm113_vm0, %v1073_v19 }
 0x316   :  { %6539 = vmatprep.mubr.msk.f32.mxu1 %vm113_vm0, %v1024_v47  ;;  %6630 = vmatprep.mubr.msk.f32.mxu0 %vm113_vm0, %v1074_v22 }
 0x319   :  { %6540 = vmatmul.mubr.msk.f32.gmra.mrb[64].mxu1 %vm113_vm0, %v1025_v52  ;;  %6631 = vmatmul.mubr.msk.f32.gmra.mrb[66].mxu0 %vm113_vm0, %v1075_v31 }
 0x31a   :  { %6542 = vmatprep.mubr.msk.f32.mxu1 %vm113_vm0, %v1026_v23  ;;  %6633 = vmatprep.mubr.msk.f32.mxu0 %vm113_vm0, %v1076_v12 }
 0x31d   :  { %6543 = vmatmul.mubr.msk.f32.gmra.mrb[66].mxu1 %vm113_vm0, %v1027_v25  ;;  %6634 = vmatmul.mubr.msk.f32.gmra.mrb[68].mxu0 %vm113_vm0, %v1077_v26 }
 0x31e   :  { %6545 = vmatprep.mubr.msk.f32.mxu1 %vm113_vm0, %v1028_v27  ;;  %6636 = vmatprep.mubr.msk.f32.mxu0 %vm113_vm0, %v1078_v10 }
 0x321   :  { %6546 = vmatmul.mubr.msk.f32.gmra.mrb[68].mxu1 %vm113_vm0, %v1029_v29  ;;  %6637 = vmatmul.mubr.msk.f32.gmra.mrb[70].mxu0 %vm113_vm0, %v1079_v16 }
 0x322   :  { %6548 = vmatprep.mubr.msk.f32.mxu1 %vm113_vm0, %v1030_v40  ;;  %6639 = vmatprep.mubr.msk.f32.mxu0 %vm113_vm0, %v1080_v5 }
 0x325   :  { %6549 = vmatmul.mubr.msk.f32.gmra.mrb[70].mxu1 %vm113_vm0, %v1031_v61  ;;  %6640 = vmatmul.mubr.msk.f32.gmra.mrb[72].mxu0 %vm113_vm0, %v1081_v32 }
 0x326   :  { %6551 = vmatprep.mubr.msk.f32.mxu1 %vm113_vm0, %v1032_v13  ;;  %6642 = vmatprep.mubr.msk.f32.mxu0 %vm113_vm0, %v1082_v39 }
 0x329   :  { %6552 = vmatmul.mubr.msk.f32.gmra.mrb[72].mxu1 %vm113_vm0, %v1033_v43  ;;  %6643 = vmatmul.mubr.msk.f32.gmra.mrb[74].mxu0 %vm113_vm0, %v1083_v42 }
 0x32a   :  { %6554 = vmatprep.mubr.msk.f32.mxu1 %vm113_vm0, %v1034_v55  ;;  %6645 = vmatprep.mubr.msk.f32.mxu0 %vm113_vm0, %v1084_v46 }
 0x32d   :  { %6555 = vmatmul.mubr.msk.f32.gmra.mrb[74].mxu1 %vm113_vm0, %v1035_v0  ;;  %6646 = vmatmul.mubr.msk.f32.gmra.mrb[76].mxu0 %vm113_vm0, %v1085_v7 }
 0x32e   :  { %6557 = vmatprep.mubr.msk.f32.mxu1 %vm113_vm0, %v1036_v49  ;;  %6648 = vmatprep.mubr.msk.f32.mxu0 %vm113_vm0, %v1086_v57 }
 0x331   :  { %6558 = vmatmul.mubr.msk.f32.gmra.mrb[76].mxu1 %vm113_vm0, %v1037_v34  ;;  %6649 = vmatmul.mubr.msk.f32.gmra.mrb[78].mxu0 %vm113_vm0, %v1087_v59 }
 0x332   :  { %6560 = vmatprep.mubr.msk.f32.mxu1 %vm113_vm0, %v1038_v53  ;;  %6651 = vmatprep.mubr.msk.f32.mxu0 %vm113_vm0, %v1088_v62 }
 0x335   :  { %6561 = vmatmul.mubr.msk.f32.gmra.mrb[78].mxu1 %vm113_vm0, %v1039_v17  ;;  %6652 = vmatmul.mubr.msk.f32.gmra.mrb[80].mxu0 %vm113_vm0, %v1089_v1 }
 0x336   :  { %6654 = vmatprep.mubr.msk.f32.mxu0 %vm113_vm0, %v1090_v8 }
 0x339   :  { %6655 = vmatmul.mubr.msk.f32.gmra.mrb[82].mxu0 %vm113_vm0, %v1091_v3 }
 0x33a   :  { %6657 = vmatprep.mubr.msk.f32.mxu0 %vm113_vm0, %v1092_v14 }
 0x33d   :  { %6658 = vmatmul.mubr.msk.f32.gmra.mrb[84].mxu0 %vm113_vm0, %v1093_v15 }
 0x33e   :  { %6660 = vmatprep.mubr.msk.f32.mxu0 %vm113_vm0, %v1094_v38 }
 0x341   :  { %6661 = vmatmul.mubr.msk.f32.gmra.mrb[86].mxu0 %vm113_vm0, %v1095_v51 }
 0x342   :  { %6663 = vmatprep.mubr.msk.f32.mxu0 %vm113_vm0, %v1096_v30 }
 0x345   :  { %6664 = vmatmul.mubr.msk.f32.gmra.mrb[88].mxu0 %vm113_vm0, %v1097_v35 }
 0x346   :  { %6666 = vmatprep.mubr.msk.f32.mxu0 %vm113_vm0, %v1098_v50 }
 0x349   :  { %6667 = vmatmul.mubr.msk.f32.gmra.mrb[90].mxu0 %vm113_vm0, %v1099_v9 }
 0x34a   :  { %6669 = vmatprep.mubr.msk.f32.mxu0 %vm113_vm0, %v1100_v63 }
 0x34d   :  { %6670 = vmatmul.mubr.msk.f32.gmra.mrb[92].mxu0 %vm113_vm0, %v1101_v4 }
 0x34e   :  { %6672 = vmatprep.mubr.msk.f32.mxu0 %vm113_vm0, %v1102_v58 }
 0x351   :  { %6673 = vmatmul.mubr.msk.f32.gmra.mrb[94].mxu0 %vm113_vm0, %v1103_v24 }
 0x38c   :  { %v6469_v60 = vpop.f32.mrb[16].mxu1 }
 0x38d   :  { %v8567_v28 = vmul.f32 0.5, %v6469_v60  ;;  %v1386_v44 = vpop.f32.mrb[17].mxu1 }
 0x38e   :  { %v8569_v21 = vmul.f32 0.5, %v1386_v44 }
 0x38f   :  { %11471 = vst [vmem:[#allocation10_spill] sm:$0xff] %v8567_v28  ;;  %v2438_v54 = vsel %vm2434_vm2, %v8567_v28, -inf }
 0x390   :  { %2439 = vmax.xlane.f32.xlu1 %v2438_v54  ;;  %v6472_v6 = vpop.f32.mrb[18].mxu1  ;;  %v2435_v48 = vsel %vm2434_vm2, %v8569_v21, -inf }
 0x391   :  { %v8575_v45 = vmul.f32 0.5, %v6472_v6  ;;  %2436 = vmax.xlane.f32.xlu0 %v2435_v48  ;;  %v1396_v33 = vpop.f32.mrb[19].mxu1 }
 0x392   :  { %v8577_v19 = vmul.f32 0.5, %v1396_v33 }
 0x393   :  { %11472 = vst [vmem:[#allocation11_spill] sm:$0xff] %v8575_v45  ;;  %v2444_v47 = vsel %vm2434_vm2, %v8575_v45, -inf }
 0x394   :  { %2445 = vmax.xlane.f32.xlu1 %v2444_v47  ;;  %v6475_v22 = vpop.f32.mrb[20].mxu1  ;;  %v2441_v52 = vsel %vm2434_vm2, %v8577_v19, -inf }
 0x395   :  { %v8583_v31 = vmul.f32 0.5, %v6475_v22  ;;  %2442 = vmax.xlane.f32.xlu0 %v2441_v52  ;;  %v1406_v23 = vpop.f32.mrb[21].mxu1 }
 0x396   :  { %v8585_v12 = vmul.f32 0.5, %v1406_v23 }
 0x397   :  { %11473 = vst [vmem:[#allocation12_spill] sm:$0xff] %v8583_v31  ;;  %v2450_v25 = vsel %vm2434_vm2, %v8583_v31, -inf }
 0x398   :  { %11474 = vst [vmem:[#allocation13_spill] sm:$0xff] %v8585_v12  ;;  %2451 = vmax.xlane.f32.xlu1 %v2450_v25  ;;  %v6478_v26 = vpop.f32.mrb[22].mxu1  ;;  %v2447_v27 = vsel %vm2434_vm2, %v8585_v12, -inf }
 0x399   :  { %v8591_v10 = vmul.f32 0.5, %v6478_v26  ;;  %2448 = vmax.xlane.f32.xlu0 %v2447_v27  ;;  %v1416_v29 = vpop.f32.mrb[23].mxu1 }
 0x39a   :  { %v8593_v16 = vmul.f32 0.5, %v1416_v29 }
 0x39b   :  { %11475 = vst [vmem:[#allocation14_spill] sm:$0xff] %v8591_v10  ;;  %v2456_v40 = vsel %vm2434_vm2, %v8591_v10, -inf }
 0x39c   :  { %11476 = vst [vmem:[#allocation15_spill] sm:$0xff] %v8593_v16  ;;  %2457 = vmax.xlane.f32.xlu1 %v2456_v40  ;;  %v6481_v5 = vpop.f32.mrb[24].mxu1  ;;  %v2453_v61 = vsel %vm2434_vm2, %v8593_v16, -inf }
 0x39d   :  { %v8599_v32 = vmul.f32 0.5, %v6481_v5  ;;  %2454 = vmax.xlane.f32.xlu0 %v2453_v61  ;;  %v1426_v13 = vpop.f32.mrb[25].mxu1 }
 0x39e   :  { %v8603_v43 = vmul.f32 0.5, %v1426_v13 }
 0x39f   :  { %11477 = vst [vmem:[#allocation16_spill] sm:$0xff] %v8599_v32  ;;  %v2462_v39 = vsel %vm2434_vm2, %v8599_v32, -inf }
 0x3a0   :  { %11478 = vst [vmem:[#allocation17_spill] sm:$0xff] %v8603_v43  ;;  %v6484_v42 = vpop.f32.mrb[26].mxu1  ;;  %v2459_v7 = vsel %vm2434_vm2, %v8603_v43, -inf }
 0x3a1   :  { %2463 = vmax.xlane.f32.xlu0 %v2462_v39  ;;  %v1436_v55 = vpop.f32.mrb[27].mxu1  ;;  %v8605_v46 = vmul.f32 0.5, %v6484_v42 }
 0x3a2   :  { %v8609_v57 = vmul.f32 0.5, %v1436_v55 }
 0x3a3   :  { %11479 = vst [vmem:[#allocation18_spill] sm:$0xff] %v8605_v46  ;;  %v2468_v53 = vsel %vm2434_vm2, %v8605_v46, -inf }
 0x3a4   :  { %v6487_v0 = vpop.f32.mrb[28].mxu1  ;;  %11480 = vst [vmem:[#allocation19_spill] sm:$0xff] %v8609_v57  ;;  %v2465_v51 = vsel %vm2434_vm2, %v8609_v57, -inf }
 0x3a5   :  { %2460 = vmax.xlane.f32.xlu0 %v2459_v7  ;;  %v1446_v49 = vpop.f32.mrb[29].mxu1  ;;  %v8619_v14 = vmul.f32 0.5, %v6487_v0 }
 0x3a6   :  { %v8627_v63 = vmul.f32 0.5, %v1446_v49 }
 0x3a7   :  { %11483 = vst [vmem:[#allocation22_spill] sm:$0xff] %v8619_v14  ;;  %v2474_v24 = vsel %vm2434_vm2, %v8619_v14, -inf }
 0x3a8   :  { %v6490_v34 = vpop.f32.mrb[30].mxu1  ;;  %v6581_v59 = vpop.f32.mrb[32].mxu0  ;;  %11485 = vst [vmem:[#allocation24_spill] sm:$0xff] %v8627_v63  ;;  %v2471_v22 = vsel %vm2434_vm2, %v8627_v63, -inf }
 0x3a9   :  { %v8613_v62 = vmul.f32 0.5, %v6581_v59  ;;  %2469 = vmax.xlane.f32.xlu0 %v2468_v53  ;;  %v1456_v17 = vpop.f32.mrb[31].mxu1  ;;  %v1987_v1 = vpop.f32.mrb[33].mxu0  ;;  %v8635_v48 = vmul.f32 0.5, %v6490_v34 }
 0x3aa   :  { %v8615_v8 = vmul.f32 0.5, %v1987_v1  ;;  %v8645_v27 = vmul.f32 0.5, %v1456_v17 }
 0x3ab   :  { %11481 = vst [vmem:[#allocation20_spill] sm:$0xff] %v8613_v62  ;;  %v2630_v3 = vsel %vm2434_vm2, %v8613_v62, -inf  ;;  %11487 = vst [vmem:[#allocation26_spill] sm:$0xff] %v8635_v48  ;;  %v2480_v5 = vsel %vm2434_vm2, %v8635_v48, -inf }
 0x3ac   :  { %11482 = vst [vmem:[#allocation21_spill] sm:$0xff] %v8615_v8  ;;  %v6493_v15 = vpop.f32.mrb[32].mxu1  ;;  %2631 = vmax.xlane.f32.xlu1 %v2630_v3  ;;  %v6584_v38 = vpop.f32.mrb[34].mxu0  ;;  %v2627_v9 = vsel %vm2434_vm2, %v8615_v8, -inf  ;;  %11489 = vst [vmem:[#allocation28_spill] sm:$0xff] %v8645_v27  ;;  %v2477_v49 = vsel %vm2434_vm2, %v8645_v27, -inf }
 0x3ad   :  { %2466 = vmax.xlane.f32.xlu0 %v2465_v51  ;;  %v1466_v30 = vpop.f32.mrb[33].mxu1  ;;  %v1997_v35 = vpop.f32.mrb[35].mxu0  ;;  %v8623_v50 = vmul.f32 0.5, %v6584_v38  ;;  %v8657_v55 = vmul.f32 0.5, %v6493_v15 }
 0x3ae   :  { %v8631_v54 = vmul.f32 0.5, %v1997_v35  ;;  %v8669_v1 = vmul.f32 0.5, %v1466_v30 }
 0x3af   :  { %11484 = vst [vmem:[#allocation23_spill] sm:$0xff] %v8623_v50  ;;  %v2636_v6 = vsel %vm2434_vm2, %v8623_v50, -inf  ;;  %11491 = vst [vmem:[#allocation30_spill] sm:$0xff] %v8657_v55  ;;  %v2486_v38 = vsel %vm2434_vm2, %v8657_v55, -inf }
 0x3b0   :  { %v6496_v4 = vpop.f32.mrb[34].mxu1  ;;  %2628 = vmax.xlane.f32.xlu1 %v2627_v9  ;;  %v6587_v58 = vpop.f32.mrb[36].mxu0  ;;  %11486 = vst [vmem:[#allocation25_spill] sm:$0xff] %v8631_v54  ;;  %v2633_v26 = vsel %vm2434_vm2, %v8631_v54, -inf  ;;  %11493 = vst [vmem:[#allocation32_spill] sm:$0xff] %v8669_v1 }
 0x3b1   :  { %2475 = vmax.xlane.f32.xlu0 %v2474_v24  ;;  %v1476_v60 = vpop.f32.mrb[35].mxu1  ;;  %v2007_v44 = vpop.f32.mrb[37].mxu0  ;;  %v8641_v25 = vmul.f32 0.5, %v6587_v58  ;;  %v8681_v24 = vmul.f32 0.5, %v6496_v4 }
 0x3b2   :  { %v8653_v39 = vmul.f32 0.5, %v2007_v44  ;;  %v8697_v4 = vmul.f32 0.5, %v1476_v60 }
 0x3b3   :  { %11488 = vst [vmem:[#allocation27_spill] sm:$0xff] %v8641_v25  ;;  %v2642_v42 = vsel %vm2434_vm2, %v8641_v25, -inf  ;;  %11495 = vst [vmem:[#allocation34_spill] sm:$0xff] %v8681_v24 }
 0x3b4   :  { %v6499_v33 = vpop.f32.mrb[36].mxu1  ;;  %2637 = vmax.xlane.f32.xlu1 %v2636_v6  ;;  %v6590_v47 = vpop.f32.mrb[38].mxu0  ;;  %11490 = vst [vmem:[#allocation29_spill] sm:$0xff] %v8653_v39  ;;  %v2639_v17 = vsel %vm2434_vm2, %v8653_v39, -inf  ;;  %v2483_v6 = vsel %vm2434_vm2, %v8669_v1, -inf  ;;  %11497 = vst [vmem:[#allocation36_spill] sm:$0xff] %v8697_v4 }
 0x3b5   :  { %2472 = vmax.xlane.f32.xlu0 %v2471_v22  ;;  %v8639_v52 = vpop.f32.mrb[37].mxu1  ;;  %v2017_v23 = vpop.f32.mrb[39].mxu0  ;;  %v8665_v53 = vmul.f32 0.5, %v6590_v47  ;;  %v8713_v60 = vmul.f32 0.5, %v6499_v33  ;;  %v2489_v2 = vsel %vm2434_vm2, %v8697_v4, -inf }
 0x3b6   :  { %v8677_v9 = vmul.f32 0.5, %v2017_v23  ;;  %v8730_v33 = vmul.f32 0.5, %v8639_v52 }
 0x3b7   :  { %11492 = vst [vmem:[#allocation31_spill] sm:$0xff] %v8665_v53  ;;  %v2648_v58 = vsel %vm2434_vm2, %v8665_v53, -inf  ;;  %11499 = vst [vmem:[#allocation38_spill] sm:$0xff] %v8713_v60 }
 0x3b8   :  { %v8647_v29 = vpop.f32.mrb[38].mxu1  ;;  %2634 = vmax.xlane.f32.xlu1 %v2633_v26  ;;  %v6593_v40 = vpop.f32.mrb[40].mxu0  ;;  %11494 = vst [vmem:[#allocation33_spill] sm:$0xff] %v8677_v9  ;;  %v2645_v26 = vsel %vm2434_vm2, %v8677_v9, -inf  ;;  %11501 = vst [vmem:[#allocation40_spill] sm:$0xff] %v8730_v33 }
 0x3b9   :  { %2481 = vmax.xlane.f32.xlu0 %v2480_v5  ;;  %v8651_v61 = vpop.f32.mrb[39].mxu1  ;;  %v2027_v13 = vpop.f32.mrb[41].mxu0  ;;  %v8693_v23 = vmul.f32 0.5, %v6593_v40  ;;  %v8747_v52 = vmul.f32 0.5, %v8647_v29 }
 0x3ba   :  { %v8709_v40 = vmul.f32 0.5, %v2027_v13  ;;  %v8764_v29 = vmul.f32 0.5, %v8651_v61 }
 0x3bb   :  { %11496 = vst [vmem:[#allocation35_spill] sm:$0xff] %v8693_v23  ;;  %11503 = vst [vmem:[#allocation42_spill] sm:$0xff] %v8747_v52 }
 0x3bc   :  { %v8659_v0 = vpop.f32.mrb[40].mxu1  ;;  %2643 = vmax.xlane.f32.xlu1 %v2642_v42  ;;  %v6596_v7 = vpop.f32.mrb[42].mxu0  ;;  %11498 = vst [vmem:[#allocation37_spill] sm:$0xff] %v8709_v40  ;;  %v2651_v37 = vsel %vm2434_vm2, %v8709_v40, -inf  ;;  %11505 = vst [vmem:[#allocation44_spill] sm:$0xff] %v8764_v29 }
 0x3bd   :  { %2478 = vmax.xlane.f32.xlu0 %v2477_v49  ;;  %v8663_v34 = vpop.f32.mrb[41].mxu1  ;;  %v2037_v59 = vpop.f32.mrb[43].mxu0  ;;  %v2492_v49 = vsel %vm2434_vm2, %v8681_v24, -inf  ;;  %v8725_v13 = vmul.f32 0.5, %v6596_v7  ;;  %v8781_v61 = vmul.f32 0.5, %v8659_v0 }
 0x3be   :  { %v8742_v7 = vmul.f32 0.5, %v2037_v59 }
 0x3bf   :  { %11500 = vst [vmem:[#allocation39_spill] sm:$0xff] %v8725_v13  ;;  %v2660_v56 = vsel %vm2434_vm2, %v8725_v13, -inf  ;;  %11507 = vst [vmem:[#allocation46_spill] sm:$0xff] %v8781_v61 }
 0x3c0   :  { %v8671_v3 = vpop.f32.mrb[42].mxu1  ;;  %2640 = vmax.xlane.f32.xlu1 %v2639_v17  ;;  %v6599_v15 = vpop.f32.mrb[44].mxu0  ;;  %11502 = vst [vmem:[#allocation41_spill] sm:$0xff] %v8742_v7  ;;  %v2657_v13 = vsel %vm2434_vm2, %v8742_v7, -inf }
 0x3c1   :  { %2487 = vmax.xlane.f32.xlu0 %v2486_v38  ;;  %v8675_v51 = vpop.f32.mrb[43].mxu1  ;;  %v2047_v35 = vpop.f32.mrb[45].mxu0  ;;  %v8759_v59 = vmul.f32 0.5, %v6599_v15 }
 0x3c2   :  { %v8776_v15 = vmul.f32 0.5, %v2047_v35 }
 0x3c3   :  { %11504 = vst [vmem:[#allocation43_spill] sm:$0xff] %v8759_v59  ;;  %v2666_v7 = vsel %vm2434_vm2, %v8759_v59, -inf  ;;  %v8799_v59 = vmul.f32 0.5, %v8663_v34 }
 0x3c4   :  { %v8683_v30 = vpop.f32.mrb[44].mxu1  ;;  %2649 = vmax.xlane.f32.xlu1 %v2648_v58  ;;  %v8685_v44 = vpop.f32.mrb[46].mxu0  ;;  %v2654_v58 = vsel %vm2434_vm2, %v8693_v23, -inf  ;;  %11506 = vst [vmem:[#allocation45_spill] sm:$0xff] %v8776_v15  ;;  %v2663_v0 = vsel %vm2434_vm2, %v8776_v15, -inf  ;;  %v8817_v15 = vmul.f32 0.5, %v8671_v3 }
 0x3c5   :  { %2484 = vmax.xlane.f32.xlu0 %v2483_v6  ;;  %v8689_v47 = vpop.f32.mrb[45].mxu1  ;;  %v8691_v22 = vpop.f32.mrb[47].mxu0  ;;  %v8794_v35 = vmul.f32 0.5, %v8685_v44  ;;  %11509 = vst [vmem:[#allocation48_spill] sm:$0xff] %v8799_v59 }
 0x3c6   :  { %v8812_v44 = vmul.f32 0.5, %v8691_v22  ;;  %11511 = vst [vmem:[#allocation50_spill] sm:$0xff] %v8817_v15 }
 0x3c7   :  { %11508 = vst [vmem:[#allocation47_spill] sm:$0xff] %v8794_v35  ;;  %v2672_v34 = vsel %vm2434_vm2, %v8794_v35, -inf  ;;  %v8835_v35 = vmul.f32 0.5, %v8675_v51 }
 0x3c8   :  { %v8699_v5 = vpop.f32.mrb[46].mxu1  ;;  %2646 = vmax.xlane.f32.xlu1 %v2645_v26  ;;  %v8701_v42 = vpop.f32.mrb[48].mxu0  ;;  %11510 = vst [vmem:[#allocation49_spill] sm:$0xff] %v8812_v44  ;;  %v2669_v3 = vsel %vm2434_vm2, %v8812_v44, -inf  ;;  %v8853_v44 = vmul.f32 0.5, %v8683_v30 }
 0x3c9   :  { %2493 = vmax.xlane.f32.xlu0 %v2492_v49  ;;  %v8705_v17 = vpop.f32.mrb[47].mxu1  ;;  %v8707_v38 = vpop.f32.mrb[49].mxu0  ;;  %v8830_v22 = vmul.f32 0.5, %v8701_v42  ;;  %11513 = vst [vmem:[#allocation52_spill] sm:$0xff] %v8835_v35 }
 0x3ca   :  { %v8848_v42 = vmul.f32 0.5, %v8707_v38  ;;  %11515 = vst [vmem:[#allocation54_spill] sm:$0xff] %v8853_v44 }
 0x3cb   :  { %11512 = vst [vmem:[#allocation51_spill] sm:$0xff] %v8830_v22  ;;  %v2678_v51 = vsel %vm2434_vm2, %v8830_v22, -inf  ;;  %v8871_v22 = vmul.f32 0.5, %v8689_v47 }
 0x3cc   :  { %v8715_v6 = vpop.f32.mrb[48].mxu1  ;;  %2655 = vmax.xlane.f32.xlu1 %v2654_v58  ;;  %v8717_v26 = vpop.f32.mrb[50].mxu0  ;;  %11514 = vst [vmem:[#allocation53_spill] sm:$0xff] %v8848_v42  ;;  %v2675_v30 = vsel %vm2434_vm2, %v8848_v42, -inf  ;;  %v8889_v42 = vmul.f32 0.5, %v8699_v5 }
 0x3cd   :  { %2490 = vmax.xlane.f32.xlu0 %v2489_v2  ;;  %v8721_v49 = vpop.f32.mrb[49].mxu1  ;;  %v8723_v41 = vpop.f32.mrb[51].mxu0  ;;  %v2498_v2 = vsel %vm2434_vm2, %v8713_v60, -inf  ;;  %v8866_v38 = vmul.f32 0.5, %v8717_v26  ;;  %11517 = vst [vmem:[#allocation56_spill] sm:$0xff] %v8871_v22 }
 0x3ce   :  { %v8884_v26 = vmul.f32 0.5, %v8723_v41  ;;  %11519 = vst [vmem:[#allocation58_spill] sm:$0xff] %v8889_v42 }
 0x3cf   :  { %11516 = vst [vmem:[#allocation55_spill] sm:$0xff] %v8866_v38  ;;  %v2684_v47 = vsel %vm2434_vm2, %v8866_v38, -inf  ;;  %v8907_v38 = vmul.f32 0.5, %v8705_v17 }
 0x3d0   :  { %v8732_v36 = vpop.f32.mrb[50].mxu1  ;;  %2652 = vmax.xlane.f32.xlu1 %v2651_v37  ;;  %v8734_v58 = vpop.f32.mrb[52].mxu0  ;;  %11518 = vst [vmem:[#allocation57_spill] sm:$0xff] %v8884_v26  ;;  %v2681_v5 = vsel %vm2434_vm2, %v8884_v26, -inf  ;;  %v8925_v26 = vmul.f32 0.5, %v8715_v6 }
 0x3d1   :  { %2499 = vmax.xlane.f32.xlu0 %v2498_v2  ;;  %v8738_v18 = vpop.f32.mrb[51].mxu1  ;;  %v8740_v11 = vpop.f32.mrb[53].mxu0  ;;  %v2495_v2 = vsel %vm2434_vm2, %v8730_v33, -inf  ;;  %v8902_v41 = vmul.f32 0.5, %v8734_v58  ;;  %11521 = vst [vmem:[#allocation60_spill] sm:$0xff] %v8907_v38 }
 0x3d2   :  { %v8920_v58 = vmul.f32 0.5, %v8740_v11  ;;  %11523 = vst [vmem:[#allocation62_spill] sm:$0xff] %v8925_v26 }
 0x3d3   :  { %11520 = vst [vmem:[#allocation59_spill] sm:$0xff] %v8902_v41  ;;  %v2690_v17 = vsel %vm2434_vm2, %v8902_v41, -inf  ;;  %v8943_v41 = vmul.f32 0.5, %v8721_v49 }
 0x3d4   :  { %v8749_v20 = vpop.f32.mrb[52].mxu1  ;;  %2661 = vmax.xlane.f32.xlu1 %v2660_v56  ;;  %v8751_v37 = vpop.f32.mrb[54].mxu0  ;;  %11522 = vst [vmem:[#allocation61_spill] sm:$0xff] %v8920_v58  ;;  %v2687_v6 = vsel %vm2434_vm2, %v8920_v58, -inf  ;;  %v8961_v58 = vmul.f32 0.5, %v8732_v36 }
 0x3d5   :  { %2496 = vmax.xlane.f32.xlu0 %v2495_v2  ;;  %v8755_v40 = vpop.f32.mrb[53].mxu1  ;;  %v8757_v60 = vpop.f32.mrb[55].mxu0  ;;  %v2504_v2 = vsel %vm2434_vm2, %v8747_v52, -inf  ;;  %v8938_v11 = vmul.f32 0.5, %v8751_v37  ;;  %11525 = vst [vmem:[#allocation64_spill] sm:$0xff] %v8943_v41 }
 0x3d6   :  { %v8956_v37 = vmul.f32 0.5, %v8757_v60  ;;  %11527 = vst [vmem:[#allocation66_spill] sm:$0xff] %v8961_v58 }
 0x3d7   :  { %11524 = vst [vmem:[#allocation63_spill] sm:$0xff] %v8938_v11  ;;  %v2696_v49 = vsel %vm2434_vm2, %v8938_v11, -inf  ;;  %v8979_v11 = vmul.f32 0.5, %v8738_v18 }
 0x3d8   :  { %v8766_v23 = vpop.f32.mrb[54].mxu1  ;;  %2658 = vmax.xlane.f32.xlu1 %v2657_v13  ;;  %v8768_v56 = vpop.f32.mrb[56].mxu0  ;;  %11526 = vst [vmem:[#allocation65_spill] sm:$0xff] %v8956_v37  ;;  %v2693_v36 = vsel %vm2434_vm2, %v8956_v37, -inf  ;;  %v8997_v37 = vmul.f32 0.5, %v8749_v20 }
 0x3d9   :  { %2505 = vmax.xlane.f32.xlu0 %v2504_v2  ;;  %v8772_v4 = vpop.f32.mrb[55].mxu1  ;;  %v8774_v33 = vpop.f32.mrb[57].mxu0  ;;  %v2501_v2 = vsel %vm2434_vm2, %v8764_v29, -inf  ;;  %v8974_v60 = vmul.f32 0.5, %v8768_v56  ;;  %11529 = vst [vmem:[#allocation68_spill] sm:$0xff] %v8979_v11 }
 0x3da   :  { %v8992_v56 = vmul.f32 0.5, %v8774_v33  ;;  %11531 = vst [vmem:[#allocation70_spill] sm:$0xff] %v8997_v37 }
 0x3db   :  { %11528 = vst [vmem:[#allocation67_spill] sm:$0xff] %v8974_v60  ;;  %v2702_v18 = vsel %vm2434_vm2, %v8974_v60, -inf  ;;  %v9011_v60 = vmul.f32 0.5, %v8755_v40 }
 0x3dc   :  { %v8783_v24 = vpop.f32.mrb[56].mxu1  ;;  %2667 = vmax.xlane.f32.xlu1 %v2666_v7  ;;  %v8785_v13 = vpop.f32.mrb[58].mxu0  ;;  %11530 = vst [vmem:[#allocation69_spill] sm:$0xff] %v8992_v56  ;;  %v2699_v33 = vsel %vm2434_vm2, %v8992_v56, -inf  ;;  %v9025_v56 = vmul.f32 0.5, %v8766_v23 }
 0x3dd   :  { %2502 = vmax.xlane.f32.xlu0 %v2501_v2  ;;  %v8789_v52 = vpop.f32.mrb[57].mxu1  ;;  %v8791_v9 = vpop.f32.mrb[59].mxu0  ;;  %v2510_v2 = vsel %vm2434_vm2, %v8781_v61, -inf  ;;  %v9006_v12 = vmul.f32 0.5, %v8785_v13  ;;  %11533 = vst [vmem:[#allocation72_spill] sm:$0xff] %v9011_v60 }
 0x3de   :  { %11535 = vst [vmem:[#allocation74_spill] sm:$0xff] %v9025_v56 }
 0x3df   :  { %11532 = vst [vmem:[#allocation71_spill] sm:$0xff] %v9006_v12  ;;  %v2708_v13 = vsel %vm2434_vm2, %v9006_v12, -inf  ;;  %v9039_v12 = vmul.f32 0.5, %v8772_v4 }
 0x3e0   :  { %v8801_v7 = vpop.f32.mrb[58].mxu1  ;;  %2664 = vmax.xlane.f32.xlu1 %v2663_v0  ;;  %v8803_v1 = vpop.f32.mrb[60].mxu0 }
 0x3e1   :  { %2511 = vmax.xlane.f32.xlu0 %v2510_v2  ;;  %v8807_v29 = vpop.f32.mrb[59].mxu1  ;;  %v8809_v53 = vpop.f32.mrb[61].mxu0  ;;  %v2507_v2 = vsel %vm2434_vm2, %v8799_v59, -inf  ;;  %11537 = vst [vmem:[#allocation76_spill] sm:$0xff] %v9039_v12 }
 0x3e4   :  { %v8819_v0 = vpop.f32.mrb[60].mxu1  ;;  %2673 = vmax.xlane.f32.xlu1 %v2672_v34  ;;  %v8821_v55 = vpop.f32.mrb[62].mxu0 }
 0x3e5   :  { %2508 = vmax.xlane.f32.xlu0 %v2507_v2  ;;  %v8825_v61 = vpop.f32.mrb[61].mxu1  ;;  %v8827_v39 = vpop.f32.mrb[63].mxu0  ;;  %v2516_v2 = vsel %vm2434_vm2, %v8817_v15, -inf }
 0x3e8   :  { %v8837_v34 = vpop.f32.mrb[62].mxu1  ;;  %2670 = vmax.xlane.f32.xlu1 %v2669_v3  ;;  %v8839_v27 = vpop.f32.mrb[64].mxu0 }
 0x3e9   :  { %2517 = vmax.xlane.f32.xlu0 %v2516_v2  ;;  %v8843_v59 = vpop.f32.mrb[63].mxu1  ;;  %v8845_v25 = vpop.f32.mrb[65].mxu0  ;;  %v2513_v2 = vsel %vm2434_vm2, %v8835_v35, -inf }
 0x3ec   :  { %v8855_v3 = vpop.f32.mrb[64].mxu1  ;;  %2679 = vmax.xlane.f32.xlu1 %v2678_v51  ;;  %v8857_v48 = vpop.f32.mrb[66].mxu0 }
 0x3ed   :  { %2514 = vmax.xlane.f32.xlu0 %v2513_v2  ;;  %v8861_v15 = vpop.f32.mrb[65].mxu1  ;;  %v8863_v54 = vpop.f32.mrb[67].mxu0  ;;  %v2522_v2 = vsel %vm2434_vm2, %v8853_v44, -inf }
 0x3f0   :  { %v8873_v51 = vpop.f32.mrb[66].mxu1  ;;  %2676 = vmax.xlane.f32.xlu1 %v2675_v30  ;;  %v8875_v63 = vpop.f32.mrb[68].mxu0 }
 0x3f1   :  { %2523 = vmax.xlane.f32.xlu0 %v2522_v2  ;;  %v8879_v35 = vpop.f32.mrb[67].mxu1  ;;  %v8881_v50 = vpop.f32.mrb[69].mxu0  ;;  %v2519_v2 = vsel %vm2434_vm2, %v8871_v22, -inf }
 0x3f4   :  { %v8891_v30 = vpop.f32.mrb[68].mxu1  ;;  %2685 = vmax.xlane.f32.xlu1 %v2684_v47  ;;  %v8893_v14 = vpop.f32.mrb[70].mxu0 }
 0x3f5   :  { %2520 = vmax.xlane.f32.xlu0 %v2519_v2  ;;  %v8897_v44 = vpop.f32.mrb[69].mxu1  ;;  %v8899_v8 = vpop.f32.mrb[71].mxu0  ;;  %v2528_v2 = vsel %vm2434_vm2, %v8889_v42, -inf }
 0x3f8   :  { %v8909_v47 = vpop.f32.mrb[70].mxu1  ;;  %2682 = vmax.xlane.f32.xlu1 %v2681_v5  ;;  %v8911_v57 = vpop.f32.mrb[72].mxu0 }
 0x3f9   :  { %2529 = vmax.xlane.f32.xlu0 %v2528_v2  ;;  %v8915_v22 = vpop.f32.mrb[71].mxu1  ;;  %v8917_v62 = vpop.f32.mrb[73].mxu0  ;;  %v2525_v2 = vsel %vm2434_vm2, %v8907_v38, -inf }
 0x3fc   :  { %v8927_v5 = vpop.f32.mrb[72].mxu1  ;;  %2691 = vmax.xlane.f32.xlu1 %v2690_v17  ;;  %v8929_v46 = vpop.f32.mrb[74].mxu0 }
 0x3fd   :  { %2526 = vmax.xlane.f32.xlu0 %v2525_v2  ;;  %v8933_v42 = vpop.f32.mrb[73].mxu1  ;;  %v8935_v10 = vpop.f32.mrb[75].mxu0  ;;  %v2534_v2 = vsel %vm2434_vm2, %v8925_v26, -inf }
 0x400   :  { %v8945_v17 = vpop.f32.mrb[74].mxu1  ;;  %2688 = vmax.xlane.f32.xlu1 %v2687_v6  ;;  %v8947_v43 = vpop.f32.mrb[76].mxu0 }
 0x401   :  { %2535 = vmax.xlane.f32.xlu0 %v2534_v2  ;;  %v8951_v38 = vpop.f32.mrb[75].mxu1  ;;  %v8953_v31 = vpop.f32.mrb[77].mxu0  ;;  %v2531_v2 = vsel %vm2434_vm2, %v8943_v41, -inf }
 0x404   :  { %v8963_v6 = vpop.f32.mrb[76].mxu1  ;;  %2697 = vmax.xlane.f32.xlu1 %v2696_v49  ;;  %v8965_v32 = vpop.f32.mrb[78].mxu0 }
 0x405   :  { %2532 = vmax.xlane.f32.xlu0 %v2531_v2  ;;  %v8969_v26 = vpop.f32.mrb[77].mxu1  ;;  %v8971_v45 = vpop.f32.mrb[79].mxu0  ;;  %v2540_v2 = vsel %vm2434_vm2, %v8961_v58, -inf  ;;  %v2537_v58 = vsel %vm2434_vm2, %v8979_v11, -inf }
 0x408   :  { %v8981_v49 = vpop.f32.mrb[78].mxu1  ;;  %2694 = vmax.xlane.f32.xlu1 %v2693_v36  ;;  %v8983_v16 = vpop.f32.mrb[80].mxu0 }
 0x409   :  { %2541 = vmax.xlane.f32.xlu0 %v2540_v2  ;;  %v8987_v41 = vpop.f32.mrb[79].mxu1  ;;  %v8989_v28 = vpop.f32.mrb[81].mxu0 }
 0x40c   :  { %2703 = vmax.xlane.f32.xlu1 %v2702_v18  ;;  %v8999_v36 = vpop.f32.mrb[82].mxu0  ;;  %v2546_v18 = vsel %vm2434_vm2, %v8997_v37, -inf }
 0x40d   :  { %2538 = vmax.xlane.f32.xlu0 %v2537_v58  ;;  %v9003_v2 = vpop.f32.mrb[83].mxu0  ;;  %v9020_v58 = vmul.f32 0.5, %v8791_v9 }
 0x40f   :  { %11534 = vst [vmem:[#allocation73_spill] sm:$0xff] %v9020_v58  ;;  %v2705_v9 = vsel %vm2434_vm2, %v9020_v58, -inf  ;;  %v9053_v58 = vmul.f32 0.5, %v8783_v24  ;;  %v9069_v24 = vmul.f32 0.5, %v8789_v52 }
 0x410   :  { %2700 = vmax.xlane.f32.xlu1 %v2699_v33  ;;  %v9013_v20 = vpop.f32.mrb[84].mxu0  ;;  %v2543_v33 = vsel %vm2434_vm2, %v9011_v60, -inf }
 0x411   :  { %2547 = vmax.xlane.f32.xlu0 %v2546_v18  ;;  %v9017_v11 = vpop.f32.mrb[85].mxu0  ;;  %v9034_v18 = vmul.f32 0.5, %v8803_v1  ;;  %11540 = vst [vmem:[#allocation79_spill] sm:$0xff] %v9053_v58  ;;  %11543 = vst [vmem:[#allocation82_spill] sm:$0xff] %v9069_v24 }
 0x413   :  { %11536 = vst [vmem:[#allocation75_spill] sm:$0xff] %v9034_v18  ;;  %v2714_v1 = vsel %vm2434_vm2, %v9034_v18, -inf }
 0x414   :  { %2709 = vmax.xlane.f32.xlu1 %v2708_v13  ;;  %v9027_v40 = vpop.f32.mrb[86].mxu0  ;;  %v2552_v13 = vsel %vm2434_vm2, %v9025_v56, -inf }
 0x415   :  { %2544 = vmax.xlane.f32.xlu0 %v2543_v33  ;;  %v9031_v37 = vpop.f32.mrb[87].mxu0  ;;  %v9048_v33 = vmul.f32 0.5, %v8809_v53  ;;  %v9064_v53 = vmul.f32 0.5, %v8821_v55  ;;  %v9080_v55 = vmul.f32 0.5, %v8819_v0  ;;  %v9098_v0 = vmul.f32 0.5, %v8827_v39 }
 0x417   :  { %11539 = vst [vmem:[#allocation78_spill] sm:$0xff] %v9048_v33  ;;  %11542 = vst [vmem:[#allocation81_spill] sm:$0xff] %v9064_v53  ;;  %v2711_v18 = vsel %vm2434_vm2, %v9048_v33, -inf  ;;  %v2720_v52 = vsel %vm2434_vm2, %v9064_v53, -inf  ;;  %v2570_v53 = vsel %vm2434_vm2, %v9080_v55, -inf  ;;  %v2717_v39 = vsel %vm2434_vm2, %v9098_v0, -inf }
 0x418   :  { %2706 = vmax.xlane.f32.xlu1 %v2705_v9  ;;  %v9041_v23 = vpop.f32.mrb[88].mxu0  ;;  %v2549_v9 = vsel %vm2434_vm2, %v9039_v12, -inf  ;;  %v2558_v12 = vsel %vm2434_vm2, %v9053_v58, -inf  ;;  %11545 = vst [vmem:[#allocation84_spill] sm:$0xff] %v9080_v55  ;;  %11548 = vst [vmem:[#allocation87_spill] sm:$0xff] %v9098_v0  ;;  %v9117_v55 = vmul.f32 0.5, %v8825_v61 }
 0x419   :  { %11538 = vst [vmem:[#allocation77_spill] sm:$0xff] %v9041_v23  ;;  %2553 = vmax.xlane.f32.xlu0 %v2552_v13  ;;  %v9045_v60 = vpop.f32.mrb[89].mxu0  ;;  %v9131_v0 = vmul.f32 0.5, %v8843_v59 }
 0x41a   :  { %11551 = vst [vmem:[#allocation90_spill] sm:$0xff] %v9117_v55  ;;  %v2567_v61 = vsel %vm2434_vm2, %v9117_v55, -inf }
 0x41b   :  { %11553 = vst [vmem:[#allocation92_spill] sm:$0xff] %v9131_v0  ;;  %v2573_v59 = vsel %vm2434_vm2, %v9131_v0, -inf }
 0x41c   :  { %2715 = vmax.xlane.f32.xlu1 %v2714_v1  ;;  %v9055_v4 = vpop.f32.mrb[90].mxu0 }
 0x41d   :  { %11541 = vst [vmem:[#allocation80_spill] sm:$0xff] %v9055_v4  ;;  %2550 = vmax.xlane.f32.xlu0 %v2549_v9  ;;  %v9059_v56 = vpop.f32.mrb[91].mxu0  ;;  %v9082_v23 = vpop.xlane.xlu1 %2439 }
 0x41e   :  { %v9061_v13 = vpop.xlane.xlu0 %2436 }
 0x420   :  { %2712 = vmax.xlane.f32.xlu1 %v2711_v18  ;;  %v9071_v1 = vpop.f32.mrb[92].mxu0  ;;  %v9087_v18 = vmul.f32 0.5, %v8801_v7  ;;  %v9103_v7 = vmul.f32 0.5, %v8807_v29 }
 0x421   :  { %11544 = vst [vmem:[#allocation83_spill] sm:$0xff] %v9071_v1  ;;  %2559 = vmax.xlane.f32.xlu0 %v2558_v12  ;;  %v9075_v9 = vpop.f32.mrb[93].mxu0  ;;  %v2555_v12 = vsel %vm2434_vm2, %v9069_v24, -inf  ;;  %v9112_v24 = vmul.f32 0.5, %v8839_v27 }
 0x422   :  { %v9077_v4 = vpop.xlane.xlu0 %2442  ;;  %11546 = vst [vmem:[#allocation85_spill] sm:$0xff] %v9087_v18  ;;  %11549 = vst [vmem:[#allocation88_spill] sm:$0xff] %v9103_v7  ;;  %v2561_v29 = vsel %vm2434_vm2, %v9103_v7, -inf  ;;  %v9143_v7 = vmul.f32 0.5, %v8861_v15 }
 0x423   :  { %11550 = vst [vmem:[#allocation89_spill] sm:$0xff] %v9112_v24  ;;  %v2726_v27 = vsel %vm2434_vm2, %v9112_v24, -inf }
 0x424   :  { %2721 = vmax.xlane.f32.xlu1 %v2720_v52  ;;  %v9089_v33 = vpop.f32.mrb[94].mxu0  ;;  %v2564_v52 = vsel %vm2434_vm2, %v9087_v18, -inf  ;;  %11555 = vst [vmem:[#allocation94_spill] sm:$0xff] %v9143_v7  ;;  %v2579_v15 = vsel %vm2434_vm2, %v9143_v7, -inf  ;;  %v9180_v7 = vmul.f32 0.5, %v8863_v54 }
 0x425   :  { %11547 = vst [vmem:[#allocation86_spill] sm:$0xff] %v9089_v33  ;;  %2556 = vmax.xlane.f32.xlu0 %v2555_v12  ;;  %v9093_v58 = vpop.f32.mrb[95].mxu0  ;;  %v9107_v33 = vpop.xlane.xlu1 %2445 }
 0x426   :  { %v9095_v1 = vpop.xlane.xlu0 %2448  ;;  %11560 = vst [vmem:[#allocation99_spill] sm:$0xff] %v9180_v7  ;;  %v2729_v54 = vsel %vm2434_vm2, %v9180_v7, -inf  ;;  %v9213_v7 = vmul.f32 0.5, %v8897_v44 }
 0x428   :  { %2571 = vmax.xlane.f32.xlu1 %v2570_v53  ;;  %11565 = vst [vmem:[#allocation104_spill] sm:$0xff] %v9213_v7  ;;  %v2591_v44 = vsel %vm2434_vm2, %v9213_v7, -inf }
 0x429   :  { %2565 = vmax.xlane.f32.xlu0 %v2564_v52  ;;  %v9124_v52 = vmul.f32 0.5, %v8837_v34  ;;  %v9126_v18 = vpop.xlane.xlu1 %2451 }
 0x42a   :  { %v9109_v12 = vpop.xlane.xlu0 %2454 }
 0x42b   :  { %11552 = vst [vmem:[#allocation91_spill] sm:$0xff] %v9124_v52  ;;  %v2576_v34 = vsel %vm2434_vm2, %v9124_v52, -inf  ;;  %v9157_v52 = vmul.f32 0.5, %v8875_v63 }
 0x42c   :  { %2718 = vmax.xlane.f32.xlu1 %v2717_v39 }
 0x42d   :  { %2562 = vmax.xlane.f32.xlu0 %v2561_v29  ;;  %v9138_v29 = vmul.f32 0.5, %v8845_v25  ;;  %11557 = vst [vmem:[#allocation96_spill] sm:$0xff] %v9157_v52  ;;  %v2738_v63 = vsel %vm2434_vm2, %v9157_v52, -inf }
 0x42e   :  { %v9121_v53 = vpop.xlane.xlu0 %2463 }
 0x42f   :  { %11554 = vst [vmem:[#allocation93_spill] sm:$0xff] %v9138_v29  ;;  %v2723_v25 = vsel %vm2434_vm2, %v9138_v29, -inf  ;;  %v9171_v29 = vmul.f32 0.5, %v8879_v35 }
 0x430   :  { %2727 = vmax.xlane.f32.xlu1 %v2726_v27  ;;  %v9147_v27 = vpop.xlane.xlu1 %2457 }
 0x431   :  { %2568 = vmax.xlane.f32.xlu0 %v2567_v61  ;;  %v9152_v61 = vmul.f32 0.5, %v8857_v48  ;;  %11559 = vst [vmem:[#allocation98_spill] sm:$0xff] %v9171_v29  ;;  %v2585_v35 = vsel %vm2434_vm2, %v9171_v29, -inf }
 0x432   :  { %v9135_v39 = vpop.xlane.xlu0 %2460 }
 0x433   :  { %11556 = vst [vmem:[#allocation95_spill] sm:$0xff] %v9152_v61  ;;  %v2732_v48 = vsel %vm2434_vm2, %v9152_v61, -inf  ;;  %v9185_v61 = vmul.f32 0.5, %v8893_v14 }
 0x434   :  { %2577 = vmax.xlane.f32.xlu1 %v2576_v34 }
 0x435   :  { %2574 = vmax.xlane.f32.xlu0 %v2573_v59  ;;  %v9166_v59 = vmul.f32 0.5, %v8855_v3  ;;  %11561 = vst [vmem:[#allocation100_spill] sm:$0xff] %v9185_v61  ;;  %v2744_v14 = vsel %vm2434_vm2, %v9185_v61, -inf }
 0x436   :  { %v9149_v55 = vpop.xlane.xlu0 %2469 }
 0x437   :  { %11558 = vst [vmem:[#allocation97_spill] sm:$0xff] %v9166_v59  ;;  %v2582_v3 = vsel %vm2434_vm2, %v9166_v59, -inf  ;;  %v9199_v59 = vmul.f32 0.5, %v8891_v30 }
 0x438   :  { %2724 = vmax.xlane.f32.xlu1 %v2723_v25 }
 0x439   :  { %2580 = vmax.xlane.f32.xlu0 %v2579_v15  ;;  %v9161_v34 = vpop.xlane.xlu1 %2631  ;;  %11563 = vst [vmem:[#allocation102_spill] sm:$0xff] %v9199_v59  ;;  %v2594_v30 = vsel %vm2434_vm2, %v9199_v59, -inf }
 0x43a   :  { %v9163_v0 = vpop.xlane.xlu0 %2466 }
 0x43c   :  { %2733 = vmax.xlane.f32.xlu1 %v2732_v48 }
 0x43d   :  { %v9175_v25 = vpop.xlane.xlu1 %2628  ;;  %2739 = vmax.xlane.f32.xlu0 %v2738_v63  ;;  %v9194_v63 = vmul.f32 0.5, %v8873_v51 }
 0x43e   :  { %v9177_v15 = vpop.xlane.xlu0 %2475 }
 0x43f   :  { %11562 = vst [vmem:[#allocation101_spill] sm:$0xff] %v9194_v63  ;;  %v2588_v51 = vsel %vm2434_vm2, %v9194_v63, -inf  ;;  %v9227_v63 = vmul.f32 0.5, %v8911_v57 }
 0x440   :  { %2583 = vmax.xlane.f32.xlu1 %v2582_v3 }
 0x441   :  { %v9189_v48 = vpop.xlane.xlu1 %2637  ;;  %2586 = vmax.xlane.f32.xlu0 %v2585_v35  ;;  %v9208_v35 = vmul.f32 0.5, %v8881_v50  ;;  %11567 = vst [vmem:[#allocation106_spill] sm:$0xff] %v9227_v63  ;;  %v2750_v57 = vsel %vm2434_vm2, %v9227_v63, -inf }
 0x442   :  { %v9191_v52 = vpop.xlane.xlu0 %2472 }
 0x443   :  { %11564 = vst [vmem:[#allocation103_spill] sm:$0xff] %v9208_v35  ;;  %v2735_v50 = vsel %vm2434_vm2, %v9208_v35, -inf  ;;  %v9241_v35 = vmul.f32 0.5, %v8909_v47 }
 0x444   :  { %2730 = vmax.xlane.f32.xlu1 %v2729_v54 }
 0x445   :  { %v9203_v3 = vpop.xlane.xlu1 %2634  ;;  %2745 = vmax.xlane.f32.xlu0 %v2744_v14  ;;  %v9222_v14 = vmul.f32 0.5, %v8899_v8  ;;  %11569 = vst [vmem:[#allocation108_spill] sm:$0xff] %v9241_v35  ;;  %v2600_v47 = vsel %vm2434_vm2, %v9241_v35, -inf }
 0x446   :  { %v9205_v29 = vpop.xlane.xlu0 %2481 }
 0x447   :  { %11566 = vst [vmem:[#allocation105_spill] sm:$0xff] %v9222_v14  ;;  %v2741_v8 = vsel %vm2434_vm2, %v9222_v14, -inf  ;;  %v9255_v14 = vmul.f32 0.5, %v8915_v22 }
 0x448   :  { %2589 = vmax.xlane.f32.xlu1 %v2588_v51 }
 0x449   :  { %v9217_v54 = vpop.xlane.xlu1 %2643  ;;  %2595 = vmax.xlane.f32.xlu0 %v2594_v30  ;;  %v9236_v30 = vmul.f32 0.5, %v8917_v62  ;;  %11571 = vst [vmem:[#allocation110_spill] sm:$0xff] %v9255_v14  ;;  %v2597_v22 = vsel %vm2434_vm2, %v9255_v14, -inf }
 0x44a   :  { %v9219_v61 = vpop.xlane.xlu0 %2478 }
 0x44b   :  { %11568 = vst [vmem:[#allocation107_spill] sm:$0xff] %v9236_v30  ;;  %v2747_v62 = vsel %vm2434_vm2, %v9236_v30, -inf  ;;  %v9269_v30 = vmul.f32 0.5, %v8929_v46 }
 0x44c   :  { %2736 = vmax.xlane.f32.xlu1 %v2735_v50 }
 0x44d   :  { %v9231_v51 = vpop.xlane.xlu1 %2640  ;;  %2592 = vmax.xlane.f32.xlu0 %v2591_v44  ;;  %v9250_v44 = vmul.f32 0.5, %v8935_v10  ;;  %11573 = vst [vmem:[#allocation112_spill] sm:$0xff] %v9269_v30  ;;  %v2756_v46 = vsel %vm2434_vm2, %v9269_v30, -inf }
 0x44e   :  { %v9233_v59 = vpop.xlane.xlu0 %2487 }
 0x44f   :  { %11570 = vst [vmem:[#allocation109_spill] sm:$0xff] %v9250_v44  ;;  %v2753_v10 = vsel %vm2434_vm2, %v9250_v44, -inf  ;;  %v9283_v44 = vmul.f32 0.5, %v8927_v5 }
 0x450   :  { %2742 = vmax.xlane.f32.xlu1 %v2741_v8 }
 0x451   :  { %v9245_v50 = vpop.xlane.xlu1 %2649  ;;  %2751 = vmax.xlane.f32.xlu0 %v2750_v57  ;;  %v9264_v57 = vmul.f32 0.5, %v8947_v43  ;;  %11575 = vst [vmem:[#allocation114_spill] sm:$0xff] %v9283_v44  ;;  %v2606_v5 = vsel %vm2434_vm2, %v9283_v44, -inf }
 0x452   :  { %v9247_v7 = vpop.xlane.xlu0 %2484 }
 0x453   :  { %11572 = vst [vmem:[#allocation111_spill] sm:$0xff] %v9264_v57  ;;  %v2762_v43 = vsel %vm2434_vm2, %v9264_v57, -inf  ;;  %v9297_v57 = vmul.f32 0.5, %v8933_v42 }
 0x454   :  { %2748 = vmax.xlane.f32.xlu1 %v2747_v62 }
 0x455   :  { %v9259_v8 = vpop.xlane.xlu1 %2646  ;;  %2601 = vmax.xlane.f32.xlu0 %v2600_v47  ;;  %v9278_v47 = vmul.f32 0.5, %v8953_v31  ;;  %11577 = vst [vmem:[#allocation116_spill] sm:$0xff] %v9297_v57  ;;  %v2603_v42 = vsel %vm2434_vm2, %v9297_v57, -inf }
 0x456   :  { %v9261_v63 = vpop.xlane.xlu0 %2493 }
 0x457   :  { %11574 = vst [vmem:[#allocation113_spill] sm:$0xff] %v9278_v47  ;;  %v2759_v31 = vsel %vm2434_vm2, %v9278_v47, -inf  ;;  %v9311_v47 = vmul.f32 0.5, %v8945_v17 }
 0x458   :  { %2754 = vmax.xlane.f32.xlu1 %v2753_v10 }
 0x459   :  { %v9273_v62 = vpop.xlane.xlu1 %2655  ;;  %2598 = vmax.xlane.f32.xlu0 %v2597_v22  ;;  %v9292_v22 = vmul.f32 0.5, %v8965_v32  ;;  %11579 = vst [vmem:[#allocation118_spill] sm:$0xff] %v9311_v47  ;;  %v2612_v17 = vsel %vm2434_vm2, %v9311_v47, -inf }
 0x45a   :  { %v9275_v35 = vpop.xlane.xlu0 %2490 }
 0x45b   :  { %11576 = vst [vmem:[#allocation115_spill] sm:$0xff] %v9292_v22  ;;  %v2768_v32 = vsel %vm2434_vm2, %v9292_v22, -inf  ;;  %v9325_v22 = vmul.f32 0.5, %v8951_v38 }
 0x45c   :  { %2763 = vmax.xlane.f32.xlu1 %v2762_v43 }
 0x45d   :  { %v9287_v10 = vpop.xlane.xlu1 %2652  ;;  %2757 = vmax.xlane.f32.xlu0 %v2756_v46  ;;  %v9306_v46 = vmul.f32 0.5, %v8971_v45  ;;  %11581 = vst [vmem:[#allocation120_spill] sm:$0xff] %v9325_v22  ;;  %v2609_v38 = vsel %vm2434_vm2, %v9325_v22, -inf }
 0x45e   :  { %v9289_v14 = vpop.xlane.xlu0 %2499 }
 0x45f   :  { %11578 = vst [vmem:[#allocation117_spill] sm:$0xff] %v9306_v46  ;;  %v2765_v45 = vsel %vm2434_vm2, %v9306_v46, -inf  ;;  %v9339_v46 = vmul.f32 0.5, %v8963_v6 }
 0x460   :  { %2760 = vmax.xlane.f32.xlu1 %v2759_v31 }
 0x461   :  { %v9301_v43 = vpop.xlane.xlu1 %2661  ;;  %2607 = vmax.xlane.f32.xlu0 %v2606_v5  ;;  %v9320_v5 = vmul.f32 0.5, %v8983_v16  ;;  %11583 = vst [vmem:[#allocation122_spill] sm:$0xff] %v9339_v46  ;;  %v2618_v6 = vsel %vm2434_vm2, %v9339_v46, -inf }
 0x462   :  { %v9303_v30 = vpop.xlane.xlu0 %2496 }
 0x463   :  { %11580 = vst [vmem:[#allocation119_spill] sm:$0xff] %v9320_v5  ;;  %v2774_v16 = vsel %vm2434_vm2, %v9320_v5, -inf  ;;  %v9353_v5 = vmul.f32 0.5, %v8969_v26 }
 0x464   :  { %2769 = vmax.xlane.f32.xlu1 %v2768_v32 }
 0x465   :  { %v9315_v31 = vpop.xlane.xlu1 %2658  ;;  %2604 = vmax.xlane.f32.xlu0 %v2603_v42  ;;  %v9334_v42 = vmul.f32 0.5, %v8989_v28  ;;  %11585 = vst [vmem:[#allocation124_spill] sm:$0xff] %v9353_v5  ;;  %v2615_v26 = vsel %vm2434_vm2, %v9353_v5, -inf }
 0x466   :  { %v9317_v44 = vpop.xlane.xlu0 %2505 }
 0x467   :  { %11582 = vst [vmem:[#allocation121_spill] sm:$0xff] %v9334_v42  ;;  %v2771_v28 = vsel %vm2434_vm2, %v9334_v42, -inf  ;;  %v9367_v42 = vmul.f32 0.5, %v8981_v49 }
 0x468   :  { %2766 = vmax.xlane.f32.xlu1 %v2765_v45 }
 0x469   :  { %v9329_v32 = vpop.xlane.xlu1 %2667  ;;  %2613 = vmax.xlane.f32.xlu0 %v2612_v17  ;;  %v9348_v17 = vmul.f32 0.5, %v8999_v36  ;;  %11587 = vst [vmem:[#allocation126_spill] sm:$0xff] %v9367_v42  ;;  %v2624_v49 = vsel %vm2434_vm2, %v9367_v42, -inf }
 0x46a   :  { %v9331_v57 = vpop.xlane.xlu0 %2502 }
 0x46b   :  { %11584 = vst [vmem:[#allocation123_spill] sm:$0xff] %v9348_v17  ;;  %v2780_v36 = vsel %vm2434_vm2, %v9348_v17, -inf  ;;  %v9381_v17 = vmul.f32 0.5, %v8987_v41  ;;  %v9397_v41 = vmul.f32 0.5, %v9045_v60 }
 0x46c   :  { %2775 = vmax.xlane.f32.xlu1 %v2774_v16 }
 0x46d   :  { %v9343_v45 = vpop.xlane.xlu1 %2664  ;;  %2610 = vmax.xlane.f32.xlu0 %v2609_v38  ;;  %v9362_v38 = vmul.f32 0.5, %v9003_v2  ;;  %11589 = vst [vmem:[#allocation128_spill] sm:$0xff] %v9381_v17  ;;  %11591 = vst [vmem:[#allocation130_spill] sm:$0xff] %v9397_v41 }
 0x46e   :  { %v9345_v47 = vpop.xlane.xlu0 %2511 }
 0x46f   :  { %11586 = vst [vmem:[#allocation125_spill] sm:$0xff] %v9362_v38  ;;  %v2777_v2 = vsel %vm2434_vm2, %v9362_v38, -inf }
 0x470   :  { %2772 = vmax.xlane.f32.xlu1 %v2771_v28 }
 0x471   :  { %v9357_v16 = vpop.xlane.xlu1 %2673  ;;  %2619 = vmax.xlane.f32.xlu0 %v2618_v6  ;;  %v9376_v6 = vmul.f32 0.5, %v9013_v20  ;;  %v2819_v20 = vsub.f32 %v8569_v21, %v9061_v13  ;;  %v2821_v21 = vsub.f32 %v8577_v19, %v9077_v4  ;;  %v9413_v13 = vmul.f32 0.5, %v9059_v56  ;;  %v11595_v4 = vld [vmem:[#allocation13_spill] sm:$0xff] }
 0x472   :  { %v9359_v22 = vpop.xlane.xlu0 %2508 }
 0x473   :  { %11588 = vst [vmem:[#allocation127_spill] sm:$0xff] %v9376_v6  ;;  %v2786_v38 = vsel %vm2434_vm2, %v9376_v6, -inf  ;;  %v2947_v24 = vmul.f32 1.442695, %v2819_v20  ;;  %11593 = vst [vmem:[#allocation132_spill] sm:$0xff] %v9413_v13 }
 0x474   :  { %2781 = vmax.xlane.f32.xlu1 %v2780_v36  ;;  %v2951_v19 = vmul.f32 1.442695, %v2821_v21 }
 0x475   :  { %v9371_v28 = vpop.xlane.xlu1 %2670  ;;  %2616 = vmax.xlane.f32.xlu0 %v2615_v26  ;;  %v9390_v26 = vmul.f32 0.5, %v9017_v11  ;;  %v9406_v11 = vmul.f32 0.5, %v9027_v40  ;;  %v9420_v40 = vmul.f32 0.5, %v9031_v37  ;;  %7078 = vpow2.f32 %v2947_v24  ;;  %v11597_v37 = vld [vmem:[#allocation77_spill] sm:$0xff]  ;;  %v11599_v24 = vld [vmem:[#allocation10_spill] sm:$0xff] }
 0x476   :  { %v9373_v46 = vpop.xlane.xlu0 %2517  ;;  %v2820_v21 = vsub.f32 %v11599_v24, %v9082_v23  ;;  %7080 = vpow2.f32 %v2951_v19  ;;  %v11602_v19 = vld [vmem:[#allocation11_spill] sm:$0xff] }
 0x477   :  { %11590 = vst [vmem:[#allocation129_spill] sm:$0xff] %v9390_v26  ;;  %11592 = vst [vmem:[#allocation131_spill] sm:$0xff] %v9406_v11  ;;  %v2783_v60 = vsel %vm2434_vm2, %v9390_v26, -inf  ;;  %v2823_v26 = vsub.f32 %v11595_v4, %v9095_v1  ;;  %v2792_v56 = vsel %vm2434_vm2, %v9406_v11, -inf }
 0x478   :  { %2778 = vmax.xlane.f32.xlu1 %v2777_v2  ;;  %v2621_v2 = vsel %vm2434_vm2, %v9381_v17, -inf  ;;  %11594 = vst [vmem:[#allocation133_spill] sm:$0xff] %v9420_v40  ;;  %v9436_v17 = vmul.f32 0.5, %v11597_v37  ;;  %v2949_v23 = vmul.f32 1.442695, %v2820_v21 }
 0x479   :  { %v9385_v36 = vpop.xlane.xlu1 %2679  ;;  %2625 = vmax.xlane.f32.xlu0 %v2624_v49  ;;  %v2955_v4 = vmul.f32 1.442695, %v2823_v26  ;;  %v2822_v26 = vsub.f32 %v11602_v19, %v9107_v33  ;;  %v11607_v19 = vld [vmem:[#allocation83_spill] sm:$0xff] }
 0x47a   :  { %v9387_v5 = vpop.xlane.xlu0 %2514  ;;  %11598 = vst [vmem:[#allocation77_spill] sm:$0xff] %v9436_v17 }
 0x47b   :  { %7082 = vpow2.f32 %v2955_v4  ;;  %v11609_v4 = vld [vmem:[#allocation12_spill] sm:$0xff] }
 0x47c   :  { %2787 = vmax.xlane.f32.xlu1 %v2786_v38  ;;  %v2795_v38 = vsel %vm2434_vm2, %v9397_v41, -inf  ;;  %7084 = vpow2.f32 %v2949_v23 }
 0x47d   :  { %v9401_v42 = vpop.xlane.xlu1 %2676  ;;  %2622 = vmax.xlane.f32.xlu0 %v2621_v2 }
 0x47e   :  { %v9403_v49 = vpop.xlane.xlu0 %2523 }
 0x480   :  { %2784 = vmax.xlane.f32.xlu1 %v2783_v60  ;;  %v9429_v60 = vmul.f32 0.5, %v9075_v9  ;;  %v11600_v9 = vld [vmem:[#allocation15_spill] sm:$0xff] }
 0x481   :  { %v9417_v2 = vpop.xlane.xlu1 %2685  ;;  %2796 = vmax.xlane.f32.xlu0 %v2795_v38  ;;  %v2801_v38 = vsel %vm2434_vm2, %v9413_v13, -inf  ;;  %v2825_v11 = vsub.f32 %v11600_v9, %v9109_v12  ;;  %v9447_v13 = vmul.f32 0.5, %v9093_v58  ;;  %v2798_v12 = vsel %vm2434_vm2, %v9436_v17, -inf  ;;  %v11603_v9 = vld [vmem:[#allocation80_spill] sm:$0xff] }
 0x482   :  { %v9422_v20 = vpop.xlane.xlu0 %2520  ;;  %11596 = vst [vmem:[#allocation13_spill] sm:$0xff] %v9429_v60  ;;  %v9471_v17 = vmul.f32 0.5, %v11607_v19 }
 0x483   :  { %11601 = vst [vmem:[#allocation10_spill] sm:$0xff] %v9447_v13  ;;  %v2959_v58 = vmul.f32 1.442695, %v2825_v11  ;;  %v2813_v21 = vsel %vm2434_vm2, %v9447_v13, -inf  ;;  %v2824_v11 = vsub.f32 %v11609_v4, %v9126_v18  ;;  %v11613_v4 = vld [vmem:[#allocation86_spill] sm:$0xff] }
 0x484   :  { %2793 = vmax.xlane.f32.xlu1 %v2792_v56  ;;  %v2789_v56 = vsel %vm2434_vm2, %v9420_v40, -inf  ;;  %v9460_v40 = vmul.f32 0.5, %v11603_v9  ;;  %11608 = vst [vmem:[#allocation80_spill] sm:$0xff] %v9471_v17  ;;  %v2953_v9 = vmul.f32 1.442695, %v2822_v26 }
 0x485   :  { %v9433_v41 = vpop.xlane.xlu1 %2682  ;;  %2802 = vmax.xlane.f32.xlu0 %v2801_v38  ;;  %v2807_v38 = vsel %vm2434_vm2, %v9429_v60, -inf  ;;  %7086 = vpow2.f32 %v2959_v58  ;;  %v2957_v18 = vmul.f32 1.442695, %v2824_v11  ;;  %v11612_v58 = vld [vmem:[#allocation14_spill] sm:$0xff] }
 0x486   :  { %v9440_v1 = vpop.xlane.xlu0 %2529  ;;  %11604 = vst [vmem:[#allocation15_spill] sm:$0xff] %v9460_v40  ;;  %v2804_v13 = vsel %vm2434_vm2, %v9460_v40, -inf  ;;  %7088 = vpow2.f32 %v2953_v9  ;;  %v11615_v40 = vld [vmem:[#allocation18_spill] sm:$0xff] }
 0x488   :  { %2790 = vmax.xlane.f32.xlu1 %v2789_v56  ;;  %v11605_v56 = vld [vmem:[#allocation16_spill] sm:$0xff] }
 0x489   :  { %v9451_v37 = vpop.xlane.xlu1 %2691  ;;  %2808 = vmax.xlane.f32.xlu0 %v2807_v38  ;;  %v2828_v60 = vsub.f32 %v11605_v56, %v9121_v53  ;;  %v9466_v38 = vpop.eup %7078 }
 0x48a   :  { %v9455_v24 = vpop.xlane.xlu0 %2526  ;;  %11606 = vst [vmem:[#allocation11_spill] sm:$0xff] %v9466_v38  ;;  %v3203_v23 = vsel %vm2434_vm2, %v9466_v38, 0.0  ;;  %v2830_v38 = vsub.f32 %v11615_v40, %v9149_v55  ;;  %v11618_v55 = vld [vmem:[#allocation19_spill] sm:$0xff] }
 0x48b   :  { %v2965_v53 = vmul.f32 1.442695, %v2828_v60  ;;  %v2826_v60 = vsub.f32 %v11612_v58, %v9147_v27  ;;  %v11617_v58 = vld [vmem:[#allocation20_spill] sm:$0xff]  ;;  %v2829_v40 = vsub.f32 %v11618_v55, %v9163_v0  ;;  %v11621_v55 = vld [vmem:[#allocation22_spill] sm:$0xff] }
 0x48c   :  { %2799 = vmax.xlane.f32.xlu1 %v2798_v12  ;;  %v11610_v12 = vld [vmem:[#allocation17_spill] sm:$0xff] }
 0x48d   :  { %v9468_v33 = vpop.xlane.xlu1 %2688  ;;  %2814 = vmax.xlane.f32.xlu0 %v2813_v21  ;;  %v2827_v56 = vsub.f32 %v11610_v12, %v9135_v39  ;;  %v9483_v21 = vpop.eup %7080  ;;  %v2810_v39 = vsel %vm2434_vm2, %v9471_v17, -inf  ;;  %7090 = vpow2.f32 %v2965_v53  ;;  %v2969_v53 = vmul.f32 1.442695, %v2830_v38  ;;  %v11620_v38 = vld [vmem:[#allocation21_spill] sm:$0xff] }
 0x48e   :  { %v9475_v6 = vpop.xlane.xlu0 %2535  ;;  %11611 = vst [vmem:[#allocation16_spill] sm:$0xff] %v9483_v21  ;;  %v3209_v9 = vsel %vm2434_vm2, %v9483_v21, 0.0  ;;  %v9500_v11 = vpop.eup %7082  ;;  %7092 = vpow2.f32 %v2957_v18 }
 0x48f   :  { %v2963_v12 = vmul.f32 1.442695, %v2827_v56  ;;  %11616 = vst [vmem:[#allocation12_spill] sm:$0xff] %v9500_v11  ;;  %v3215_v18 = vsel %vm2434_vm2, %v9500_v11, 0.0 }
 0x490   :  { %2805 = vmax.xlane.f32.xlu1 %v2804_v13  ;;  %v9494_v13 = vmul.f32 0.5, %v11613_v4  ;;  %v2884_v4 = vsub.f32 %v11617_v58, %v9161_v34  ;;  %v2967_v58 = vmul.f32 1.442695, %v2829_v40 }
 0x491   :  { %v9485_v26 = vpop.xlane.xlu1 %2697  ;;  %3204 = vadd.xlane.f32.xlu0 %v3203_v23  ;;  %v2961_v23 = vmul.f32 1.442695, %v2826_v60  ;;  %7094 = vpow2.f32 %v2963_v12  ;;  %v2883_v12 = vsub.f32 %v11620_v38, %v9175_v25 }
 0x492   :  { %v9489_v19 = vpop.xlane.xlu0 %2532  ;;  %11614 = vst [vmem:[#allocation83_spill] sm:$0xff] %v9494_v13  ;;  %v2816_v56 = vsel %vm2434_vm2, %v9494_v13, -inf  ;;  %v3077_v34 = vmul.f32 1.442695, %v2884_v4 }
 0x493   :  { %7096 = vpow2.f32 %v2961_v23  ;;  %v3075_v25 = vmul.f32 1.442695, %v2883_v12 }
 0x494   :  { %2811 = vmax.xlane.f32.xlu1 %v2810_v39  ;;  %v9512_v39 = vpop.eup %7084  ;;  %7098 = vpow2.f32 %v2969_v53  ;;  %v11624_v53 = vld [vmem:[#allocation23_spill] sm:$0xff] }
 0x495   :  { %v9502_v27 = vpop.xlane.xlu1 %2694  ;;  %3210 = vadd.xlane.f32.xlu0 %v3209_v9  ;;  %v9516_v60 = vpop.eup %7086  ;;  %v3206_v13 = vsel %vm2434_vm2, %v9512_v39, 0.0  ;;  %7100 = vpow2.f32 %v3077_v34  ;;  %v2886_v40 = vsub.f32 %v11624_v53, %v9189_v48 }
 0x496   :  { %v9506_v17 = vpop.xlane.xlu0 %2541  ;;  %11619 = vst [vmem:[#allocation17_spill] sm:$0xff] %v9516_v60  ;;  %v9528_v11 = vpop.eup %7088  ;;  %v3221_v23 = vsel %vm2434_vm2, %v9516_v60, 0.0  ;;  %7102 = vpow2.f32 %v2967_v58  ;;  %v11628_v58 = vld [vmem:[#allocation25_spill] sm:$0xff] }
 0x497   :  { %11622 = vst [vmem:[#allocation14_spill] sm:$0xff] %v9528_v11  ;;  %v9532_v4 = vpop.eup %7090  ;;  %v3212_v60 = vsel %vm2434_vm2, %v9528_v11, 0.0  ;;  %7104 = vpow2.f32 %v3075_v25  ;;  %v3081_v48 = vmul.f32 1.442695, %v2886_v40 }
 0x498   :  { %2817 = vmax.xlane.f32.xlu1 %v2816_v56  ;;  %v2832_v56 = vsub.f32 %v11621_v55, %v9177_v15  ;;  %11623 = vst [vmem:[#allocation86_spill] sm:$0xff] %v9532_v4  ;;  %v11625_v55 = vld [vmem:[#allocation24_spill] sm:$0xff]  ;;  %v9544_v21 = vpop.eup %7092  ;;  %v3230_v34 = vsel %vm2434_vm2, %v9532_v4, 0.0 }
 0x499   :  { %v9518_v9 = vpop.xlane.xlu1 %2703  ;;  %3216 = vadd.xlane.f32.xlu0 %v3215_v18  ;;  %11626 = vst [vmem:[#allocation18_spill] sm:$0xff] %v9544_v21  ;;  %v3218_v4 = vsel %vm2434_vm2, %v9544_v21, 0.0 }
 0x49a   :  { %v9522_v0 = vpop.xlane.xlu0 %2538  ;;  %v2973_v38 = vmul.f32 1.442695, %v2832_v56  ;;  %v2885_v56 = vsub.f32 %v11628_v58, %v9203_v3 }
 0x49b   :  { %v9548_v12 = vpop.eup %7094 }
 0x49c   :  { %3207 = vadd.xlane.f32.xlu1 %v3206_v13  ;;  %v2831_v13 = vsub.f32 %v11625_v55, %v9191_v52  ;;  %11627 = vst [vmem:[#allocation20_spill] sm:$0xff] %v9548_v12  ;;  %7106 = vpow2.f32 %v2973_v38  ;;  %v11629_v55 = vld [vmem:[#allocation26_spill] sm:$0xff]  ;;  %v3227_v25 = vsel %vm2434_vm2, %v9548_v12, 0.0  ;;  %v3079_v3 = vmul.f32 1.442695, %v2885_v56  ;;  %v11632_v38 = vld [vmem:[#allocation27_spill] sm:$0xff] }
 0x49d   :  { %v9534_v18 = vpop.xlane.xlu1 %2700  ;;  %3222 = vadd.xlane.f32.xlu0 %v3221_v23  ;;  %v9560_v11 = vpop.eup %7096  ;;  %7108 = vpow2.f32 %v3081_v48 }
 0x49e   :  { %v9538_v15 = vpop.xlane.xlu0 %2547  ;;  %v2971_v53 = vmul.f32 1.442695, %v2831_v13  ;;  %11630 = vst [vmem:[#allocation19_spill] sm:$0xff] %v9560_v11  ;;  %v9564_v40 = vpop.eup %7098  ;;  %v2888_v13 = vsub.f32 %v11632_v38, %v9217_v54  ;;  %v3224_v12 = vsel %vm2434_vm2, %v9560_v11, 0.0 }
 0x49f   :  { %11631 = vst [vmem:[#allocation21_spill] sm:$0xff] %v9564_v40  ;;  %v9576_v21 = vpop.eup %7100  ;;  %v3236_v48 = vsel %vm2434_vm2, %v9564_v40, 0.0 }
 0x4a0   :  { %3213 = vadd.xlane.f32.xlu1 %v3212_v60  ;;  %v2834_v60 = vsub.f32 %v11629_v55, %v9205_v29  ;;  %7110 = vpow2.f32 %v2971_v53  ;;  %v11633_v55 = vld [vmem:[#allocation28_spill] sm:$0xff]  ;;  %11634 = vst [vmem:[#allocation22_spill] sm:$0xff] %v9576_v21  ;;  %v9580_v56 = vpop.eup %7102  ;;  %v3085_v54 = vmul.f32 1.442695, %v2888_v13  ;;  %v11636_v53 = vld [vmem:[#allocation29_spill] sm:$0xff]  ;;  %v3398_v40 = vsel %vm2434_vm2, %v9576_v21, 0.0 }
 0x4a1   :  { %v9550_v23 = vpop.xlane.xlu1 %2709  ;;  %3231 = vadd.xlane.f32.xlu0 %v3230_v34  ;;  %11635 = vst [vmem:[#allocation23_spill] sm:$0xff] %v9580_v56  ;;  %7112 = vpow2.f32 %v3079_v3  ;;  %v9592_v11 = vpop.eup %7104  ;;  %v3233_v3 = vsel %vm2434_vm2, %v9580_v56, 0.0 }
 0x4a2   :  { %v9554_v52 = vpop.xlane.xlu0 %2544  ;;  %v2977_v58 = vmul.f32 1.442695, %v2834_v60  ;;  %v2887_v60 = vsub.f32 %v11636_v53, %v9231_v51  ;;  %11638 = vst [vmem:[#allocation24_spill] sm:$0xff] %v9592_v11  ;;  %v3395_v21 = vsel %vm2434_vm2, %v9592_v11, 0.0 }
 0x4a4   :  { %3219 = vadd.xlane.f32.xlu1 %v3218_v4  ;;  %v2833_v4 = vsub.f32 %v11633_v55, %v9219_v61  ;;  %7114 = vpow2.f32 %v2977_v58  ;;  %v11637_v55 = vld [vmem:[#allocation30_spill] sm:$0xff]  ;;  %v3083_v51 = vmul.f32 1.442695, %v2887_v60  ;;  %v11640_v58 = vld [vmem:[#allocation31_spill] sm:$0xff] }
 0x4a5   :  { %v9566_v34 = vpop.xlane.xlu1 %2706  ;;  %3228 = vadd.xlane.f32.xlu0 %v3227_v25  ;;  %7116 = vpow2.f32 %v3085_v54 }
 0x4a6   :  { %v9570_v29 = vpop.xlane.xlu0 %2553  ;;  %v2975_v38 = vmul.f32 1.442695, %v2833_v4  ;;  %v9596_v13 = vpop.eup %7106  ;;  %v2890_v4 = vsub.f32 %v11640_v58, %v9245_v50 }
 0x4a7   :  { %11639 = vst [vmem:[#allocation25_spill] sm:$0xff] %v9596_v13  ;;  %v9608_v56 = vpop.eup %7108  ;;  %v3242_v54 = vsel %vm2434_vm2, %v9596_v13, 0.0 }
 0x4a8   :  { %3225 = vadd.xlane.f32.xlu1 %v3224_v12  ;;  %v2836_v12 = vsub.f32 %v11637_v55, %v9233_v59  ;;  %7118 = vpow2.f32 %v2975_v38  ;;  %v11641_v55 = vld [vmem:[#allocation32_spill] sm:$0xff]  ;;  %11642 = vst [vmem:[#allocation26_spill] sm:$0xff] %v9608_v56  ;;  %v3089_v50 = vmul.f32 1.442695, %v2890_v4  ;;  %v11644_v38 = vld [vmem:[#allocation33_spill] sm:$0xff]  ;;  %v3404_v13 = vsel %vm2434_vm2, %v9608_v56, 0.0 }
 0x4a9   :  { %v9582_v25 = vpop.xlane.xlu1 %2715  ;;  %3237 = vadd.xlane.f32.xlu0 %v3236_v48  ;;  %7120 = vpow2.f32 %v3083_v51 }
 0x4aa   :  { %v9586_v61 = vpop.xlane.xlu0 %2550  ;;  %v2981_v53 = vmul.f32 1.442695, %v2836_v12  ;;  %v9612_v60 = vpop.eup %7110  ;;  %v2889_v12 = vsub.f32 %v11644_v38, %v9259_v8 }
 0x4ab   :  { %11643 = vst [vmem:[#allocation27_spill] sm:$0xff] %v9612_v60  ;;  %v9624_v11 = vpop.eup %7112  ;;  %v3239_v51 = vsel %vm2434_vm2, %v9612_v60, 0.0 }
 0x4ac   :  { %3399 = vadd.xlane.f32.xlu1 %v3398_v40  ;;  %v2835_v40 = vsub.f32 %v11641_v55, %v9247_v7  ;;  %7122 = vpow2.f32 %v2981_v53  ;;  %v11645_v55 = vld [vmem:[#allocation34_spill] sm:$0xff]  ;;  %11646 = vst [vmem:[#allocation28_spill] sm:$0xff] %v9624_v11  ;;  %v3087_v8 = vmul.f32 1.442695, %v2889_v12  ;;  %v11648_v53 = vld [vmem:[#allocation40_spill] sm:$0xff]  ;;  %v3401_v56 = vsel %vm2434_vm2, %v9624_v11, 0.0 }
 0x4ad   :  { %v9598_v48 = vpop.xlane.xlu1 %2712  ;;  %3234 = vadd.xlane.f32.xlu0 %v3233_v3  ;;  %7124 = vpow2.f32 %v3089_v50 }
 0x4ae   :  { %v9602_v59 = vpop.xlane.xlu0 %2559  ;;  %v2979_v58 = vmul.f32 1.442695, %v2835_v40  ;;  %v9628_v4 = vpop.eup %7114  ;;  %v2839_v40 = vsub.f32 %v11648_v53, %v9303_v30  ;;  %v11652_v30 = vld [vmem:[#allocation35_spill] sm:$0xff] }
 0x4af   :  { %11647 = vst [vmem:[#allocation29_spill] sm:$0xff] %v9628_v4  ;;  %v9640_v60 = vpop.eup %7116  ;;  %v3248_v50 = vsel %vm2434_vm2, %v9628_v4, 0.0 }
 0x4b0   :  { %3396 = vadd.xlane.f32.xlu1 %v3395_v21  ;;  %v2838_v21 = vsub.f32 %v11645_v55, %v9261_v63  ;;  %7126 = vpow2.f32 %v2979_v58  ;;  %v11649_v55 = vld [vmem:[#allocation36_spill] sm:$0xff]  ;;  %11650 = vst [vmem:[#allocation30_spill] sm:$0xff] %v9640_v60  ;;  %v2892_v58 = vsub.f32 %v11652_v30, %v9273_v62  ;;  %v3410_v4 = vsel %vm2434_vm2, %v9640_v60, 0.0 }
 0x4b1   :  { %v9614_v3 = vpop.xlane.xlu1 %2721  ;;  %3243 = vadd.xlane.f32.xlu0 %v3242_v54  ;;  %7128 = vpow2.f32 %v3087_v8 }
 0x4b2   :  { %v9618_v7 = vpop.xlane.xlu0 %2556  ;;  %v2985_v38 = vmul.f32 1.442695, %v2838_v21  ;;  %v9644_v12 = vpop.eup %7118  ;;  %v2987_v21 = vmul.f32 1.442695, %v2839_v40  ;;  %v3093_v40 = vmul.f32 1.442695, %v2892_v58 }
 0x4b3   :  { %11651 = vst [vmem:[#allocation31_spill] sm:$0xff] %v9644_v12  ;;  %v9656_v11 = vpop.eup %7120  ;;  %v3245_v8 = vsel %vm2434_vm2, %v9644_v12, 0.0 }
 0x4b4   :  { %3405 = vadd.xlane.f32.xlu1 %v3404_v13  ;;  %v2837_v13 = vsub.f32 %v11649_v55, %v9275_v35  ;;  %7130 = vpow2.f32 %v2985_v38  ;;  %v11653_v55 = vld [vmem:[#allocation38_spill] sm:$0xff]  ;;  %11654 = vst [vmem:[#allocation32_spill] sm:$0xff] %v9656_v11  ;;  %v11656_v38 = vld [vmem:[#allocation37_spill] sm:$0xff]  ;;  %v3407_v60 = vsel %vm2434_vm2, %v9656_v11, 0.0 }
 0x4b5   :  { %v9630_v54 = vpop.xlane.xlu1 %2571  ;;  %3240 = vadd.xlane.f32.xlu0 %v3239_v51  ;;  %7132 = vpow2.f32 %v2987_v21 }
 0x4b6   :  { %v9634_v63 = vpop.xlane.xlu0 %2565  ;;  %v2983_v53 = vmul.f32 1.442695, %v2837_v13  ;;  %v2891_v13 = vsub.f32 %v11656_v38, %v9287_v10 }
 0x4b8   :  { %3402 = vadd.xlane.f32.xlu1 %v3401_v56  ;;  %v2840_v56 = vsub.f32 %v11653_v55, %v9289_v14  ;;  %7134 = vpow2.f32 %v2983_v53  ;;  %v11657_v55 = vld [vmem:[#allocation42_spill] sm:$0xff]  ;;  %v3091_v21 = vmul.f32 1.442695, %v2891_v13  ;;  %v11660_v53 = vld [vmem:[#allocation44_spill] sm:$0xff] }
 0x4b9   :  { %v9646_v51 = vpop.xlane.xlu1 %2718  ;;  %3249 = vadd.xlane.f32.xlu0 %v3248_v50  ;;  %v9660_v50 = vpop.eup %7122  ;;  %7136 = vpow2.f32 %v3093_v40 }
 0x4ba   :  { %v9650_v35 = vpop.xlane.xlu0 %2562  ;;  %11655 = vst [vmem:[#allocation33_spill] sm:$0xff] %v9660_v50  ;;  %v2989_v30 = vmul.f32 1.442695, %v2840_v56  ;;  %v9672_v12 = vpop.eup %7124  ;;  %v3254_v58 = vsel %vm2434_vm2, %v9660_v50, 0.0  ;;  %v2841_v56 = vsub.f32 %v11660_v53, %v9331_v57  ;;  %v11664_v57 = vld [vmem:[#allocation39_spill] sm:$0xff] }
 0x4bb   :  { %11658 = vst [vmem:[#allocation34_spill] sm:$0xff] %v9672_v12  ;;  %v3416_v50 = vsel %vm2434_vm2, %v9672_v12, 0.0 }
 0x4bc   :  { %3411 = vadd.xlane.f32.xlu1 %v3410_v4  ;;  %v2842_v4 = vsub.f32 %v11657_v55, %v9317_v44  ;;  %7138 = vpow2.f32 %v2989_v30  ;;  %v11661_v55 = vld [vmem:[#allocation46_spill] sm:$0xff]  ;;  %v2894_v30 = vsub.f32 %v11664_v57, %v9301_v43  ;;  %v11669_v57 = vld [vmem:[#allocation45_spill] sm:$0xff] }
 0x4bd   :  { %v9662_v62 = vpop.xlane.xlu1 %2727  ;;  %3246 = vadd.xlane.f32.xlu0 %v3245_v8  ;;  %v9676_v8 = vpop.eup %7126  ;;  %7140 = vpow2.f32 %v3091_v21 }
 0x4be   :  { %v9666_v14 = vpop.xlane.xlu0 %2568  ;;  %11659 = vst [vmem:[#allocation40_spill] sm:$0xff] %v9676_v8  ;;  %v2993_v38 = vmul.f32 1.442695, %v2842_v4  ;;  %v9688_v11 = vpop.eup %7128  ;;  %v3251_v40 = vsel %vm2434_vm2, %v9676_v8, 0.0  ;;  %v2991_v4 = vmul.f32 1.442695, %v2841_v56 }
 0x4bf   :  { %11662 = vst [vmem:[#allocation36_spill] sm:$0xff] %v9688_v11  ;;  %v9692_v13 = vpop.eup %7130  ;;  %v3413_v12 = vsel %vm2434_vm2, %v9688_v11, 0.0  ;;  %v3097_v56 = vmul.f32 1.442695, %v2894_v30 }
 0x4c0   :  { %3408 = vadd.xlane.f32.xlu1 %v3407_v60  ;;  %v2844_v60 = vsub.f32 %v11661_v55, %v9345_v47  ;;  %11663 = vst [vmem:[#allocation35_spill] sm:$0xff] %v9692_v13  ;;  %7142 = vpow2.f32 %v2993_v38  ;;  %v11665_v55 = vld [vmem:[#allocation50_spill] sm:$0xff]  ;;  %v9704_v8 = vpop.eup %7132  ;;  %v3260_v21 = vsel %vm2434_vm2, %v9692_v13, 0.0  ;;  %v11668_v38 = vld [vmem:[#allocation41_spill] sm:$0xff] }
 0x4c1   :  { %v9678_v10 = vpop.xlane.xlu1 %2577  ;;  %3255 = vadd.xlane.f32.xlu0 %v3254_v58  ;;  %11666 = vst [vmem:[#allocation38_spill] sm:$0xff] %v9704_v8  ;;  %7144 = vpow2.f32 %v2991_v4  ;;  %v3263_v13 = vsel %vm2434_vm2, %v9704_v8, 0.0 }
 0x4c2   :  { %v9682_v44 = vpop.xlane.xlu0 %2574  ;;  %v2997_v53 = vmul.f32 1.442695, %v2844_v60  ;;  %v2893_v60 = vsub.f32 %v11668_v38, %v9315_v31 }
 0x4c4   :  { %3417 = vadd.xlane.f32.xlu1 %v3416_v50  ;;  %v2846_v50 = vsub.f32 %v11665_v55, %v9373_v46  ;;  %v2895_v55 = vsub.f32 %v11669_v57, %v9343_v45  ;;  %7146 = vpow2.f32 %v2997_v53  ;;  %v3095_v4 = vmul.f32 1.442695, %v2893_v60  ;;  %v11672_v45 = vld [vmem:[#allocation48_spill] sm:$0xff]  ;;  %v11673_v57 = vld [vmem:[#allocation54_spill] sm:$0xff] }
 0x4c5   :  { %v9694_v58 = vpop.xlane.xlu1 %2724  ;;  %3252 = vadd.xlane.f32.xlu0 %v3251_v40  ;;  %v9708_v40 = vpop.eup %7134  ;;  %7148 = vpow2.f32 %v3097_v56  ;;  %v2843_v53 = vsub.f32 %v11672_v45, %v9359_v22  ;;  %v11676_v22 = vld [vmem:[#allocation43_spill] sm:$0xff]  ;;  %v11677_v45 = vld [vmem:[#allocation49_spill] sm:$0xff] }
 0x4c6   :  { %v9698_v47 = vpop.xlane.xlu0 %2580  ;;  %11667 = vst [vmem:[#allocation37_spill] sm:$0xff] %v9708_v40  ;;  %v9720_v11 = vpop.eup %7136  ;;  %v3257_v30 = vsel %vm2434_vm2, %v9708_v40, 0.0  ;;  %v3099_v38 = vmul.f32 1.442695, %v2895_v55  ;;  %v2896_v55 = vsub.f32 %v11676_v22, %v9329_v32 }
 0x4c7   :  { %11670 = vst [vmem:[#allocation42_spill] sm:$0xff] %v9720_v11  ;;  %v3422_v8 = vsel %vm2434_vm2, %v9720_v11, 0.0 }
 0x4c8   :  { %3414 = vadd.xlane.f32.xlu1 %v3413_v12  ;;  %v3001_v12 = vmul.f32 1.442695, %v2846_v50 }
 0x4c9   :  { %v9710_v43 = vpop.xlane.xlu1 %2733  ;;  %3261 = vadd.xlane.f32.xlu0 %v3260_v21  ;;  %v9724_v21 = vpop.eup %7138 }
 0x4ca   :  { %v9714_v46 = vpop.xlane.xlu0 %2739  ;;  %11671 = vst [vmem:[#allocation44_spill] sm:$0xff] %v9724_v21  ;;  %7150 = vpow2.f32 %v3001_v12  ;;  %v9736_v40 = vpop.eup %7140  ;;  %v3266_v56 = vsel %vm2434_vm2, %v9724_v21, 0.0  ;;  %v2995_v12 = vmul.f32 1.442695, %v2843_v53  ;;  %v3101_v53 = vmul.f32 1.442695, %v2896_v55 }
 0x4cb   :  { %11674 = vst [vmem:[#allocation46_spill] sm:$0xff] %v9736_v40  ;;  %v9740_v60 = vpop.eup %7142  ;;  %7152 = vpow2.f32 %v3095_v4  ;;  %v3419_v11 = vsel %vm2434_vm2, %v9736_v40, 0.0 }
 0x4cc   :  { %3264 = vadd.xlane.f32.xlu1 %v3263_v13  ;;  %v2848_v13 = vsub.f32 %v11673_v57, %v9403_v49  ;;  %11675 = vst [vmem:[#allocation39_spill] sm:$0xff] %v9740_v60  ;;  %7154 = vpow2.f32 %v3099_v38  ;;  %v2897_v57 = vsub.f32 %v11677_v45, %v9371_v28  ;;  %v9752_v21 = vpop.eup %7144  ;;  %v3272_v4 = vsel %vm2434_vm2, %v9740_v60, 0.0  ;;  %v11680_v38 = vld [vmem:[#allocation52_spill] sm:$0xff] }
 0x4cd   :  { %v9726_v31 = vpop.xlane.xlu1 %2583  ;;  %3258 = vadd.xlane.f32.xlu0 %v3257_v30  ;;  %11678 = vst [vmem:[#allocation50_spill] sm:$0xff] %v9752_v21  ;;  %7156 = vpow2.f32 %v2995_v12  ;;  %v2845_v28 = vsub.f32 %v11680_v38, %v9387_v5  ;;  %v11681_v45 = vld [vmem:[#allocation56_spill] sm:$0xff]  ;;  %v3269_v60 = vsel %vm2434_vm2, %v9752_v21, 0.0  ;;  %v11684_v5 = vld [vmem:[#allocation47_spill] sm:$0xff] }
 0x4ce   :  { %v9730_v50 = vpop.xlane.xlu0 %2586  ;;  %v3103_v22 = vmul.f32 1.442695, %v2897_v57  ;;  %v2898_v57 = vsub.f32 %v11684_v5, %v9357_v16  ;;  %v11689_v5 = vld [vmem:[#allocation53_spill] sm:$0xff] }
 0x4d0   :  { %3423 = vadd.xlane.f32.xlu1 %v3422_v8  ;;  %v3005_v8 = vmul.f32 1.442695, %v2848_v13 }
 0x4d1   :  { %v9742_v30 = vpop.xlane.xlu1 %2730  ;;  %3267 = vadd.xlane.f32.xlu0 %v3266_v56  ;;  %v9756_v56 = vpop.eup %7146 }
 0x4d2   :  { %v9746_v49 = vpop.xlane.xlu0 %2745  ;;  %11679 = vst [vmem:[#allocation41_spill] sm:$0xff] %v9756_v56  ;;  %7158 = vpow2.f32 %v3005_v8  ;;  %v9768_v40 = vpop.eup %7148  ;;  %v3278_v55 = vsel %vm2434_vm2, %v9756_v56, 0.0  ;;  %v2999_v8 = vmul.f32 1.442695, %v2845_v28  ;;  %v3105_v28 = vmul.f32 1.442695, %v2898_v57 }
 0x4d3   :  { %11682 = vst [vmem:[#allocation45_spill] sm:$0xff] %v9768_v40  ;;  %7160 = vpow2.f32 %v3101_v53  ;;  %v3428_v56 = vsel %vm2434_vm2, %v9768_v40, 0.0 }
 0x4d4   :  { %3420 = vadd.xlane.f32.xlu1 %v3419_v11  ;;  %v2847_v11 = vsub.f32 %v11681_v45, %v9422_v20  ;;  %v9772_v12 = vpop.eup %7150  ;;  %7162 = vpow2.f32 %v3103_v22  ;;  %v11685_v45 = vld [vmem:[#allocation58_spill] sm:$0xff]  ;;  %v11688_v22 = vld [vmem:[#allocation51_spill] sm:$0xff] }
 0x4d5   :  { %v9758_v32 = vpop.xlane.xlu1 %2589  ;;  %3273 = vadd.xlane.f32.xlu0 %v3272_v4  ;;  %11683 = vst [vmem:[#allocation48_spill] sm:$0xff] %v9772_v12  ;;  %v9784_v21 = vpop.eup %7152  ;;  %v3284_v53 = vsel %vm2434_vm2, %v9772_v12, 0.0  ;;  %7164 = vpow2.f32 %v2999_v8 }
 0x4d6   :  { %v9762_v13 = vpop.xlane.xlu0 %2595  ;;  %v3003_v38 = vmul.f32 1.442695, %v2847_v11  ;;  %11686 = vst [vmem:[#allocation54_spill] sm:$0xff] %v9784_v21  ;;  %v2900_v11 = vsub.f32 %v11688_v22, %v9385_v36  ;;  %v3425_v12 = vsel %vm2434_vm2, %v9784_v21, 0.0 }
 0x4d8   :  { %3270 = vadd.xlane.f32.xlu1 %v3269_v60  ;;  %v2850_v60 = vsub.f32 %v11685_v45, %v9440_v1  ;;  %v2899_v45 = vsub.f32 %v11689_v5, %v9401_v42  ;;  %7166 = vpow2.f32 %v3003_v38  ;;  %v3109_v8 = vmul.f32 1.442695, %v2900_v11  ;;  %v11692_v42 = vld [vmem:[#allocation55_spill] sm:$0xff]  ;;  %v11693_v5 = vld [vmem:[#allocation60_spill] sm:$0xff] }
 0x4d9   :  { %v9774_v4 = vpop.xlane.xlu1 %2736  ;;  %3279 = vadd.xlane.f32.xlu0 %v3278_v55  ;;  %v9788_v55 = vpop.eup %7154  ;;  %7168 = vpow2.f32 %v3105_v28  ;;  %v2902_v38 = vsub.f32 %v11692_v42, %v9417_v2 }
 0x4da   :  { %v9778_v20 = vpop.xlane.xlu0 %2592  ;;  %11687 = vst [vmem:[#allocation43_spill] sm:$0xff] %v9788_v55  ;;  %v9800_v40 = vpop.eup %7156  ;;  %v3431_v57 = vsel %vm2434_vm2, %v9788_v55, 0.0  ;;  %v3107_v22 = vmul.f32 1.442695, %v2899_v45  ;;  %v11696_v45 = vld [vmem:[#allocation59_spill] sm:$0xff] }
 0x4db   :  { %11690 = vst [vmem:[#allocation49_spill] sm:$0xff] %v9800_v40  ;;  %v3275_v55 = vsel %vm2434_vm2, %v9800_v40, 0.0  ;;  %v3113_v2 = vmul.f32 1.442695, %v2902_v38 }
 0x4dc   :  { %3429 = vadd.xlane.f32.xlu1 %v3428_v56  ;;  %v3009_v56 = vmul.f32 1.442695, %v2850_v60 }
 0x4dd   :  { %v9790_v16 = vpop.xlane.xlu1 %2742  ;;  %3285 = vadd.xlane.f32.xlu0 %v3284_v53  ;;  %v9804_v53 = vpop.eup %7158 }
 0x4de   :  { %v9794_v1 = vpop.xlane.xlu0 %2751  ;;  %11691 = vst [vmem:[#allocation52_spill] sm:$0xff] %v9804_v53  ;;  %7170 = vpow2.f32 %v3009_v56  ;;  %v9816_v21 = vpop.eup %7160  ;;  %v3290_v28 = vsel %vm2434_vm2, %v9804_v53, 0.0  ;;  %v2904_v56 = vsub.f32 %v11696_v45, %v9451_v37  ;;  %v11701_v45 = vld [vmem:[#allocation57_spill] sm:$0xff] }
 0x4df   :  { %11694 = vst [vmem:[#allocation56_spill] sm:$0xff] %v9816_v21  ;;  %v9820_v11 = vpop.eup %7162  ;;  %7172 = vpow2.f32 %v3109_v8  ;;  %v3434_v53 = vsel %vm2434_vm2, %v9816_v21, 0.0 }
 0x4e0   :  { %3426 = vadd.xlane.f32.xlu1 %v3425_v12  ;;  %v2849_v12 = vsub.f32 %v11693_v5, %v9455_v24  ;;  %11695 = vst [vmem:[#allocation47_spill] sm:$0xff] %v9820_v11  ;;  %7174 = vpow2.f32 %v3107_v22  ;;  %v11697_v5 = vld [vmem:[#allocation62_spill] sm:$0xff]  ;;  %v9832_v40 = vpop.eup %7164  ;;  %v3437_v8 = vsel %vm2434_vm2, %v9820_v11, 0.0  ;;  %v3117_v37 = vmul.f32 1.442695, %v2904_v56  ;;  %v11700_v22 = vld [vmem:[#allocation61_spill] sm:$0xff] }
 0x4e1   :  { %v9806_v36 = vpop.xlane.xlu1 %2748  ;;  %3432 = vadd.xlane.f32.xlu0 %v3431_v57  ;;  %11698 = vst [vmem:[#allocation58_spill] sm:$0xff] %v9832_v40  ;;  %7176 = vpow2.f32 %v3113_v2  ;;  %v3281_v11 = vsel %vm2434_vm2, %v9832_v40, 0.0 }
 0x4e2   :  { %v9810_v60 = vpop.xlane.xlu0 %2601  ;;  %v3007_v42 = vmul.f32 1.442695, %v2849_v12  ;;  %v9836_v38 = vpop.eup %7166  ;;  %v2903_v12 = vsub.f32 %v11700_v22, %v9468_v33 }
 0x4e3   :  { %11699 = vst [vmem:[#allocation51_spill] sm:$0xff] %v9836_v38  ;;  %v9848_v21 = vpop.eup %7168  ;;  %v3287_v2 = vsel %vm2434_vm2, %v9836_v38, 0.0 }
 0x4e4   :  { %3276 = vadd.xlane.f32.xlu1 %v3275_v55  ;;  %v2852_v55 = vsub.f32 %v11697_v5, %v9475_v6  ;;  %v2901_v5 = vsub.f32 %v11701_v45, %v9433_v41  ;;  %7178 = vpow2.f32 %v3007_v42  ;;  %11702 = vst [vmem:[#allocation53_spill] sm:$0xff] %v9848_v21  ;;  %v3115_v33 = vmul.f32 1.442695, %v2903_v12  ;;  %v11704_v41 = vld [vmem:[#allocation63_spill] sm:$0xff]  ;;  %v11705_v45 = vld [vmem:[#allocation64_spill] sm:$0xff] }
 0x4e5   :  { %v9822_v57 = vpop.xlane.xlu1 %2754  ;;  %3291 = vadd.xlane.f32.xlu0 %v3290_v28  ;;  %7180 = vpow2.f32 %v3117_v37  ;;  %v2906_v42 = vsub.f32 %v11704_v41, %v9485_v26  ;;  %v3440_v38 = vsel %vm2434_vm2, %v9848_v21, 0.0 }
 0x4e6   :  { %v9826_v24 = vpop.xlane.xlu0 %2598  ;;  %v3111_v22 = vmul.f32 1.442695, %v2901_v5  ;;  %v11708_v5 = vld [vmem:[#allocation65_spill] sm:$0xff] }
 0x4e7   :  { %v3121_v26 = vmul.f32 1.442695, %v2906_v42 }
 0x4e8   :  { %3435 = vadd.xlane.f32.xlu1 %v3434_v53  ;;  %v3013_v53 = vmul.f32 1.442695, %v2852_v55  ;;  %v9852_v56 = vpop.eup %7170 }
 0x4e9   :  { %v9838_v28 = vpop.xlane.xlu1 %2763  ;;  %3438 = vadd.xlane.f32.xlu0 %v3437_v8  ;;  %11703 = vst [vmem:[#allocation55_spill] sm:$0xff] %v9852_v56  ;;  %v9864_v40 = vpop.eup %7172  ;;  %v3296_v37 = vsel %vm2434_vm2, %v9852_v56, 0.0 }
 0x4ea   :  { %v9842_v6 = vpop.xlane.xlu0 %2757  ;;  %7182 = vpow2.f32 %v3013_v53  ;;  %11706 = vst [vmem:[#allocation60_spill] sm:$0xff] %v9864_v40  ;;  %v9868_v12 = vpop.eup %7174  ;;  %v2905_v53 = vsub.f32 %v11708_v5, %v9502_v27  ;;  %v3446_v56 = vsel %vm2434_vm2, %v9864_v40, 0.0 }
 0x4eb   :  { %11707 = vst [vmem:[#allocation59_spill] sm:$0xff] %v9868_v12  ;;  %7184 = vpow2.f32 %v3115_v33  ;;  %v9880_v21 = vpop.eup %7176  ;;  %v3443_v33 = vsel %vm2434_vm2, %v9868_v12, 0.0 }
 0x4ec   :  { %3282 = vadd.xlane.f32.xlu1 %v3281_v11  ;;  %v2851_v11 = vsub.f32 %v11705_v45, %v9489_v19  ;;  %7186 = vpow2.f32 %v3111_v22  ;;  %v11709_v45 = vld [vmem:[#allocation66_spill] sm:$0xff]  ;;  %11710 = vst [vmem:[#allocation62_spill] sm:$0xff] %v9880_v21  ;;  %v3119_v27 = vmul.f32 1.442695, %v2905_v53  ;;  %v11712_v22 = vld [vmem:[#allocation67_spill] sm:$0xff]  ;;  %v3452_v40 = vsel %vm2434_vm2, %v9880_v21, 0.0 }
 0x4ed   :  { %v9854_v8 = vpop.xlane.xlu1 %2760  ;;  %3288 = vadd.xlane.f32.xlu0 %v3287_v2  ;;  %7188 = vpow2.f32 %v3121_v26 }
 0x4ee   :  { %v9858_v55 = vpop.xlane.xlu0 %2607  ;;  %v3011_v41 = vmul.f32 1.442695, %v2851_v11  ;;  %v9884_v42 = vpop.eup %7178  ;;  %v2908_v11 = vsub.f32 %v11712_v22, %v9518_v9 }
 0x4ef   :  { %11711 = vst [vmem:[#allocation61_spill] sm:$0xff] %v9884_v42  ;;  %v9896_v12 = vpop.eup %7180  ;;  %v3293_v26 = vsel %vm2434_vm2, %v9884_v42, 0.0 }
 0x4f0   :  { %3441 = vadd.xlane.f32.xlu1 %v3440_v38  ;;  %v2854_v38 = vsub.f32 %v11709_v45, %v9506_v17  ;;  %7190 = vpow2.f32 %v3011_v41  ;;  %v11713_v45 = vld [vmem:[#allocation68_spill] sm:$0xff]  ;;  %11714 = vst [vmem:[#allocation57_spill] sm:$0xff] %v9896_v12  ;;  %v3125_v9 = vmul.f32 1.442695, %v2908_v11  ;;  %v11716_v41 = vld [vmem:[#allocation69_spill] sm:$0xff]  ;;  %v3458_v21 = vsel %vm2434_vm2, %v9896_v12, 0.0 }
 0x4f1   :  { %v9870_v2 = vpop.xlane.xlu1 %2769  ;;  %3297 = vadd.xlane.f32.xlu0 %v3296_v37  ;;  %7192 = vpow2.f32 %v3119_v27 }
 0x4f2   :  { %v9874_v19 = vpop.xlane.xlu0 %2604  ;;  %v3017_v5 = vmul.f32 1.442695, %v2854_v38  ;;  %v2907_v38 = vsub.f32 %v11716_v41, %v9534_v18 }
 0x4f4   :  { %3447 = vadd.xlane.f32.xlu1 %v3446_v56  ;;  %v2853_v56 = vsub.f32 %v11713_v45, %v9522_v0  ;;  %v9900_v53 = vpop.eup %7182  ;;  %7194 = vpow2.f32 %v3017_v5  ;;  %v11717_v45 = vld [vmem:[#allocation70_spill] sm:$0xff]  ;;  %v3123_v18 = vmul.f32 1.442695, %v2907_v38  ;;  %v11720_v5 = vld [vmem:[#allocation71_spill] sm:$0xff] }
 0x4f5   :  { %v9886_v37 = vpop.xlane.xlu1 %2766  ;;  %3444 = vadd.xlane.f32.xlu0 %v3443_v33  ;;  %11715 = vst [vmem:[#allocation63_spill] sm:$0xff] %v9900_v53  ;;  %v9912_v42 = vpop.eup %7184  ;;  %v3302_v27 = vsel %vm2434_vm2, %v9900_v53, 0.0  ;;  %7196 = vpow2.f32 %v3125_v9 }
 0x4f6   :  { %v9890_v17 = vpop.xlane.xlu0 %2613  ;;  %v3015_v22 = vmul.f32 1.442695, %v2853_v56  ;;  %11718 = vst [vmem:[#allocation64_spill] sm:$0xff] %v9912_v42  ;;  %v9916_v11 = vpop.eup %7186  ;;  %v2910_v56 = vsub.f32 %v11720_v5, %v9550_v23  ;;  %v3455_v12 = vsel %vm2434_vm2, %v9912_v42, 0.0 }
 0x4f7   :  { %11719 = vst [vmem:[#allocation65_spill] sm:$0xff] %v9916_v11  ;;  %v9928_v53 = vpop.eup %7188  ;;  %v3449_v9 = vsel %vm2434_vm2, %v9916_v11, 0.0 }
 0x4f8   :  { %3453 = vadd.xlane.f32.xlu1 %v3452_v40  ;;  %v2856_v40 = vsub.f32 %v11717_v45, %v9538_v15  ;;  %7198 = vpow2.f32 %v3015_v22  ;;  %v11721_v45 = vld [vmem:[#allocation72_spill] sm:$0xff]  ;;  %11722 = vst [vmem:[#allocation66_spill] sm:$0xff] %v9928_v53  ;;  %v3129_v23 = vmul.f32 1.442695, %v2910_v56  ;;  %v11724_v22 = vld [vmem:[#allocation73_spill] sm:$0xff]  ;;  %v3464_v42 = vsel %vm2434_vm2, %v9928_v53, 0.0 }
 0x4f9   :  { %v9902_v33 = vpop.xlane.xlu1 %2775  ;;  %3294 = vadd.xlane.f32.xlu0 %v3293_v26  ;;  %7200 = vpow2.f32 %v3123_v18 }
 0x4fa   :  { %v9906_v0 = vpop.xlane.xlu0 %2610  ;;  %v3021_v41 = vmul.f32 1.442695, %v2856_v40  ;;  %v9932_v38 = vpop.eup %7190  ;;  %v2909_v40 = vsub.f32 %v11724_v22, %v9566_v34 }
 0x4fb   :  { %11723 = vst [vmem:[#allocation67_spill] sm:$0xff] %v9932_v38  ;;  %v9944_v11 = vpop.eup %7192  ;;  %v3299_v18 = vsel %vm2434_vm2, %v9932_v38, 0.0 }
 0x4fc   :  { %3459 = vadd.xlane.f32.xlu1 %v3458_v21  ;;  %v2855_v21 = vsub.f32 %v11721_v45, %v9554_v52  ;;  %7202 = vpow2.f32 %v3021_v41  ;;  %v11725_v45 = vld [vmem:[#allocation74_spill] sm:$0xff]  ;;  %11726 = vst [vmem:[#allocation68_spill] sm:$0xff] %v9944_v11  ;;  %v3127_v34 = vmul.f32 1.442695, %v2909_v40  ;;  %v11728_v41 = vld [vmem:[#allocation75_spill] sm:$0xff]  ;;  %v3461_v53 = vsel %vm2434_vm2, %v9944_v11, 0.0 }
 0x4fd   :  { %v9918_v26 = vpop.xlane.xlu1 %2772  ;;  %3303 = vadd.xlane.f32.xlu0 %v3302_v27  ;;  %7204 = vpow2.f32 %v3129_v23 }
 0x4fe   :  { %v9922_v15 = vpop.xlane.xlu0 %2619  ;;  %v3019_v5 = vmul.f32 1.442695, %v2855_v21  ;;  %v9948_v56 = vpop.eup %7194  ;;  %v2912_v21 = vsub.f32 %v11728_v41, %v9582_v25 }
 0x4ff   :  { %11727 = vst [vmem:[#allocation69_spill] sm:$0xff] %v9948_v56  ;;  %v9960_v38 = vpop.eup %7196  ;;  %v3308_v23 = vsel %vm2434_vm2, %v9948_v56, 0.0 }
 0x500   :  { %3456 = vadd.xlane.f32.xlu1 %v3455_v12  ;;  %v2858_v12 = vsub.f32 %v11725_v45, %v9570_v29  ;;  %7206 = vpow2.f32 %v3019_v5  ;;  %v11729_v45 = vld [vmem:[#allocation76_spill] sm:$0xff]  ;;  %11730 = vst [vmem:[#allocation70_spill] sm:$0xff] %v9960_v38  ;;  %v3133_v25 = vmul.f32 1.442695, %v2912_v21  ;;  %v11732_v5 = vld [vmem:[#allocation78_spill] sm:$0xff]  ;;  %v3470_v56 = vsel %vm2434_vm2, %v9960_v38, 0.0 }
 0x501   :  { %v9934_v27 = vpop.xlane.xlu1 %2781  ;;  %3450 = vadd.xlane.f32.xlu0 %v3449_v9  ;;  %7208 = vpow2.f32 %v3127_v34 }
 0x502   :  { %v9938_v52 = vpop.xlane.xlu0 %2616  ;;  %v3025_v22 = vmul.f32 1.442695, %v2858_v12  ;;  %v9964_v40 = vpop.eup %7198  ;;  %v2911_v12 = vsub.f32 %v11732_v5, %v9598_v48 }
 0x503   :  { %11731 = vst [vmem:[#allocation71_spill] sm:$0xff] %v9964_v40  ;;  %v9976_v11 = vpop.eup %7200  ;;  %v3305_v34 = vsel %vm2434_vm2, %v9964_v40, 0.0 }
 0x504   :  { %3465 = vadd.xlane.f32.xlu1 %v3464_v42  ;;  %v2857_v42 = vsub.f32 %v11729_v45, %v9586_v61  ;;  %7210 = vpow2.f32 %v3025_v22  ;;  %v11733_v45 = vld [vmem:[#allocation79_spill] sm:$0xff]  ;;  %11734 = vst [vmem:[#allocation72_spill] sm:$0xff] %v9976_v11  ;;  %v3131_v48 = vmul.f32 1.442695, %v2911_v12  ;;  %v11736_v22 = vld [vmem:[#allocation81_spill] sm:$0xff]  ;;  %v3467_v38 = vsel %vm2434_vm2, %v9976_v11, 0.0 }
 0x505   :  { %v9950_v9 = vpop.xlane.xlu1 %2778  ;;  %3300 = vadd.xlane.f32.xlu0 %v3299_v18  ;;  %7212 = vpow2.f32 %v3133_v25 }
 0x506   :  { %v9954_v29 = vpop.xlane.xlu0 %2625  ;;  %v3023_v41 = vmul.f32 1.442695, %v2857_v42  ;;  %v9980_v21 = vpop.eup %7202  ;;  %v2914_v42 = vsub.f32 %v11736_v22, %v9614_v3 }
 0x507   :  { %11735 = vst [vmem:[#allocation73_spill] sm:$0xff] %v9980_v21  ;;  %v9992_v40 = vpop.eup %7204  ;;  %v3314_v25 = vsel %vm2434_vm2, %v9980_v21, 0.0 }
 0x508   :  { %3462 = vadd.xlane.f32.xlu1 %v3461_v53  ;;  %v2860_v53 = vsub.f32 %v11733_v45, %v9602_v59  ;;  %7214 = vpow2.f32 %v3023_v41  ;;  %v11737_v45 = vld [vmem:[#allocation82_spill] sm:$0xff]  ;;  %11738 = vst [vmem:[#allocation74_spill] sm:$0xff] %v9992_v40  ;;  %v3137_v3 = vmul.f32 1.442695, %v2914_v42  ;;  %v11740_v41 = vld [vmem:[#allocation87_spill] sm:$0xff]  ;;  %v3476_v21 = vsel %vm2434_vm2, %v9992_v40, 0.0 }
 0x509   :  { %v9966_v18 = vpop.xlane.xlu1 %2787  ;;  %3309 = vadd.xlane.f32.xlu0 %v3308_v23  ;;  %7216 = vpow2.f32 %v3131_v48 }
 0x50a   :  { %v9970_v61 = vpop.xlane.xlu0 %2622  ;;  %v3029_v5 = vmul.f32 1.442695, %v2860_v53  ;;  %v9996_v12 = vpop.eup %7206  ;;  %v2913_v53 = vsub.f32 %v11740_v41, %v9646_v51  ;;  %v11744_v51 = vld [vmem:[#allocation89_spill] sm:$0xff] }
 0x50b   :  { %11739 = vst [vmem:[#allocation75_spill] sm:$0xff] %v9996_v12  ;;  %v10008_v11 = vpop.eup %7208  ;;  %v3311_v48 = vsel %vm2434_vm2, %v9996_v12, 0.0 }
 0x50c   :  { %3471 = vadd.xlane.f32.xlu1 %v3470_v56  ;;  %v2859_v56 = vsub.f32 %v11737_v45, %v9618_v7  ;;  %7218 = vpow2.f32 %v3029_v5  ;;  %v11741_v45 = vld [vmem:[#allocation85_spill] sm:$0xff]  ;;  %11742 = vst [vmem:[#allocation76_spill] sm:$0xff] %v10008_v11  ;;  %v3135_v5 = vmul.f32 1.442695, %v2913_v53  ;;  %v3473_v40 = vsel %vm2434_vm2, %v10008_v11, 0.0 }
 0x50d   :  { %v9982_v23 = vpop.xlane.xlu1 %2784  ;;  %3306 = vadd.xlane.f32.xlu0 %v3305_v34  ;;  %7220 = vpow2.f32 %v3137_v3 }
 0x50e   :  { %v9986_v59 = vpop.xlane.xlu0 %2796  ;;  %v3027_v22 = vmul.f32 1.442695, %v2859_v56  ;;  %v10012_v42 = vpop.eup %7210 }
 0x50f   :  { %11743 = vst [vmem:[#allocation78_spill] sm:$0xff] %v10012_v42  ;;  %v10024_v12 = vpop.eup %7212 }
 0x510   :  { %3468 = vadd.xlane.f32.xlu1 %v3467_v38  ;;  %v2862_v38 = vsub.f32 %v11741_v45, %v9634_v63  ;;  %7222 = vpow2.f32 %v3027_v22  ;;  %v11745_v45 = vld [vmem:[#allocation88_spill] sm:$0xff]  ;;  %11746 = vst [vmem:[#allocation79_spill] sm:$0xff] %v10024_v12  ;;  %v11749_v22 = vld [vmem:[#allocation93_spill] sm:$0xff] }
 0x511   :  { %v9998_v34 = vpop.xlane.xlu1 %2793  ;;  %3315 = vadd.xlane.f32.xlu0 %v3314_v25  ;;  %v2916_v25 = vsub.f32 %v11744_v51, %v9662_v62  ;;  %v3320_v62 = vsel %vm2434_vm2, %v10012_v42, 0.0  ;;  %7224 = vpow2.f32 %v3135_v5  ;;  %v3482_v42 = vsel %vm2434_vm2, %v10024_v12, 0.0 }
 0x512   :  { %v10002_v7 = vpop.xlane.xlu0 %2802  ;;  %v3033_v56 = vmul.f32 1.442695, %v2862_v38  ;;  %v10028_v51 = vpop.eup %7214  ;;  %v2915_v38 = vsub.f32 %v11749_v22, %v9694_v58  ;;  %v11754_v22 = vld [vmem:[#allocation95_spill] sm:$0xff] }
 0x513   :  { %11747 = vst [vmem:[#allocation81_spill] sm:$0xff] %v10028_v51  ;;  %v3141_v3 = vmul.f32 1.442695, %v2916_v25  ;;  %v10040_v11 = vpop.eup %7216  ;;  %v11752_v25 = vld [vmem:[#allocation90_spill] sm:$0xff]  ;;  %v3317_v5 = vsel %vm2434_vm2, %v10028_v51, 0.0 }
 0x514   :  { %3477 = vadd.xlane.f32.xlu1 %v3476_v21  ;;  %v2861_v21 = vsub.f32 %v11745_v45, %v9650_v35  ;;  %7226 = vpow2.f32 %v3033_v56 }
 0x515   :  { %v10016_v41 = vpop.xlane.xlu1 %2790  ;;  %3312 = vadd.xlane.f32.xlu0 %v3311_v48  ;;  %v11751_v48 = vld [vmem:[#allocation84_spill] sm:$0xff]  ;;  %7228 = vpow2.f32 %v3141_v3 }
 0x516   :  { %v10018_v63 = vpop.xlane.xlu0 %2808  ;;  %v2864_v45 = vsub.f32 %v11751_v48, %v9630_v54  ;;  %v10046_v58 = vpop.eup %7218  ;;  %v2918_v48 = vsub.f32 %v11754_v22, %v9710_v43 }
 0x517   :  { %v10058_v3 = vpop.eup %7220  ;;  %v3326_v43 = vsel %vm2434_vm2, %v10046_v58, 0.0 }
 0x518   :  { %3474 = vadd.xlane.f32.xlu1 %v3473_v40  ;;  %v3031_v40 = vmul.f32 1.442695, %v2861_v21  ;;  %v3139_v21 = vmul.f32 1.442695, %v2915_v38  ;;  %11756 = vst [vmem:[#allocation85_spill] sm:$0xff] %v10058_v3 }
 0x519   :  { %v10030_v53 = vpop.xlane.xlu1 %2799  ;;  %3321 = vadd.xlane.f32.xlu0 %v3320_v62  ;;  %v11753_v62 = vld [vmem:[#allocation91_spill] sm:$0xff]  ;;  %v3145_v22 = vmul.f32 1.442695, %v2918_v48 }
 0x51a   :  { %11748 = vst [vmem:[#allocation82_spill] sm:$0xff] %v10030_v53  ;;  %v10034_v35 = vpop.xlane.xlu0 %2814  ;;  %v2863_v53 = vsub.f32 %v11752_v25, %v9666_v14  ;;  %v2866_v54 = vsub.f32 %v11753_v62, %v9678_v10  ;;  %7230 = vpow2.f32 %v3031_v40  ;;  %v11755_v14 = vld [vmem:[#allocation92_spill] sm:$0xff]  ;;  %v3479_v25 = vsel %vm2434_vm2, %v10040_v11, 0.0  ;;  %v11757_v10 = vld [vmem:[#allocation94_spill] sm:$0xff]  ;;  %v10064_v38 = vpop.eup %7222  ;;  %v11758_v40 = vld [vmem:[#allocation99_spill] sm:$0xff] }
 0x51b   :  { %11750 = vst [vmem:[#allocation87_spill] sm:$0xff] %v10034_v35  ;;  %v3037_v35 = vmul.f32 1.442695, %v2864_v45  ;;  %v2867_v62 = vsub.f32 %v11757_v10, %v9698_v47  ;;  %v3488_v47 = vsel %vm2434_vm2, %v10058_v3, 0.0 }
 0x51c   :  { %3483 = vadd.xlane.f32.xlu1 %v3482_v42  ;;  %v2865_v42 = vsub.f32 %v11755_v14, %v9682_v44  ;;  %v3035_v51 = vmul.f32 1.442695, %v2863_v53  ;;  %v3041_v45 = vmul.f32 1.442695, %v2866_v54  ;;  %v2917_v44 = vsub.f32 %v11758_v40, %v9742_v30  ;;  %v11759_v54 = vld [vmem:[#allocation96_spill] sm:$0xff] }
 0x51d   :  { %v10050_v56 = vpop.xlane.xlu1 %2805  ;;  %3318 = vadd.xlane.f32.xlu0 %v3317_v5  ;;  %v2920_v10 = vsub.f32 %v11759_v54, %v9714_v46  ;;  %v3323_v30 = vsel %vm2434_vm2, %v10064_v38, 0.0 }
 0x51e   :  { %v3205_v12 = vpop.xlane.xlu0 %3204  ;;  %v3039_v14 = vmul.f32 1.442695, %v2865_v42 }
 0x51f   :  { %7232 = vrcp.f32 %v3205_v12  ;;  %v10072_v12 = vpop.eup %7224  ;;  %v3149_v40 = vmul.f32 1.442695, %v2920_v10  ;;  %v11764_v10 = vld [vmem:[#allocation98_spill] sm:$0xff] }
 0x520   :  { %3480 = vadd.xlane.f32.xlu1 %v3479_v25  ;;  %7234 = vpow2.f32 %v3139_v21  ;;  %v3043_v25 = vmul.f32 1.442695, %v2867_v62  ;;  %v3143_v21 = vmul.f32 1.442695, %v2917_v44  ;;  %v3485_v46 = vsel %vm2434_vm2, %v10072_v12, 0.0 }
 0x521   :  { %v10068_v5 = vpop.xlane.xlu1 %2811  ;;  %3327 = vadd.xlane.f32.xlu0 %v3326_v43  ;;  %7236 = vpow2.f32 %v3037_v35  ;;  %v10078_v43 = vpop.eup %7226 }
 0x522   :  { %v3211_v53 = vpop.xlane.xlu0 %3210  ;;  %7238 = vpow2.f32 %v3035_v51  ;;  %11760 = vst [vmem:[#allocation89_spill] sm:$0xff] %v10078_v43  ;;  %v10082_v42 = vpop.eup %7228  ;;  %v11762_v51 = vld [vmem:[#allocation97_spill] sm:$0xff]  ;;  %v3332_v44 = vsel %vm2434_vm2, %v10078_v43, 0.0 }
 0x523   :  { %7240 = vpow2.f32 %v3041_v45  ;;  %11761 = vst [vmem:[#allocation88_spill] sm:$0xff] %v10082_v42  ;;  %v2868_v62 = vsub.f32 %v11762_v51, %v9726_v31  ;;  %v2869_v51 = vsub.f32 %v11764_v10, %v9730_v50 }
 0x524   :  { %3489 = vadd.xlane.f32.xlu1 %v3488_v47  ;;  %7242 = vpow2.f32 %v3145_v22  ;;  %v11763_v47 = vld [vmem:[#allocation103_spill] sm:$0xff]  ;;  %v10092_v22 = vpop.eup %7230 }
 0x525   :  { %v10080_v35 = vpop.xlane.xlu1 %2817  ;;  %3324 = vadd.xlane.f32.xlu0 %v3323_v30  ;;  %7244 = vpow2.f32 %v3039_v14  ;;  %v2919_v45 = vsub.f32 %v11763_v47, %v9774_v4  ;;  %v3494_v30 = vsel %vm2434_vm2, %v10082_v42, 0.0  ;;  %v11765_v4 = vld [vmem:[#allocation11_spill] sm:$0xff] }
 0x526   :  { %v3217_v48 = vpop.xlane.xlu0 %3216  ;;  %7246 = vpow2.f32 %v3043_v25  ;;  %v3045_v25 = vmul.f32 1.442695, %v2868_v62 }
 0x527   :  { %7248 = vpow2.f32 %v3143_v21  ;;  %v11766_v21 = vld [vmem:[#allocation100_spill] sm:$0xff] }
 0x528   :  { %3486 = vadd.xlane.f32.xlu1 %v3485_v46  ;;  %7250 = vrcp.f32 %v3211_v53  ;;  %v2922_v43 = vsub.f32 %v11766_v21, %v9746_v49  ;;  %v3329_v53 = vsel %vm2434_vm2, %v10092_v22, 0.0  ;;  %v3047_v49 = vmul.f32 1.442695, %v2869_v51  ;;  %v11772_v51 = vld [vmem:[#allocation106_spill] sm:$0xff] }
 0x529   :  { %v3208_v54 = vpop.xlane.xlu1 %3207  ;;  %3333 = vadd.xlane.f32.xlu0 %v3332_v44  ;;  %v7233_v14 = vpop.eup %7232  ;;  %v3147_v44 = vmul.f32 1.442695, %v2919_v45  ;;  %v11769_v45 = vld [vmem:[#allocation101_spill] sm:$0xff] }
 0x52a   :  { %v3223_v31 = vpop.xlane.xlu0 %3222  ;;  %7252 = vrcp.f32 %v3208_v54  ;;  %v3715_v46 = vmul.f32 %v7233_v14, %v11765_v4  ;;  %v10099_v47 = vpop.eup %7234  ;;  %v2870_v14 = vsub.f32 %v11769_v45, %v9758_v32  ;;  %v11771_v4 = vld [vmem:[#allocation105_spill] sm:$0xff] }
 0x52b   :  { %7254 = vpow2.f32 %v3149_v40  ;;  %v10105_v3 = vpop.eup %7236 }
 0x52c   :  { %3495 = vadd.xlane.f32.xlu1 %v3494_v30  ;;  %11767 = vst [vmem:[#allocation93_spill] sm:$0xff] %v10105_v3  ;;  %7256 = vrcp.f32 %v3217_v48  ;;  %6691 = vmatprep.mubr.msk.f32.mxu1 %vm2434_vm2, %v3715_v46  ;;  %v10108_v62 = vpop.eup %7238  ;;  %v3491_v30 = vsel %vm2434_vm2, %v10099_v47, 0.0  ;;  %v3153_v48 = vmul.f32 1.442695, %v2922_v43  ;;  %v2921_v46 = vsub.f32 %v11771_v4, %v9790_v16 }
 0x52d   :  { %v3214_v50 = vpop.xlane.xlu1 %3213  ;;  %3330 = vadd.xlane.f32.xlu0 %v3329_v53  ;;  %11768 = vst [vmem:[#allocation84_spill] sm:$0xff] %v10108_v62  ;;  %v10110_v40 = vpop.eup %7240  ;;  %v3338_v21 = vsel %vm2434_vm2, %v10105_v3, 0.0  ;;  %v3049_v16 = vmul.f32 1.442695, %v2870_v14 }
 0x52e   :  { %7258 = vrcp.f32 %v3214_v50  ;;  %v3232_v54 = vpop.xlane.xlu0 %3231  ;;  %v10116_v10 = vpop.eup %7242  ;;  %v2924_v50 = vsub.f32 %v11772_v51, %v9794_v1  ;;  %v3151_v4 = vmul.f32 1.442695, %v2921_v46 }
 0x52f   :  { %7260 = vpow2.f32 %v3045_v25  ;;  %11770 = vst [vmem:[#allocation90_spill] sm:$0xff] %v10116_v10  ;;  %v10122_v53 = vpop.eup %7244  ;;  %v3500_v45 = vsel %vm2434_vm2, %v10116_v10, 0.0  ;;  %v11774_v10 = vld [vmem:[#allocation16_spill] sm:$0xff] }
 0x530   :  { %7262 = vpow2.f32 %v3147_v44  ;;  %3492 = vadd.xlane.f32.xlu1 %v3491_v30  ;;  %v10124_v32 = vpop.eup %7246 }
 0x531   :  { %7264 = vrcp.f32 %v3223_v31  ;;  %v3220_v25 = vpop.xlane.xlu1 %3219  ;;  %3339 = vadd.xlane.f32.xlu0 %v3338_v21  ;;  %v10128_v44 = vpop.eup %7248  ;;  %v3335_v31 = vsel %vm2434_vm2, %v10108_v62, 0.0 }
 0x532   :  { %7266 = vrcp.f32 %v3220_v25  ;;  %v3229_v43 = vpop.xlane.xlu0 %3228  ;;  %v7251_v30 = vpop.eup %7250  ;;  %v3157_v25 = vmul.f32 1.442695, %v2924_v50 }
 0x533   :  { %7268 = vpow2.f32 %v3047_v49  ;;  %v3717_v62 = vmul.f32 %v7251_v30, %v11774_v10 }
 0x534   :  { %7270 = vpow2.f32 %v3153_v48  ;;  %3501 = vadd.xlane.f32.xlu1 %v3500_v45  ;;  %v7253_v21 = vpop.eup %7252  ;;  %v11773_v48 = vld [vmem:[#allocation102_spill] sm:$0xff]  ;;  %v3497_v45 = vsel %vm2434_vm2, %v10128_v44, 0.0 }
 0x535   :  { %7272 = vrcp.f32 %v3229_v43  ;;  %v3226_v3 = vpop.xlane.xlu1 %3225  ;;  %3336 = vadd.xlane.f32.xlu0 %v3335_v31  ;;  %v10134_v1 = vpop.eup %7254  ;;  %v3716_v49 = vmul.f32 %v7253_v21, %v9512_v39  ;;  %v2872_v46 = vsub.f32 %v11773_v48, %v9762_v13  ;;  %v11775_v31 = vld [vmem:[#allocation104_spill] sm:$0xff]  ;;  %v3344_v39 = vsel %vm2434_vm2, %v10110_v40, 0.0  ;;  %v11776_v13 = vld [vmem:[#allocation107_spill] sm:$0xff] }
 0x536   :  { %7274 = vrcp.f32 %v3226_v3  ;;  %v3238_v14 = vpop.xlane.xlu0 %3237  ;;  %v7257_v51 = vpop.eup %7256  ;;  %v2871_v42 = vsub.f32 %v11775_v31, %v9778_v20  ;;  %v2923_v50 = vsub.f32 %v11776_v13, %v9806_v36  ;;  %v3506_v48 = vsel %vm2434_vm2, %v10134_v1, 0.0 }
 0x537   :  { %7276 = vpow2.f32 %v3049_v16  ;;  %6692 = vmatmul.mubr.msk.f32.vlgmr.msra.gmra.mrb[80].mxu1 %vm2434_vm2, %v3716_v49  ;;  %v11777_v16 = vld [vmem:[#allocation14_spill] sm:$0xff]  ;;  %v3053_v49 = vmul.f32 1.442695, %v2872_v46 }
 0x538   :  { %v7259_v43 = vpop.eup %7258  ;;  %7278 = vpow2.f32 %v3151_v4  ;;  %3498 = vadd.xlane.f32.xlu1 %v3497_v45  ;;  %6694 = vmatprep.mubr.msk.f32.mxu1 %vm2434_vm2, %v3717_v62  ;;  %v11778_v45 = vld [vmem:[#allocation12_spill] sm:$0xff]  ;;  %v3155_v46 = vmul.f32 1.442695, %v2923_v50  ;;  %v11782_v50 = vld [vmem:[#allocation17_spill] sm:$0xff] }
 0x539   :  { %v10147_v3 = vpop.eup %7260  ;;  %7280 = vrcp.f32 %v3232_v54  ;;  %v3400_v10 = vpop.xlane.xlu1 %3399  ;;  %3345 = vadd.xlane.f32.xlu0 %v3344_v39  ;;  %v3718_v30 = vmul.f32 %v7259_v43, %v11777_v16  ;;  %v3719_v31 = vmul.f32 %v7257_v51, %v11778_v45  ;;  %v3051_v54 = vmul.f32 1.442695, %v2871_v42  ;;  %v11779_v62 = vld [vmem:[#allocation112_spill] sm:$0xff]  ;;  %v11780_v51 = vld [vmem:[#allocation18_spill] sm:$0xff] }
 0x53a   :  { %v10153_v20 = vpop.eup %7262  ;;  %7282 = vpow2.f32 %v3157_v25  ;;  %v3235_v4 = vpop.xlane.xlu0 %3234  ;;  %v2926_v13 = vsub.f32 %v11779_v62, %v9842_v6  ;;  %v3341_v25 = vsel %vm2434_vm2, %v10122_v53, 0.0 }
 0x53b   :  { %v7265_v21 = vpop.eup %7264  ;;  %7284 = vrcp.f32 %v3235_v4  ;;  %6695 = vmatmul.mubr.msk.f32.gmra.mrb[82].mxu1 %vm2434_vm2, %v3718_v30  ;;  %v11781_v30 = vld [vmem:[#allocation108_spill] sm:$0xff] }
 0x53c   :  { %v7267_v36 = vpop.eup %7266  ;;  %7286 = vrcp.f32 %v3238_v14  ;;  %3507 = vadd.xlane.f32.xlu1 %v3506_v48  ;;  %6697 = vmatprep.mubr.msk.f32.mxu1 %vm2434_vm2, %v3719_v31  ;;  %v2874_v4 = vsub.f32 %v11781_v30, %v9810_v60  ;;  %v3503_v48 = vsel %vm2434_vm2, %v10153_v20, 0.0  ;;  %v11783_v31 = vld [vmem:[#allocation109_spill] sm:$0xff]  ;;  %v11784_v60 = vld [vmem:[#allocation110_spill] sm:$0xff] }
 0x53d   :  { %v10163_v43 = vpop.eup %7268  ;;  %7288 = vrcp.f32 %v3400_v10  ;;  %v3397_v39 = vpop.xlane.xlu1 %3396  ;;  %3342 = vadd.xlane.f32.xlu0 %v3341_v25  ;;  %v3720_v42 = vmul.f32 %v7267_v36, %v11780_v51  ;;  %v3721_v10 = vmul.f32 %v7265_v21, %v11782_v50  ;;  %v2925_v62 = vsub.f32 %v11783_v31, %v9822_v57 }
 0x53e   :  { %v10167_v16 = vpop.eup %7270  ;;  %7290 = vrcp.f32 %v3397_v39  ;;  %v3244_v6 = vpop.xlane.xlu0 %3243  ;;  %v3161_v36 = vmul.f32 1.442695, %v2926_v13  ;;  %v2873_v39 = vsub.f32 %v11784_v60, %v9826_v24  ;;  %v3057_v30 = vmul.f32 1.442695, %v2874_v4 }
 0x53f   :  { %v7273_v14 = vpop.eup %7272  ;;  %7292 = vpow2.f32 %v3053_v49  ;;  %6698 = vmatmul.mubr.msk.f32.gmra.mrb[84].mxu1 %vm2434_vm2, %v3720_v42  ;;  %v3350_v49 = vsel %vm2434_vm2, %v10147_v3, 0.0  ;;  %v3159_v24 = vmul.f32 1.442695, %v2925_v62 }
 0x540   :  { %v7275_v45 = vpop.eup %7274  ;;  %7294 = vpow2.f32 %v3051_v54  ;;  %3504 = vadd.xlane.f32.xlu1 %v3503_v48  ;;  %6700 = vmatprep.mubr.msk.f32.mxu1 %vm2434_vm2, %v3721_v10  ;;  %v11785_v54 = vld [vmem:[#allocation19_spill] sm:$0xff]  ;;  %v3512_v48 = vsel %vm2434_vm2, %v10167_v16, 0.0 }
 0x541   :  { %v10179_v25 = vpop.eup %7276  ;;  %7296 = vpow2.f32 %v3155_v46  ;;  %v3406_v21 = vpop.xlane.xlu1 %3405  ;;  %3351 = vadd.xlane.f32.xlu0 %v3350_v49  ;;  %v3722_v51 = vmul.f32 %v7275_v45, %v11785_v54  ;;  %v11786_v46 = vld [vmem:[#allocation20_spill] sm:$0xff]  ;;  %v11787_v10 = vld [vmem:[#allocation111_spill] sm:$0xff]  ;;  %v3055_v45 = vmul.f32 1.442695, %v2873_v39  ;;  %v11788_v54 = vld [vmem:[#allocation86_spill] sm:$0xff] }
 0x542   :  { %v10185_v57 = vpop.eup %7278  ;;  %7298 = vrcp.f32 %v3244_v6  ;;  %v3241_v13 = vpop.xlane.xlu0 %3240  ;;  %v3723_v50 = vmul.f32 %v7273_v14, %v11786_v46  ;;  %v2928_v49 = vsub.f32 %v11787_v10, %v9838_v28  ;;  %v3347_v6 = vsel %vm2434_vm2, %v10124_v32, 0.0  ;;  %v11789_v28 = vld [vmem:[#allocation23_spill] sm:$0xff]  ;;  %v11791_v10 = vld [vmem:[#allocation114_spill] sm:$0xff] }
 0x543   :  { %v7281_v42 = vpop.eup %7280  ;;  %7300 = vrcp.f32 %v3241_v13  ;;  %6701 = vmatmul.mubr.msk.f32.gmra.mrb[86].mxu1 %vm2434_vm2, %v3722_v51  ;;  %v11790_v51 = vld [vmem:[#allocation113_spill] sm:$0xff]  ;;  %v3509_v39 = vsel %vm2434_vm2, %v10185_v57, 0.0 }
 0x544   :  { %v10190_v31 = vpop.eup %7282  ;;  %7302 = vpow2.f32 %v3161_v36  ;;  %3513 = vadd.xlane.f32.xlu1 %v3512_v48  ;;  %6703 = vmatprep.mubr.msk.f32.mxu1 %vm2434_vm2, %v3723_v50  ;;  %v3724_v13 = vmul.f32 %v7281_v42, %v11788_v54  ;;  %v2927_v48 = vsub.f32 %v11790_v51, %v9854_v8  ;;  %v3165_v50 = vmul.f32 1.442695, %v2928_v49  ;;  %v11792_v8 = vld [vmem:[#allocation115_spill] sm:$0xff] }
 0x545   :  { %v7285_v4 = vpop.eup %7284  ;;  %7304 = vrcp.f32 %v3406_v21  ;;  %v3403_v60 = vpop.xlane.xlu1 %3402  ;;  %3348 = vadd.xlane.f32.xlu0 %v3347_v6  ;;  %v2876_v6 = vsub.f32 %v11791_v10, %v9858_v55  ;;  %v3356_v42 = vsel %vm2434_vm2, %v10179_v25, 0.0  ;;  %v11795_v10 = vld [vmem:[#allocation22_spill] sm:$0xff] }
 0x546   :  { %v7287_v14 = vpop.eup %7286  ;;  %7306 = vrcp.f32 %v3403_v60  ;;  %v3250_v62 = vpop.xlane.xlu0 %3249  ;;  %v3725_v36 = vmul.f32 %v7285_v4, %v11789_v28 }
 0x547   :  { %v7289_v46 = vpop.eup %7288  ;;  %7308 = vpow2.f32 %v3057_v30  ;;  %6704 = vmatmul.mubr.msk.f32.gmra.mrb[88].mxu1 %vm2434_vm2, %v3724_v13  ;;  %v2930_v30 = vsub.f32 %v11792_v8, %v9870_v2  ;;  %v11794_v13 = vld [vmem:[#allocation21_spill] sm:$0xff]  ;;  %v3518_v2 = vsel %vm2434_vm2, %v10190_v31, 0.0 }
 0x548   :  { %v7291_v21 = vpop.eup %7290  ;;  %7310 = vpow2.f32 %v3159_v24  ;;  %3510 = vadd.xlane.f32.xlu1 %v3509_v39  ;;  %6706 = vmatprep.mubr.msk.f32.mxu1 %vm2434_vm2, %v3725_v36  ;;  %v11793_v24 = vld [vmem:[#allocation24_spill] sm:$0xff]  ;;  %v3726_v28 = vmul.f32 %v7287_v14, %v11794_v13  ;;  %v3163_v39 = vmul.f32 1.442695, %v2927_v48  ;;  %v3353_v14 = vsel %vm2434_vm2, %v10163_v43, 0.0 }
 0x549   :  { %v10209_v4 = vpop.eup %7292  ;;  %7312 = vpow2.f32 %v3055_v45  ;;  %v3412_v60 = vpop.xlane.xlu1 %3411  ;;  %3357 = vadd.xlane.f32.xlu0 %v3356_v42  ;;  %v3779_v49 = vmul.f32 %v7291_v21, %v11793_v24  ;;  %v3780_v45 = vmul.f32 %v7289_v46, %v11795_v10  ;;  %v3061_v21 = vmul.f32 1.442695, %v2876_v6  ;;  %v11796_v42 = vld [vmem:[#allocation116_spill] sm:$0xff]  ;;  %v11797_v6 = vld [vmem:[#allocation27_spill] sm:$0xff] }
 0x54a   :  { %v10215_v54 = vpop.eup %7294  ;;  %7314 = vrcp.f32 %v3250_v62  ;;  %v3247_v55 = vpop.xlane.xlu0 %3246  ;;  %v2875_v62 = vsub.f32 %v11796_v42, %v9874_v19  ;;  %v3169_v46 = vmul.f32 1.442695, %v2930_v30  ;;  %v11799_v30 = vld [vmem:[#allocation25_spill] sm:$0xff] }
 0x54b   :  { %v10218_v51 = vpop.eup %7296  ;;  %7316 = vrcp.f32 %v3247_v55  ;;  %6803 = vmatprep.mubr.msk.f32.mxu0 %vm2434_vm2, %v3779_v49  ;;  %6707 = vmatmul.mubr.msk.f32.gmra.mrb[90].mxu1 %vm2434_vm2, %v3726_v28  ;;  %v11798_v55 = vld [vmem:[#allocation117_spill] sm:$0xff] }
 0x54c   :  { %v7299_v36 = vpop.eup %7298  ;;  %7318 = vpow2.f32 %v3165_v50  ;;  %3519 = vadd.xlane.f32.xlu1 %v3518_v2  ;;  %6804 = vmatmul.mubr.msk.f32.vlgmr.msra.gmra.mrb[96].mxu0 %vm2434_vm2, %v3780_v45  ;;  %v2929_v13 = vsub.f32 %v11798_v55, %v9886_v37  ;;  %v3515_v28 = vsel %vm2434_vm2, %v10218_v51, 0.0  ;;  %v3059_v45 = vmul.f32 1.442695, %v2875_v62  ;;  %v11800_v2 = vld [vmem:[#allocation118_spill] sm:$0xff] }
 0x54d   :  { %v7301_v48 = vpop.eup %7300  ;;  %7320 = vrcp.f32 %v3412_v60  ;;  %v3409_v8 = vpop.xlane.xlu1 %3408  ;;  %3354 = vadd.xlane.f32.xlu0 %v3353_v14  ;;  %v3728_v60 = vmul.f32 %v7299_v36, %v11799_v30  ;;  %v2878_v42 = vsub.f32 %v11800_v2, %v9890_v17  ;;  %v11801_v36 = vld [vmem:[#allocation28_spill] sm:$0xff]  ;;  %v11802_v17 = vld [vmem:[#allocation26_spill] sm:$0xff] }
 0x54e   :  { %v10230_v24 = vpop.eup %7302  ;;  %7322 = vrcp.f32 %v3409_v8  ;;  %v3256_v50 = vpop.xlane.xlu0 %3255  ;;  %v3727_v49 = vmul.f32 %v7301_v48, %v11797_v6  ;;  %v11804_v2 = vld [vmem:[#allocation120_spill] sm:$0xff] }
 0x54f   :  { %v7305_v19 = vpop.eup %7304  ;;  %7324 = vpow2.f32 %v3163_v39  ;;  %v3362_v39 = vsel %vm2434_vm2, %v10209_v4, 0.0 }
 0x550   :  { %v7307_v10 = vpop.eup %7306  ;;  %7326 = vpow2.f32 %v3061_v21  ;;  %3516 = vadd.xlane.f32.xlu1 %v3515_v28  ;;  %6709 = vmatprep.mubr.msk.f32.mxu1 %vm2434_vm2, %v3727_v49  ;;  %v3782_v8 = vmul.f32 %v7305_v19, %v11802_v17  ;;  %v3167_v49 = vmul.f32 1.442695, %v2929_v13  ;;  %v3065_v28 = vmul.f32 1.442695, %v2878_v42  ;;  %v11803_v19 = vld [vmem:[#allocation119_spill] sm:$0xff]  ;;  %v11806_v17 = vld [vmem:[#allocation29_spill] sm:$0xff] }
 0x551   :  { %v10243_v14 = vpop.eup %7308  ;;  %7328 = vpow2.f32 %v3169_v46  ;;  %v3418_v37 = vpop.xlane.xlu1 %3417  ;;  %3363 = vadd.xlane.f32.xlu0 %v3362_v39  ;;  %6710 = vmatmul.mubr.msk.f32.gmra.mrb[92].mxu1 %vm2434_vm2, %v3728_v60  ;;  %v3781_v48 = vmul.f32 %v7307_v10, %v11801_v36  ;;  %v3524_v46 = vsel %vm2434_vm2, %v10230_v24, 0.0  ;;  %v2932_v60 = vsub.f32 %v11803_v19, %v9902_v33  ;;  %v11805_v42 = vld [vmem:[#allocation31_spill] sm:$0xff] }
 0x552   :  { %v10247_v21 = vpop.eup %7310  ;;  %7330 = vrcp.f32 %v3256_v50  ;;  %v3253_v62 = vpop.xlane.xlu0 %3252  ;;  %v3359_v50 = vsel %vm2434_vm2, %v10215_v54, 0.0  ;;  %v2877_v39 = vsub.f32 %v11804_v2, %v9906_v0  ;;  %v3368_v0 = vsel %vm2434_vm2, %v10243_v14, 0.0  ;;  %v11810_v2 = vld [vmem:[#allocation30_spill] sm:$0xff] }
 0x553   :  { %v10250_v6 = vpop.eup %7312  ;;  %7332 = vrcp.f32 %v3253_v62  ;;  %6806 = vmatprep.mubr.msk.f32.mxu0 %vm2434_vm2, %v3781_v48  ;;  %v3521_v62 = vsel %vm2434_vm2, %v10247_v21, 0.0 }
 0x554   :  { %v7315_v55 = vpop.eup %7314  ;;  %7334 = vpow2.f32 %v3059_v45  ;;  %3525 = vadd.xlane.f32.xlu1 %v3524_v46  ;;  %6807 = vmatmul.mubr.msk.f32.gmra.mrb[98].mxu0 %vm2434_vm2, %v3782_v8 }
 0x555   :  { %v7317_v30 = vpop.eup %7316  ;;  %7336 = vrcp.f32 %v3418_v37  ;;  %v3415_v13 = vpop.xlane.xlu1 %3414  ;;  %3360 = vadd.xlane.f32.xlu0 %v3359_v50  ;;  %v3730_v8 = vmul.f32 %v7315_v55, %v11806_v17  ;;  %v11807_v37 = vld [vmem:[#allocation121_spill] sm:$0xff]  ;;  %v11808_v55 = vld [vmem:[#allocation32_spill] sm:$0xff] }
 0x556   :  { %v10260_v10 = vpop.eup %7318  ;;  %7338 = vrcp.f32 %v3415_v13  ;;  %v3262_v45 = vpop.xlane.xlu0 %3261  ;;  %v3729_v36 = vmul.f32 %v7317_v30, %v11805_v42  ;;  %v2931_v46 = vsub.f32 %v11807_v37, %v9918_v26  ;;  %v3173_v30 = vmul.f32 1.442695, %v2932_v60 }
 0x557   :  { %v7321_v48 = vpop.eup %7320  ;;  %7340 = vpow2.f32 %v3167_v49  ;;  %v3063_v13 = vmul.f32 1.442695, %v2877_v39  ;;  %v3530_v60 = vsel %vm2434_vm2, %v10260_v10, 0.0 }
 0x558   :  { %v7323_v33 = vpop.eup %7322  ;;  %7342 = vpow2.f32 %v3065_v28  ;;  %3522 = vadd.xlane.f32.xlu1 %v3521_v62  ;;  %6712 = vmatprep.mubr.msk.f32.mxu1 %vm2434_vm2, %v3729_v36  ;;  %v3784_v42 = vmul.f32 %v7321_v48, %v11810_v2  ;;  %v11811_v62 = vld [vmem:[#allocation122_spill] sm:$0xff]  ;;  %v3365_v48 = vsel %vm2434_vm2, %v10250_v6, 0.0  ;;  %v11814_v2 = vld [vmem:[#allocation124_spill] sm:$0xff] }
 0x559   :  { %v10273_v50 = vpop.eup %7324  ;;  %7344 = vrcp.f32 %v3262_v45  ;;  %v3265_v49 = vpop.xlane.xlu1 %3264  ;;  %3369 = vadd.xlane.f32.xlu0 %v3368_v0  ;;  %6713 = vmatmul.mubr.msk.f32.gmra.mrb[94].mxu1 %vm2434_vm2, %v3730_v8  ;;  %v3783_v19 = vmul.f32 %v7323_v33, %v11808_v55  ;;  %v2880_v17 = vsub.f32 %v11811_v62, %v9922_v15  ;;  %v3171_v8 = vmul.f32 1.442695, %v2931_v46  ;;  %v11812_v33 = vld [vmem:[#allocation123_spill] sm:$0xff]  ;;  %v11813_v55 = vld [vmem:[#allocation40_spill] sm:$0xff]  ;;  %v11815_v62 = vld [vmem:[#allocation33_spill] sm:$0xff] }
 0x55a   :  { %v10277_v28 = vpop.eup %7326  ;;  %7346 = vrcp.f32 %v3265_v49  ;;  %v3259_v26 = vpop.xlane.xlu0 %3258  ;;  %v2934_v39 = vsub.f32 %v11812_v33, %v9934_v27  ;;  %v3527_v46 = vsel %vm2434_vm2, %v10273_v50, 0.0 }
 0x55b   :  { %11809 = vst [vmem:[#allocation91_spill] sm:$0xff] %v10277_v28  ;;  %v10280_v36 = vpop.eup %7328  ;;  %7348 = vrcp.f32 %v3259_v26  ;;  %6809 = vmatprep.mubr.msk.f32.mxu0 %vm2434_vm2, %v3783_v19  ;;  %v3069_v26 = vmul.f32 1.442695, %v2880_v17  ;;  %v11817_v17 = vld [vmem:[#allocation126_spill] sm:$0xff] }
 0x55c   :  { %v7331_v45 = vpop.eup %7330  ;;  %3531 = vadd.xlane.f32.xlu1 %v3530_v60  ;;  %6810 = vmatmul.mubr.msk.f32.gmra.mrb[100].mxu0 %vm2434_vm2, %v3784_v42  ;;  %7350 = vpow2.f32 %v3173_v30  ;;  %v2879_v42 = vsub.f32 %v11814_v2, %v9938_v52  ;;  %v3177_v33 = vmul.f32 1.442695, %v2934_v39  ;;  %v2882_v52 = vsub.f32 %v11817_v17, %v9954_v29  ;;  %v11820_v2 = vld [vmem:[#allocation34_spill] sm:$0xff]  ;;  %v11821_v29 = vld [vmem:[#allocation128_spill] sm:$0xff] }
 0x55d   :  { %v7333_v37 = vpop.eup %7332  ;;  %v3424_v15 = vpop.xlane.xlu1 %3423  ;;  %3366 = vadd.xlane.f32.xlu0 %v3365_v48  ;;  %7352 = vpow2.f32 %v3063_v13  ;;  %v3732_v60 = vmul.f32 %v7331_v45, %v11815_v62  ;;  %v11816_v48 = vld [vmem:[#allocation125_spill] sm:$0xff]  ;;  %v11818_v45 = vld [vmem:[#allocation36_spill] sm:$0xff] }
 0x55e   :  { %v10292_v0 = vpop.eup %7334  ;;  %v3268_v49 = vpop.xlane.xlu0 %3267  ;;  %v3731_v19 = vmul.f32 %v7333_v37, %v11813_v55  ;;  %v2933_v13 = vsub.f32 %v11816_v48, %v9950_v9  ;;  %v3374_v37 = vsel %vm2434_vm2, %v10277_v28, 0.0  ;;  %v11819_v9 = vld [vmem:[#allocation127_spill] sm:$0xff]  ;;  %v3067_v28 = vmul.f32 1.442695, %v2879_v42 }
 0x55f   :  { %v7337_v27 = vpop.eup %7336  ;;  %7354 = vrcp.f32 %v3268_v49  ;;  %v3073_v42 = vmul.f32 1.442695, %v2882_v52 }
 0x560   :  { %v7339_v30 = vpop.eup %7338  ;;  %7356 = vpow2.f32 %v3171_v8  ;;  %3528 = vadd.xlane.f32.xlu1 %v3527_v46  ;;  %6715 = vmatprep.mubr.msk.f32.mxu1 %vm2434_vm2, %v3731_v19  ;;  %v2936_v46 = vsub.f32 %v11819_v9, %v9966_v18  ;;  %v3786_v62 = vmul.f32 %v7337_v27, %v11820_v2  ;;  %v11822_v18 = vld [vmem:[#allocation129_spill] sm:$0xff]  ;;  %v3371_v27 = vsel %vm2434_vm2, %v10292_v0, 0.0 }
 0x561   :  { %v10305_v55 = vpop.eup %7340  ;;  %7358 = vrcp.f32 %v3424_v15  ;;  %v3421_v49 = vpop.xlane.xlu1 %3420  ;;  %3375 = vadd.xlane.f32.xlu0 %v3374_v37  ;;  %6716 = vmatmul.mubr.msk.f32.gmra.mrb[96].mxu1 %vm2434_vm2, %v3732_v60  ;;  %v3785_v8 = vmul.f32 %v7339_v30, %v11818_v45  ;;  %v2881_v15 = vsub.f32 %v11821_v29, %v9970_v61  ;;  %v3536_v60 = vsel %vm2434_vm2, %v10280_v36, 0.0  ;;  %v11825_v29 = vld [vmem:[#allocation130_spill] sm:$0xff] }
 0x562   :  { %v10311_v39 = vpop.eup %7342  ;;  %7360 = vrcp.f32 %v3421_v49  ;;  %v3274_v19 = vpop.xlane.xlu0 %3273  ;;  %v3175_v37 = vmul.f32 1.442695, %v2933_v13  ;;  %v2935_v17 = vsub.f32 %v11822_v18, %v9982_v23  ;;  %v3181_v49 = vmul.f32 1.442695, %v2936_v46  ;;  %v11823_v13 = vld [vmem:[#allocation37_spill] sm:$0xff]  ;;  %v11826_v18 = vld [vmem:[#allocation38_spill] sm:$0xff] }
 0x563   :  { %v7345_v48 = vpop.eup %7344  ;;  %7362 = vpow2.f32 %v3069_v26  ;;  %6812 = vmatprep.mubr.msk.f32.mxu0 %vm2434_vm2, %v3785_v8  ;;  %v3071_v9 = vmul.f32 1.442695, %v2881_v15  ;;  %v3380_v2 = vsel %vm2434_vm2, %v10311_v39, 0.0 }
 0x564   :  { %v7347_v30 = vpop.eup %7346  ;;  %7364 = vpow2.f32 %v3177_v33  ;;  %3537 = vadd.xlane.f32.xlu1 %v3536_v60  ;;  %6813 = vmatmul.mubr.msk.f32.gmra.mrb[102].mxu0 %vm2434_vm2, %v3786_v62  ;;  %v3533_v33 = vsel %vm2434_vm2, %v10305_v55, 0.0  ;;  %v11824_v62 = vld [vmem:[#allocation35_spill] sm:$0xff]  ;;  %v3179_v46 = vmul.f32 1.442695, %v2935_v17  ;;  %v2939_v60 = vsub.f32 %v11825_v29, %v9986_v59  ;;  %v11831_v29 = vld [vmem:[#allocation46_spill] sm:$0xff] }
 0x565   :  { %v7349_v26 = vpop.eup %7348  ;;  %7366 = vrcp.f32 %v3274_v19  ;;  %v3271_v61 = vpop.xlane.xlu1 %3270  ;;  %3372 = vadd.xlane.f32.xlu0 %v3371_v27  ;;  %v3734_v52 = vmul.f32 %v7345_v48, %v11824_v62  ;;  %v3735_v27 = vmul.f32 %v7347_v30, %v11826_v18  ;;  %v11833_v18 = vld [vmem:[#allocation42_spill] sm:$0xff] }
 0x566   :  { %7368 = vrcp.f32 %v3271_v61  ;;  %v3280_v45 = vpop.xlane.xlu0 %3279  ;;  %v3733_v8 = vmul.f32 %v7349_v26, %v11823_v13  ;;  %v10329_v23 = vpop.eup %7350  ;;  %v11828_v61 = vld [vmem:[#allocation131_spill] sm:$0xff]  ;;  %v3187_v13 = vmul.f32 1.442695, %v2939_v60 }
 0x567   :  { %7370 = vpow2.f32 %v3067_v28  ;;  %v10334_v19 = vpop.eup %7352  ;;  %v2938_v30 = vsub.f32 %v11828_v61, %v9998_v34 }
 0x568   :  { %7372 = vpow2.f32 %v3175_v37  ;;  %3534 = vadd.xlane.f32.xlu1 %v3533_v33  ;;  %6718 = vmatprep.mubr.msk.f32.mxu1 %vm2434_vm2, %v3733_v8  ;;  %v11827_v37 = vld [vmem:[#allocation44_spill] sm:$0xff] }
 0x569   :  { %v7355_v26 = vpop.eup %7354  ;;  %7374 = vpow2.f32 %v3073_v42  ;;  %v3430_v28 = vpop.xlane.xlu1 %3429  ;;  %3381 = vadd.xlane.f32.xlu0 %v3380_v2  ;;  %6719 = vmatmul.mubr.msk.f32.gmra.mrb[98].mxu1 %vm2434_vm2, %v3734_v52  ;;  %v3542_v42 = vsel %vm2434_vm2, %v10329_v23, 0.0  ;;  %v11829_v8 = vld [vmem:[#allocation132_spill] sm:$0xff]  ;;  %v3377_v2 = vsel %vm2434_vm2, %v10334_v19, 0.0 }
 0x56a   :  { %v10341_v15 = vpop.eup %7356  ;;  %7376 = vpow2.f32 %v3181_v49  ;;  %6721 = vmatprep.mubr.msk.f32.mxu1 %vm2434_vm2, %v3735_v27  ;;  %v10344_v48 = vpop.xlane.xlu0 %3285  ;;  %v3736_v59 = vmul.f32 %v7355_v26, %v11827_v37  ;;  %v2941_v49 = vsub.f32 %v11829_v8, %v10002_v7  ;;  %v3185_v37 = vmul.f32 1.442695, %v2938_v30 }
 0x56b   :  { %v7359_v17 = vpop.eup %7358  ;;  %7378 = vpow2.f32 %v3071_v9  ;;  %v11830_v9 = vld [vmem:[#allocation133_spill] sm:$0xff] }
 0x56c   :  { %v7361_v33 = vpop.eup %7360  ;;  %7380 = vpow2.f32 %v3179_v46  ;;  %3543 = vadd.xlane.f32.xlu1 %v3542_v42  ;;  %v2937_v52 = vsub.f32 %v11830_v9, %v10016_v41  ;;  %v3788_v27 = vmul.f32 %v7359_v17, %v11833_v18  ;;  %v3539_v41 = vsel %vm2434_vm2, %v10341_v15, 0.0  ;;  %v11839_v18 = vld [vmem:[#allocation77_spill] sm:$0xff] }
 0x56d   :  { %v10355_v62 = vpop.eup %7362  ;;  %7382 = vrcp.f32 %v3430_v28  ;;  %v3427_v34 = vpop.xlane.xlu1 %3426  ;;  %3378 = vadd.xlane.f32.xlu0 %v3377_v2  ;;  %6722 = vmatmul.mubr.msk.f32.gmra.mrb[100].mxu1 %vm2434_vm2, %v3736_v59  ;;  %v3787_v46 = vmul.f32 %v7361_v33, %v11831_v29  ;;  %v3191_v61 = vmul.f32 1.442695, %v2941_v49  ;;  %v11834_v59 = vld [vmem:[#allocation13_spill] sm:$0xff]  ;;  %v11835_v2 = vld [vmem:[#allocation50_spill] sm:$0xff]  ;;  %v11836_v49 = vld [vmem:[#allocation39_spill] sm:$0xff] }
 0x56e   :  { %v10361_v60 = vpop.eup %7364  ;;  %7384 = vrcp.f32 %v3427_v34  ;;  %v3433_v7 = vpop.xlane.xlu0 %3432  ;;  %v2943_v42 = vsub.f32 %v11834_v59, %v10018_v63  ;;  %v3386_v17 = vsel %vm2434_vm2, %v10355_v62, 0.0  ;;  %v3183_v30 = vmul.f32 1.442695, %v2937_v52 }
 0x56f   :  { %11832 = vst [vmem:[#allocation95_spill] sm:$0xff] %v10361_v60  ;;  %v7367_v26 = vpop.eup %7366  ;;  %7386 = vrcp.f32 %v3433_v7  ;;  %6815 = vmatprep.mubr.msk.f32.mxu0 %vm2434_vm2, %v3787_v46  ;;  %v3548_v46 = vsel %vm2434_vm2, %v10361_v60, 0.0  ;;  %v11838_v7 = vld [vmem:[#allocation82_spill] sm:$0xff] }
 0x570   :  { %v7369_v28 = vpop.eup %7368  ;;  %7388 = vpow2.f32 %v3187_v13  ;;  %3540 = vadd.xlane.f32.xlu1 %v3539_v41  ;;  %6816 = vmatmul.mubr.msk.f32.gmra.mrb[104].mxu0 %vm2434_vm2, %v3788_v27  ;;  %v3738_v63 = vmul.f32 %v7367_v26, %v11836_v49  ;;  %v2940_v27 = vsub.f32 %v11839_v18, %v11838_v7 }
 0x571   :  { %v10372_v33 = vpop.eup %7370  ;;  %7390 = vrcp.f32 %v3280_v45  ;;  %v3277_v8 = vpop.xlane.xlu1 %3276  ;;  %3387 = vadd.xlane.f32.xlu0 %v3386_v17  ;;  %v3737_v9 = vmul.f32 %v7369_v28, %v11835_v2  ;;  %v3195_v45 = vmul.f32 1.442695, %v2943_v42  ;;  %v11840_v42 = vld [vmem:[#allocation87_spill] sm:$0xff]  ;;  %v11841_v17 = vld [vmem:[#allocation10_spill] sm:$0xff] }
 0x572   :  { %v10375_v34 = vpop.eup %7372  ;;  %7392 = vrcp.f32 %v3277_v8  ;;  %v3292_v13 = vpop.xlane.xlu0 %3291  ;;  %v3383_v26 = vsel %vm2434_vm2, %v10372_v33, 0.0  ;;  %v2945_v8 = vsub.f32 %v11841_v17, %v11840_v42  ;;  %v3189_v49 = vmul.f32 1.442695, %v2940_v27  ;;  %v11845_v17 = vld [vmem:[#allocation43_spill] sm:$0xff] }
 0x573   :  { %v10378_v29 = vpop.eup %7374  ;;  %7394 = vpow2.f32 %v3185_v37  ;;  %6724 = vmatprep.mubr.msk.f32.mxu1 %vm2434_vm2, %v3737_v9  ;;  %v3545_v2 = vsel %vm2434_vm2, %v10375_v34, 0.0 }
 0x574   :  { %11837 = vst [vmem:[#allocation92_spill] sm:$0xff] %v10378_v29  ;;  %v10383_v52 = vpop.eup %7376  ;;  %7396 = vpow2.f32 %v3191_v61  ;;  %3549 = vadd.xlane.f32.xlu1 %v3548_v46  ;;  %6725 = vmatmul.mubr.msk.f32.gmra.mrb[102].mxu1 %vm2434_vm2, %v3738_v63  ;;  %v11842_v46 = vld [vmem:[#allocation15_spill] sm:$0xff] }
 0x575   :  { %v10390_v41 = vpop.eup %7378  ;;  %7398 = vpow2.f32 %v3183_v30  ;;  %v3436_v37 = vpop.xlane.xlu1 %3435  ;;  %3384 = vadd.xlane.f32.xlu0 %v3383_v26  ;;  %v3392_v30 = vsel %vm2434_vm2, %v10378_v29, 0.0  ;;  %v2942_v7 = vsub.f32 %v11842_v46, %v10050_v56  ;;  %v11843_v26 = vld [vmem:[#allocation54_spill] sm:$0xff]  ;;  %v3199_v29 = vmul.f32 1.442695, %v2945_v8 }
 0x576   :  { %v10392_v28 = vpop.eup %7380  ;;  %7400 = vrcp.f32 %v3436_v37  ;;  %v3439_v59 = vpop.xlane.xlu0 %3438  ;;  %v3554_v56 = vsel %vm2434_vm2, %v10383_v52, 0.0 }
 0x577   :  { %v7383_v61 = vpop.eup %7382  ;;  %7402 = vrcp.f32 %v3439_v59 }
 0x578   :  { %v7385_v9 = vpop.eup %7384  ;;  %7404 = vpow2.f32 %v3195_v45  ;;  %3546 = vadd.xlane.f32.xlu1 %v3545_v2  ;;  %v11844_v45 = vld [vmem:[#allocation45_spill] sm:$0xff] }
 0x579   :  { %v7387_v63 = vpop.eup %7386  ;;  %7406 = vrcp.f32 %v10344_v48  ;;  %v3283_v18 = vpop.xlane.xlu1 %3282  ;;  %3393 = vadd.xlane.f32.xlu0 %v3392_v30  ;;  %v3789_v37 = vmul.f32 %v7385_v9, %v11843_v26  ;;  %v3790_v27 = vmul.f32 %v7383_v61, %v11844_v45  ;;  %v3389_v9 = vsel %vm2434_vm2, %v10390_v41, 0.0 }
 0x57a   :  { %v10404_v59 = vpop.eup %7388  ;;  %7408 = vrcp.f32 %v3283_v18  ;;  %v3289_v42 = vpop.xlane.xlu0 %3288  ;;  %v3791_v2 = vmul.f32 %v7387_v63, %v11845_v17  ;;  %v3193_v61 = vmul.f32 1.442695, %v2942_v7  ;;  %v11846_v63 = vld [vmem:[#allocation80_spill] sm:$0xff]  ;;  %v11847_v18 = vld [vmem:[#allocation49_spill] sm:$0xff] }
 0x57b   :  { %v7391_v60 = vpop.eup %7390  ;;  %7410 = vrcp.f32 %v3289_v42  ;;  %6818 = vmatprep.mubr.msk.f32.mxu0 %vm2434_vm2, %v3789_v37  ;;  %v2944_v8 = vsub.f32 %v11846_v63, %v10068_v5  ;;  %v11848_v42 = vld [vmem:[#allocation41_spill] sm:$0xff]  ;;  %v3551_v5 = vsel %vm2434_vm2, %v10392_v28, 0.0  ;;  %v3563_v7 = vsel %vm2434_vm2, %v10404_v59, 0.0 }
 0x57c   :  { %v7393_v48 = vpop.eup %7392  ;;  %7412 = vpow2.f32 %v3189_v49  ;;  %3555 = vadd.xlane.f32.xlu1 %v3554_v56  ;;  %6819 = vmatmul.mubr.msk.f32.gmra.mrb[106].mxu0 %vm2434_vm2, %v3790_v27  ;;  %v3740_v45 = vmul.f32 %v7391_v60, %v11848_v42  ;;  %v11849_v60 = vld [vmem:[#allocation56_spill] sm:$0xff] }
 0x57d   :  { %v10414_v30 = vpop.eup %7394  ;;  %7414 = vrcp.f32 %v3292_v13  ;;  %v3442_v46 = vpop.xlane.xlu1 %3441  ;;  %3390 = vadd.xlane.f32.xlu0 %v3389_v9  ;;  %6821 = vmatprep.mubr.msk.f32.mxu0 %vm2434_vm2, %v3791_v2  ;;  %v3739_v26 = vmul.f32 %v7393_v48, %v11847_v18  ;;  %v3197_v2 = vmul.f32 1.442695, %v2944_v8  ;;  %v11851_v9 = vld [vmem:[#allocation83_spill] sm:$0xff] }
 0x57e   :  { %v10420_v49 = vpop.eup %7396  ;;  %7416 = vrcp.f32 %v3442_v46  ;;  %v3298_v37 = vpop.xlane.xlu0 %3297  ;;  %v2946_v63 = vsub.f32 %v11851_v9, %v10080_v35  ;;  %v11852_v18 = vld [vmem:[#allocation47_spill] sm:$0xff] }
 0x57f   :  { %v10423_v27 = vpop.eup %7398  ;;  %7418 = vpow2.f32 %v3199_v29  ;;  %6727 = vmatprep.mubr.msk.f32.mxu1 %vm2434_vm2, %v3739_v26 }
 0x580   :  { %v7401_v13 = vpop.eup %7400  ;;  %3552 = vadd.xlane.f32.xlu1 %v3551_v5  ;;  %6728 = vmatmul.mubr.msk.f32.gmra.mrb[104].mxu1 %vm2434_vm2, %v3740_v45  ;;  %7420 = vpow2.f32 %v3193_v61  ;;  %v3557_v61 = vsel %vm2434_vm2, %v10423_v27, 0.0  ;;  %v3569_v45 = vsel %vm2434_vm2, %v10420_v49, 0.0 }
 0x581   :  { %v7403_v17 = vpop.eup %7402  ;;  %v3448_v56 = vpop.xlane.xlu1 %3447  ;;  %3564 = vadd.xlane.f32.xlu0 %v3563_v7  ;;  %v3792_v48 = vmul.f32 %v7401_v13, %v11849_v60  ;;  %v11853_v13 = vld [vmem:[#allocation58_spill] sm:$0xff] }
 0x582   :  { %v10432_v29 = vpop.eup %7404  ;;  %7422 = vrcp.f32 %v3448_v56  ;;  %v3445_v46 = vpop.xlane.xlu0 %3444  ;;  %v3793_v26 = vmul.f32 %v7403_v17, %v11852_v18  ;;  %v3201_v56 = vmul.f32 1.442695, %v2946_v63 }
 0x583   :  { %11850 = vst [vmem:[#allocation94_spill] sm:$0xff] %v10432_v29  ;;  %v7407_v42 = vpop.eup %7406  ;;  %7424 = vrcp.f32 %v3445_v46  ;;  %6822 = vmatmul.mubr.msk.f32.gmra.mrb[108].mxu0 %vm2434_vm2, %v3792_v48  ;;  %v11854_v48 = vld [vmem:[#allocation48_spill] sm:$0xff]  ;;  %v11855_v46 = vld [vmem:[#allocation51_spill] sm:$0xff]  ;;  %v3575_v63 = vsel %vm2434_vm2, %v10432_v29, 0.0 }
 0x584   :  { %v7409_v8 = vpop.eup %7408  ;;  %3558 = vadd.xlane.f32.xlu1 %v3557_v61  ;;  %6824 = vmatprep.mubr.msk.f32.mxu0 %vm2434_vm2, %v3793_v26  ;;  %7426 = vpow2.f32 %v3197_v2  ;;  %v3742_v9 = vmul.f32 %v7407_v42, %v11854_v48  ;;  %v3560_v2 = vsel %vm2434_vm2, %v10414_v30, 0.0  ;;  %v11857_v42 = vld [vmem:[#allocation53_spill] sm:$0xff] }
 0x585   :  { %v7411_v5 = vpop.eup %7410  ;;  %v3454_v35 = vpop.xlane.xlu1 %3453  ;;  %3570 = vadd.xlane.f32.xlu0 %v3569_v45  ;;  %v3741_v7 = vmul.f32 %v7409_v8, %v11853_v13  ;;  %7428 = vrcp.f32 %v3298_v37  ;;  %v11858_v13 = vld [vmem:[#allocation52_spill] sm:$0xff] }
 0x586   :  { %v10444_v17 = vpop.eup %7412  ;;  %v3295_v60 = vpop.xlane.xlu0 %3294  ;;  %v3743_v18 = vmul.f32 %v7411_v5, %v11855_v46 }
 0x587   :  { %v7415_v61 = vpop.eup %7414  ;;  %7430 = vrcp.f32 %v3295_v60  ;;  %6730 = vmatprep.mubr.msk.f32.mxu1 %vm2434_vm2, %v3741_v7  ;;  %v3566_v48 = vsel %vm2434_vm2, %v10444_v17, 0.0 }
 0x588   :  { %v7417_v26 = vpop.eup %7416  ;;  %3561 = vadd.xlane.f32.xlu1 %v3560_v2  ;;  %6731 = vmatmul.mubr.msk.f32.gmra.mrb[106].mxu1 %vm2434_vm2, %v3742_v9  ;;  %7432 = vpow2.f32 %v3201_v56  ;;  %v3744_v7 = vmul.f32 %v7415_v61, %v11858_v13  ;;  %v11860_v2 = vld [vmem:[#allocation59_spill] sm:$0xff] }
 0x589   :  { %v10454_v37 = vpop.eup %7418  ;;  %v3460_v8 = vpop.xlane.xlu1 %3459  ;;  %3576 = vadd.xlane.f32.xlu0 %v3575_v63  ;;  %6733 = vmatprep.mubr.msk.f32.mxu1 %vm2434_vm2, %v3743_v18  ;;  %v3794_v45 = vmul.f32 %v7417_v26, %v11857_v42  ;;  %7434 = vrcp.f32 %v3454_v35 }
 0x58a   :  { %11856 = vst [vmem:[#allocation99_spill] sm:$0xff] %v10454_v37  ;;  %v3304_v5 = vpop.xlane.xlu0 %3303  ;;  %v10459_v60 = vpop.eup %7420  ;;  %v3581_v46 = vsel %vm2434_vm2, %v10454_v37, 0.0 }
 0x58b   :  { %11859 = vst [vmem:[#allocation96_spill] sm:$0xff] %v10459_v60  ;;  %6825 = vmatmul.mubr.msk.f32.gmra.mrb[110].mxu0 %vm2434_vm2, %v3794_v45  ;;  %v3572_v42 = vsel %vm2434_vm2, %v10459_v60, 0.0  ;;  %v11862_v45 = vld [vmem:[#allocation60_spill] sm:$0xff] }
 0x58c   :  { %v7423_v9 = vpop.eup %7422  ;;  %3567 = vadd.xlane.f32.xlu1 %v3566_v48  ;;  %6734 = vmatmul.mubr.msk.f32.gmra.mrb[108].mxu1 %vm2434_vm2, %v3744_v7 }
 0x58d   :  { %v7425_v18 = vpop.eup %7424  ;;  %v3457_v56 = vpop.xlane.xlu1 %3456  ;;  %3582 = vadd.xlane.f32.xlu0 %v3581_v46  ;;  %v3796_v13 = vmul.f32 %v7423_v9, %v11862_v45 }
 0x58e   :  { %7436 = vrcp.f32 %v3457_v56  ;;  %v3451_v61 = vpop.xlane.xlu0 %3450  ;;  %v3795_v26 = vmul.f32 %v7425_v18, %v11860_v2  ;;  %v10468_v63 = vpop.eup %7426  ;;  %v11863_v18 = vld [vmem:[#allocation61_spill] sm:$0xff]  ;;  %v11864_v2 = vld [vmem:[#allocation55_spill] sm:$0xff] }
 0x58f   :  { %11861 = vst [vmem:[#allocation97_spill] sm:$0xff] %v10468_v63  ;;  %7438 = vrcp.f32 %v3451_v61  ;;  %v7429_v7 = vpop.eup %7428  ;;  %v3578_v61 = vsel %vm2434_vm2, %v10468_v63, 0.0 }
 0x590   :  { %3573 = vadd.xlane.f32.xlu1 %v3572_v42  ;;  %6827 = vmatprep.mubr.msk.f32.mxu0 %vm2434_vm2, %v3795_v26  ;;  %7440 = vrcp.f32 %v3460_v8  ;;  %v3746_v37 = vmul.f32 %v7429_v7, %v11864_v2 }
 0x591   :  { %v7431_v48 = vpop.eup %7430  ;;  %v3466_v35 = vpop.xlane.xlu1 %3465  ;;  %6828 = vmatmul.mubr.msk.f32.gmra.mrb[112].mxu0 %vm2434_vm2, %v3796_v13  ;;  %7442 = vrcp.f32 %v3304_v5 }
 0x592   :  { %v3301_v46 = vpop.xlane.xlu0 %3300  ;;  %v3745_v56 = vmul.f32 %v7431_v48, %v11863_v18  ;;  %v10479_v9 = vpop.eup %7432 }
 0x593   :  { %7444 = vrcp.f32 %v3301_v46  ;;  %11865 = vst [vmem:[#allocation103_spill] sm:$0xff] %v10479_v9  ;;  %v7435_v26 = vpop.eup %7434  ;;  %v3584_v42 = vsel %vm2434_vm2, %v10479_v9, 0.0  ;;  %v11866_v46 = vld [vmem:[#allocation65_spill] sm:$0xff] }
 0x594   :  { %3579 = vadd.xlane.f32.xlu1 %v3578_v61  ;;  %6736 = vmatprep.mubr.msk.f32.mxu1 %vm2434_vm2, %v3745_v56  ;;  %7446 = vrcp.f32 %v3466_v35  ;;  %v11867_v35 = vld [vmem:[#allocation62_spill] sm:$0xff] }
 0x595   :  { %v3463_v8 = vpop.xlane.xlu1 %3462  ;;  %6737 = vmatmul.mubr.msk.f32.gmra.mrb[110].mxu1 %vm2434_vm2, %v3746_v37  ;;  %v3798_v56 = vmul.f32 %v7435_v26, %v11867_v35  ;;  %v11868_v37 = vld [vmem:[#allocation64_spill] sm:$0xff]  ;;  %v11871_v26 = vld [vmem:[#allocation57_spill] sm:$0xff] }
 0x596   :  { %7448 = vrcp.f32 %v3463_v8  ;;  %v3310_v5 = vpop.xlane.xlu0 %3309 }
 0x597   :  { %7450 = vrcp.f32 %v3310_v5 }
 0x598   :  { %v7437_v45 = vpop.eup %7436  ;;  %3585 = vadd.xlane.f32.xlu1 %v3584_v42  ;;  %v11869_v42 = vld [vmem:[#allocation67_spill] sm:$0xff] }
 0x599   :  { %v7439_v13 = vpop.eup %7438  ;;  %v3472_v48 = vpop.xlane.xlu1 %3471  ;;  %v3799_v8 = vmul.f32 %v7437_v45, %v11868_v37 }
 0x59a   :  { %v3307_v7 = vpop.xlane.xlu0 %3306  ;;  %v3797_v18 = vmul.f32 %v7439_v13, %v11866_v46  ;;  %v7441_v61 = vpop.eup %7440 }
 0x59b   :  { %7452 = vrcp.f32 %v3307_v7  ;;  %v7443_v2 = vpop.eup %7442  ;;  %v11870_v7 = vld [vmem:[#allocation63_spill] sm:$0xff]  ;;  %v3800_v35 = vmul.f32 %v7441_v61, %v11871_v26 }
 0x59c   :  { %6830 = vmatprep.mubr.msk.f32.mxu0 %vm2434_vm2, %v3797_v18  ;;  %7454 = vrcp.f32 %v3472_v48  ;;  %v3748_v29 = vmul.f32 %v7443_v2, %v11870_v7  ;;  %v11872_v48 = vld [vmem:[#allocation68_spill] sm:$0xff]  ;;  %v11875_v7 = vld [vmem:[#allocation69_spill] sm:$0xff] }
 0x59d   :  { %v7445_v63 = vpop.eup %7444  ;;  %v3469_v9 = vpop.xlane.xlu1 %3468  ;;  %6831 = vmatmul.mubr.msk.f32.gmra.mrb[114].mxu0 %vm2434_vm2, %v3798_v56 }
 0x59e   :  { %7456 = vrcp.f32 %v3469_v9  ;;  %6833 = vmatprep.mubr.msk.f32.mxu0 %vm2434_vm2, %v3799_v8  ;;  %v3316_v5 = vpop.xlane.xlu0 %3315  ;;  %v3747_v13 = vmul.f32 %v7445_v63, %v11869_v42  ;;  %v7447_v46 = vpop.eup %7446  ;;  %v11873_v63 = vld [vmem:[#allocation66_spill] sm:$0xff] }
 0x59f   :  { %7458 = vrcp.f32 %v3316_v5  ;;  %v3802_v56 = vmul.f32 %v7447_v46, %v11873_v63  ;;  %v11876_v46 = vld [vmem:[#allocation72_spill] sm:$0xff] }
 0x5a0   :  { %v7449_v60 = vpop.eup %7448  ;;  %6739 = vmatprep.mubr.msk.f32.mxu1 %vm2434_vm2, %v3747_v13 }
 0x5a1   :  { %v3478_v45 = vpop.xlane.xlu1 %3477  ;;  %6740 = vmatmul.mubr.msk.f32.gmra.mrb[112].mxu1 %vm2434_vm2, %v3748_v29  ;;  %6834 = vmatmul.mubr.msk.f32.gmra.mrb[116].mxu0 %vm2434_vm2, %v3800_v35  ;;  %v3801_v9 = vmul.f32 %v7449_v60, %v11872_v48  ;;  %v7451_v2 = vpop.eup %7450  ;;  %v11874_v29 = vld [vmem:[#allocation71_spill] sm:$0xff]  ;;  %v11877_v48 = vld [vmem:[#allocation70_spill] sm:$0xff] }
 0x5a2   :  { %v3313_v18 = vpop.xlane.xlu0 %3312  ;;  %v3750_v60 = vmul.f32 %v7451_v2, %v11875_v7 }
 0x5a3   :  { %7460 = vrcp.f32 %v3313_v18  ;;  %6836 = vmatprep.mubr.msk.f32.mxu0 %vm2434_vm2, %v3801_v9 }
 0x5a4   :  { %7462 = vrcp.f32 %v3478_v45 }
 0x5a5   :  { %v7453_v37 = vpop.eup %7452  ;;  %v3475_v61 = vpop.xlane.xlu1 %3474  ;;  %6837 = vmatmul.mubr.msk.f32.gmra.mrb[118].mxu0 %vm2434_vm2, %v3802_v56 }
 0x5a6   :  { %7464 = vrcp.f32 %v3475_v61  ;;  %v3322_v8 = vpop.xlane.xlu0 %3321  ;;  %v3749_v42 = vmul.f32 %v7453_v37, %v11874_v29  ;;  %v7455_v13 = vpop.eup %7454  ;;  %v11878_v37 = vld [vmem:[#allocation75_spill] sm:$0xff] }
 0x5a7   :  { %7466 = vrcp.f32 %v3322_v8  ;;  %v3804_v9 = vmul.f32 %v7455_v13, %v11877_v48 }
 0x5a8   :  { %v7457_v5 = vpop.eup %7456  ;;  %6742 = vmatprep.mubr.msk.f32.mxu1 %vm2434_vm2, %v3749_v42  ;;  %v11879_v42 = vld [vmem:[#allocation73_spill] sm:$0xff] }
 0x5a9   :  { %v3484_v26 = vpop.xlane.xlu1 %3483  ;;  %6743 = vmatmul.mubr.msk.f32.gmra.mrb[114].mxu1 %vm2434_vm2, %v3750_v60  ;;  %v3803_v35 = vmul.f32 %v7457_v5, %v11876_v46  ;;  %v7459_v18 = vpop.eup %7458  ;;  %v11880_v60 = vld [vmem:[#allocation76_spill] sm:$0xff] }
 0x5aa   :  { %v3319_v45 = vpop.xlane.xlu0 %3318  ;;  %v3752_v7 = vmul.f32 %v7459_v18, %v11879_v42 }
 0x5ab   :  { %7468 = vrcp.f32 %v3319_v45  ;;  %6839 = vmatprep.mubr.msk.f32.mxu0 %vm2434_vm2, %v3803_v35  ;;  %v11881_v35 = vld [vmem:[#allocation74_spill] sm:$0xff] }
 0x5ac   :  { %6840 = vmatmul.mubr.msk.f32.gmra.mrb[120].mxu0 %vm2434_vm2, %v3804_v9  ;;  %7470 = vrcp.f32 %v3484_v26 }
 0x5ad   :  { %v7461_v63 = vpop.eup %7460  ;;  %v3481_v56 = vpop.xlane.xlu1 %3480 }
 0x5ae   :  { %7472 = vrcp.f32 %v3481_v56  ;;  %v3328_v2 = vpop.xlane.xlu0 %3327  ;;  %v3751_v61 = vmul.f32 %v7461_v63, %v11878_v37  ;;  %v7463_v29 = vpop.eup %7462  ;;  %v11882_v63 = vld [vmem:[#allocation81_spill] sm:$0xff] }
 0x5af   :  { %7474 = vrcp.f32 %v3328_v2  ;;  %v3806_v26 = vmul.f32 %v7463_v29, %v11881_v35 }
 0x5b0   :  { %v7465_v8 = vpop.eup %7464  ;;  %6745 = vmatprep.mubr.msk.f32.mxu1 %vm2434_vm2, %v3751_v61  ;;  %v11883_v61 = vld [vmem:[#allocation78_spill] sm:$0xff] }
 0x5b1   :  { %v3490_v13 = vpop.xlane.xlu1 %3489  ;;  %6746 = vmatmul.mubr.msk.f32.gmra.mrb[116].mxu1 %vm2434_vm2, %v3752_v7  ;;  %v3805_v5 = vmul.f32 %v7465_v8, %v11880_v60  ;;  %v7467_v45 = vpop.eup %7466  ;;  %v11884_v60 = vld [vmem:[#allocation79_spill] sm:$0xff] }
 0x5b2   :  { %v3325_v46 = vpop.xlane.xlu0 %3324  ;;  %v3754_v42 = vmul.f32 %v7467_v45, %v11883_v61 }
 0x5b3   :  { %7476 = vrcp.f32 %v3325_v46  ;;  %6842 = vmatprep.mubr.msk.f32.mxu0 %vm2434_vm2, %v3805_v5 }
 0x5b4   :  { %6843 = vmatmul.mubr.msk.f32.gmra.mrb[122].mxu0 %vm2434_vm2, %v3806_v26  ;;  %7478 = vrcp.f32 %v3490_v13 }
 0x5b5   :  { %v7469_v48 = vpop.eup %7468  ;;  %v3487_v9 = vpop.xlane.xlu1 %3486 }
 0x5b6   :  { %7480 = vrcp.f32 %v3487_v9  ;;  %v3334_v18 = vpop.xlane.xlu0 %3333  ;;  %v3753_v56 = vmul.f32 %v7469_v48, %v11882_v63  ;;  %v7471_v37 = vpop.eup %7470 }
 0x5b7   :  { %7482 = vrcp.f32 %v3334_v18  ;;  %v3808_v13 = vmul.f32 %v7471_v37, %v11884_v60  ;;  %v11885_v37 = vld [vmem:[#allocation85_spill] sm:$0xff] }
 0x5b8   :  { %v7473_v2 = vpop.eup %7472  ;;  %6748 = vmatprep.mubr.msk.f32.mxu1 %vm2434_vm2, %v3753_v56 }
 0x5b9   :  { %v3496_v29 = vpop.xlane.xlu1 %3495  ;;  %6749 = vmatmul.mubr.msk.f32.gmra.mrb[118].mxu1 %vm2434_vm2, %v3754_v42  ;;  %v3807_v7 = vmul.f32 %v7473_v2, %v10040_v11  ;;  %v7475_v5 = vpop.eup %7474 }
 0x5ba   :  { %v3331_v8 = vpop.xlane.xlu0 %3330  ;;  %v3756_v11 = vmul.f32 %v7475_v5, %v10046_v58 }
 0x5bb   :  { %7484 = vrcp.f32 %v3331_v8  ;;  %6845 = vmatprep.mubr.msk.f32.mxu0 %vm2434_vm2, %v3807_v7  ;;  %v11886_v8 = vld [vmem:[#allocation89_spill] sm:$0xff] }
 0x5bc   :  { %6846 = vmatmul.mubr.msk.f32.gmra.mrb[124].mxu0 %vm2434_vm2, %v3808_v13  ;;  %7486 = vrcp.f32 %v3496_v29 }
 0x5bd   :  { %v7477_v46 = vpop.eup %7476  ;;  %v3493_v35 = vpop.xlane.xlu1 %3492 }
 0x5be   :  { %7488 = vrcp.f32 %v3493_v35  ;;  %v3340_v26 = vpop.xlane.xlu0 %3339  ;;  %v3755_v45 = vmul.f32 %v7477_v46, %v10064_v38  ;;  %v7479_v48 = vpop.eup %7478  ;;  %v11887_v35 = vld [vmem:[#allocation88_spill] sm:$0xff] }
 0x5bf   :  { %7490 = vrcp.f32 %v3340_v26  ;;  %v3810_v61 = vmul.f32 %v7479_v48, %v11885_v37 }
 0x5c0   :  { %v7481_v9 = vpop.eup %7480  ;;  %6751 = vmatprep.mubr.msk.f32.mxu1 %vm2434_vm2, %v3755_v45 }
 0x5c1   :  { %v3502_v18 = vpop.xlane.xlu1 %3501  ;;  %6752 = vmatmul.mubr.msk.f32.gmra.mrb[120].mxu1 %vm2434_vm2, %v3756_v11  ;;  %v3809_v63 = vmul.f32 %v7481_v9, %v10072_v12  ;;  %v7483_v42 = vpop.eup %7482  ;;  %v11888_v9 = vld [vmem:[#allocation84_spill] sm:$0xff] }
 0x5c2   :  { %v3337_v56 = vpop.xlane.xlu0 %3336  ;;  %v3758_v12 = vmul.f32 %v7483_v42, %v11886_v8 }
 0x5c3   :  { %7492 = vrcp.f32 %v3337_v56  ;;  %6848 = vmatprep.mubr.msk.f32.mxu0 %vm2434_vm2, %v3809_v63  ;;  %v11889_v56 = vld [vmem:[#allocation93_spill] sm:$0xff] }
 0x5c4   :  { %6849 = vmatmul.mubr.msk.f32.gmra.mrb[126].mxu0 %vm2434_vm2, %v3810_v61  ;;  %7494 = vrcp.f32 %v3502_v18 }
 0x5c5   :  { %v7485_v38 = vpop.eup %7484  ;;  %v3499_v58 = vpop.xlane.xlu1 %3498 }
 0x5c6   :  { %7496 = vrcp.f32 %v3499_v58  ;;  %v3346_v2 = vpop.xlane.xlu0 %3345  ;;  %v3757_v29 = vmul.f32 %v7485_v38, %v10092_v22  ;;  %v7487_v7 = vpop.eup %7486  ;;  %v11890_v58 = vld [vmem:[#allocation90_spill] sm:$0xff] }
 0x5c7   :  { %7498 = vrcp.f32 %v3346_v2  ;;  %v3812_v26 = vmul.f32 %v7487_v7, %v11887_v35 }
 0x5c8   :  { %v7489_v60 = vpop.eup %7488  ;;  %6754 = vmatprep.mubr.msk.f32.mxu1 %vm2434_vm2, %v3757_v29 }
 0x5c9   :  { %v3508_v13 = vpop.xlane.xlu1 %3507  ;;  %6755 = vmatmul.mubr.msk.f32.gmra.mrb[122].mxu1 %vm2434_vm2, %v3758_v12  ;;  %v3811_v5 = vmul.f32 %v7489_v60, %v10099_v47  ;;  %v7491_v45 = vpop.eup %7490 }
 0x5ca   :  { %v3343_v46 = vpop.xlane.xlu0 %3342  ;;  %v3760_v47 = vmul.f32 %v7491_v45, %v11889_v56 }
 0x5cb   :  { %7500 = vrcp.f32 %v3343_v46  ;;  %6851 = vmatprep.mubr.msk.f32.mxu0 %vm2434_vm2, %v3811_v5 }
 0x5cc   :  { %6852 = vmatmul.mubr.msk.f32.gmra.mrb[128].mxu0 %vm2434_vm2, %v3812_v26  ;;  %7502 = vrcp.f32 %v3508_v13 }
 0x5cd   :  { %v7493_v22 = vpop.eup %7492  ;;  %v3505_v48 = vpop.xlane.xlu1 %3504 }
 0x5ce   :  { %7504 = vrcp.f32 %v3505_v48  ;;  %v3352_v11 = vpop.xlane.xlu0 %3351  ;;  %v3759_v18 = vmul.f32 %v7493_v22, %v11888_v9  ;;  %v7495_v63 = vpop.eup %7494 }
 0x5cf   :  { %7506 = vrcp.f32 %v3352_v11  ;;  %v3814_v2 = vmul.f32 %v7495_v63, %v11890_v58 }
 0x5d0   :  { %v7497_v37 = vpop.eup %7496  ;;  %6757 = vmatprep.mubr.msk.f32.mxu1 %vm2434_vm2, %v3759_v18 }
 0x5d1   :  { %v3514_v61 = vpop.xlane.xlu1 %3513  ;;  %6758 = vmatmul.mubr.msk.f32.gmra.mrb[124].mxu1 %vm2434_vm2, %v3760_v47  ;;  %v3813_v42 = vmul.f32 %v7497_v37, %v10128_v44  ;;  %v7499_v29 = vpop.eup %7498 }
 0x5d2   :  { %v3349_v38 = vpop.xlane.xlu0 %3348  ;;  %v3762_v44 = vmul.f32 %v7499_v29, %v10110_v40 }
 0x5d3   :  { %7508 = vrcp.f32 %v3349_v38  ;;  %6854 = vmatprep.mubr.msk.f32.mxu0 %vm2434_vm2, %v3813_v42 }
 0x5d4   :  { %6855 = vmatmul.mubr.msk.f32.gmra.mrb[130].mxu0 %vm2434_vm2, %v3814_v2  ;;  %7510 = vrcp.f32 %v3514_v61 }
 0x5d5   :  { %v7501_v7 = vpop.eup %7500  ;;  %v3511_v8 = vpop.xlane.xlu1 %3510 }
 0x5d6   :  { %7512 = vrcp.f32 %v3511_v8  ;;  %v3358_v12 = vpop.xlane.xlu0 %3357  ;;  %v3761_v60 = vmul.f32 %v7501_v7, %v10122_v53  ;;  %v7503_v13 = vpop.eup %7502 }
 0x5d7   :  { %7514 = vrcp.f32 %v3358_v12  ;;  %v3816_v45 = vmul.f32 %v7503_v13, %v10134_v1 }
 0x5d8   :  { %v7505_v5 = vpop.eup %7504  ;;  %6760 = vmatprep.mubr.msk.f32.mxu1 %vm2434_vm2, %v3761_v60 }
 0x5d9   :  { %v3520_v46 = vpop.xlane.xlu1 %3519  ;;  %6761 = vmatmul.mubr.msk.f32.gmra.mrb[126].mxu1 %vm2434_vm2, %v3762_v44  ;;  %v3815_v35 = vmul.f32 %v7505_v5, %v10153_v20  ;;  %v7507_v22 = vpop.eup %7506 }
 0x5da   :  { %v3355_v26 = vpop.xlane.xlu0 %3354  ;;  %v3764_v20 = vmul.f32 %v7507_v22, %v10147_v3 }
 0x5db   :  { %7516 = vrcp.f32 %v3355_v26  ;;  %6857 = vmatprep.mubr.msk.f32.mxu0 %vm2434_vm2, %v3815_v35 }
 0x5dc   :  { %6858 = vmatmul.mubr.msk.f32.gmra.mrb[132].mxu0 %vm2434_vm2, %v3816_v45  ;;  %7518 = vrcp.f32 %v3520_v46 }
 0x5dd   :  { %v7509_v53 = vpop.eup %7508  ;;  %v3517_v40 = vpop.xlane.xlu1 %3516 }
 0x5de   :  { %7520 = vrcp.f32 %v3517_v40  ;;  %v3364_v48 = vpop.xlane.xlu0 %3363  ;;  %v3763_v11 = vmul.f32 %v7509_v53, %v10124_v32  ;;  %v7511_v9 = vpop.eup %7510 }
 0x5df   :  { %7522 = vrcp.f32 %v3364_v48  ;;  %v3818_v47 = vmul.f32 %v7511_v9, %v10167_v16 }
 0x5e0   :  { %v7513_v18 = vpop.eup %7512  ;;  %6763 = vmatprep.mubr.msk.f32.mxu1 %vm2434_vm2, %v3763_v11 }
 0x5e1   :  { %v3526_v1 = vpop.xlane.xlu1 %3525  ;;  %6764 = vmatmul.mubr.msk.f32.gmra.mrb[128].mxu1 %vm2434_vm2, %v3764_v20  ;;  %v3817_v63 = vmul.f32 %v7513_v18, %v10185_v57  ;;  %v7515_v37 = vpop.eup %7514 }
 0x5e2   :  { %v3361_v56 = vpop.xlane.xlu0 %3360  ;;  %v3766_v57 = vmul.f32 %v7515_v37, %v10179_v25  ;;  %v11891_v37 = vld [vmem:[#allocation91_spill] sm:$0xff] }
 0x5e3   :  { %7524 = vrcp.f32 %v3361_v56  ;;  %6860 = vmatprep.mubr.msk.f32.mxu0 %vm2434_vm2, %v3817_v63 }
 0x5e4   :  { %6861 = vmatmul.mubr.msk.f32.gmra.mrb[134].mxu0 %vm2434_vm2, %v3818_v47  ;;  %7526 = vrcp.f32 %v3526_v1 }
 0x5e5   :  { %v7517_v32 = vpop.eup %7516  ;;  %v3523_v3 = vpop.xlane.xlu1 %3522 }
 0x5e6   :  { %7528 = vrcp.f32 %v3523_v3  ;;  %v3370_v61 = vpop.xlane.xlu0 %3369  ;;  %v3765_v42 = vmul.f32 %v7517_v32, %v10163_v43  ;;  %v7519_v38 = vpop.eup %7518 }
 0x5e7   :  { %7530 = vrcp.f32 %v3370_v61  ;;  %v3820_v7 = vmul.f32 %v7519_v38, %v10190_v31 }
 0x5e8   :  { %v7521_v58 = vpop.eup %7520  ;;  %6766 = vmatprep.mubr.msk.f32.mxu1 %vm2434_vm2, %v3765_v42 }
 0x5e9   :  { %v3532_v16 = vpop.xlane.xlu1 %3531  ;;  %6767 = vmatmul.mubr.msk.f32.gmra.mrb[130].mxu1 %vm2434_vm2, %v3766_v57  ;;  %v3819_v2 = vmul.f32 %v7521_v58, %v10218_v51  ;;  %v7523_v8 = vpop.eup %7522 }
 0x5ea   :  { %v3367_v29 = vpop.xlane.xlu0 %3366  ;;  %v3768_v51 = vmul.f32 %v7523_v8, %v10209_v4 }
 0x5eb   :  { %7532 = vrcp.f32 %v3367_v29  ;;  %6863 = vmatprep.mubr.msk.f32.mxu0 %vm2434_vm2, %v3819_v2 }
 0x5ec   :  { %6864 = vmatmul.mubr.msk.f32.gmra.mrb[136].mxu0 %vm2434_vm2, %v3820_v7  ;;  %7534 = vrcp.f32 %v3532_v16 }
 0x5ed   :  { %v7525_v43 = vpop.eup %7524  ;;  %v3529_v25 = vpop.xlane.xlu1 %3528 }
 0x5ee   :  { %7536 = vrcp.f32 %v3529_v25  ;;  %v3376_v12 = vpop.xlane.xlu0 %3375  ;;  %v3767_v60 = vmul.f32 %v7525_v43, %v10215_v54  ;;  %v7527_v13 = vpop.eup %7526 }
 0x5ef   :  { %7538 = vrcp.f32 %v3376_v12  ;;  %v3822_v35 = vmul.f32 %v7527_v13, %v10230_v24  ;;  %v5366_v24 = vld [vmem:[%s11234_s10 + $0x8] sm:$0xff] }
 0x5f0   :  { %v7529_v44 = vpop.eup %7528  ;;  %6769 = vmatprep.mubr.msk.f32.mxu1 %vm2434_vm2, %v3767_v60 }
 0x5f1   :  { %v3538_v31 = vpop.xlane.xlu1 %3537  ;;  %6770 = vmatmul.mubr.msk.f32.gmra.mrb[132].mxu1 %vm2434_vm2, %v3768_v51  ;;  %v3821_v5 = vmul.f32 %v7529_v44, %v10247_v21  ;;  %v7531_v26 = vpop.eup %7530  ;;  %v5365_v21 = vld [vmem:[%s11234_s10] sm:$0xff] }
 0x5f2   :  { %v3373_v46 = vpop.xlane.xlu0 %3372  ;;  %v3770_v40 = vmul.f32 %v7531_v26, %v10243_v14  ;;  %v7035_v48 = vpack.c.bf16 %v5366_v24, %v5365_v21 }
 0x5f3   :  { %7540 = vrcp.f32 %v3373_v46  ;;  %6866 = vmatprep.mubr.msk.f32.mxu0 %vm2434_vm2, %v3821_v5 }
 0x5f4   :  { %6867 = vmatmul.mubr.msk.f32.gmra.mrb[138].mxu0 %vm2434_vm2, %v3822_v35  ;;  %7542 = vrcp.f32 %v3538_v31  ;;  %7036 = vmatprep.subr.bf16.mxu1 %v7035_v48 }
 0x5f5   :  { %v7533_v54 = vpop.eup %7532  ;;  %v3535_v4 = vpop.xlane.xlu1 %3534  ;;  %7038 = vmatpush3.bf16.msra.mxu1 %v7035_v48  ;;  %v11893_v48 = vld [vmem:[#allocation92_spill] sm:$0xff] }
 0x5f6   :  { %7544 = vrcp.f32 %v3535_v4  ;;  %v3382_v45 = vpop.xlane.xlu0 %3381  ;;  %v3769_v22 = vmul.f32 %v7533_v54, %v10250_v6  ;;  %v7535_v53 = vpop.eup %7534  ;;  %v11892_v4 = vld [vmem:[#allocation95_spill] sm:$0xff] }
 0x5f7   :  { %7546 = vrcp.f32 %v3382_v45  ;;  %v3824_v18 = vmul.f32 %v7535_v53, %v10260_v10 }
 0x5f8   :  { %v7537_v11 = vpop.eup %7536  ;;  %6772 = vmatprep.mubr.msk.f32.mxu1 %vm2434_vm2, %v3769_v22 }
 0x5f9   :  { %v3544_v9 = vpop.xlane.xlu1 %3543  ;;  %6773 = vmatmul.mubr.msk.f32.gmra.mrb[134].mxu1 %vm2434_vm2, %v3770_v40  ;;  %v3823_v6 = vmul.f32 %v7537_v11, %v10273_v50  ;;  %v7539_v1 = vpop.eup %7538 }
 0x5fa   :  { %v3379_v20 = vpop.xlane.xlu0 %3378  ;;  %v3772_v32 = vmul.f32 %v7539_v1, %v11891_v37  ;;  %v11895_v37 = vld [vmem:[#allocation7_spill] sm:$0xff] }
 0x5fb   :  { %7548 = vrcp.f32 %v3379_v20  ;;  %6869 = vmatprep.mubr.msk.f32.mxu0 %vm2434_vm2, %v3823_v6 }
 0x5fc   :  { %6870 = vmatmul.mubr.msk.f32.gmra.mrb[140].mxu0 %vm2434_vm2, %v3824_v18  ;;  %7550 = vrcp.f32 %v3544_v9 }
 0x5fd   :  { %v7541_v14 = vpop.eup %7540  ;;  %v3541_v63 = vpop.xlane.xlu1 %3540 }
 0x5fe   :  { %7552 = vrcp.f32 %v3541_v63  ;;  %v3388_v56 = vpop.xlane.xlu0 %3387  ;;  %v3771_v47 = vmul.f32 %v7541_v14, %v10292_v0  ;;  %v7543_v50 = vpop.eup %7542  ;;  %v11894_v14 = vld [vmem:[#allocation6_spill] sm:$0xff] }
 0x5ff   :  { %7554 = vrcp.f32 %v3388_v56  ;;  %v3826_v38 = vmul.f32 %v7543_v50, %v10280_v36 }
 0x600   :  { %v7545_v3 = vpop.eup %7544  ;;  %6775 = vmatprep.mubr.msk.f32.mxu1 %vm2434_vm2, %v3771_v47 }
 0x601   :  { %v3550_v10 = vpop.xlane.xlu1 %3549  ;;  %6776 = vmatmul.mubr.msk.f32.gmra.mrb[136].mxu1 %vm2434_vm2, %v3772_v32  ;;  %v3825_v61 = vmul.f32 %v7545_v3, %v10305_v55  ;;  %v7547_v57 = vpop.eup %7546 }
 0x602   :  { %v3385_v42 = vpop.xlane.xlu0 %3384  ;;  %v3774_v55 = vmul.f32 %v7547_v57, %v10311_v39 }
 0x603   :  { %7556 = vrcp.f32 %v3385_v42  ;;  %6872 = vmatprep.mubr.msk.f32.mxu0 %vm2434_vm2, %v3825_v61 }
 0x604   :  { %6873 = vmatmul.mubr.msk.f32.gmra.mrb[142].mxu0 %vm2434_vm2, %v3826_v38  ;;  %7558 = vrcp.f32 %v3550_v10 }
 0x605   :  { %v7549_v0 = vpop.eup %7548  ;;  %v3547_v58 = vpop.xlane.xlu1 %3546 }
 0x606   :  { %7560 = vrcp.f32 %v3547_v58  ;;  %v3394_v16 = vpop.xlane.xlu0 %3393  ;;  %v3773_v2 = vmul.f32 %v7549_v0, %v10334_v19  ;;  %v7551_v29 = vpop.eup %7550 }
 0x607   :  { %7562 = vrcp.f32 %v3394_v16  ;;  %v3828_v25 = vmul.f32 %v7551_v29, %v10329_v23 }
 0x608   :  { %v7553_v7 = vpop.eup %7552  ;;  %6778 = vmatprep.mubr.msk.f32.mxu1 %vm2434_vm2, %v3773_v2 }
 0x609   :  { %v3556_v36 = vpop.xlane.xlu1 %3555  ;;  %6779 = vmatmul.mubr.msk.f32.gmra.mrb[138].mxu1 %vm2434_vm2, %v3774_v55  ;;  %v3827_v8 = vmul.f32 %v7553_v7, %v10341_v15  ;;  %v7555_v19 = vpop.eup %7554 }
 0x60a   :  { %v3391_v43 = vpop.xlane.xlu0 %3390  ;;  %v6693_v12 = vpop.f32.mrb[80].mxu1  ;;  %v3776_v5 = vmul.f32 %v7555_v19, %v10355_v62 }
 0x60b   :  { %7564 = vrcp.f32 %v3391_v43  ;;  %6875 = vmatprep.mubr.msk.f32.mxu0 %vm2434_vm2, %v3827_v8  ;;  %v4101_v60 = vpop.f32.mrb[81].mxu1  ;;  %v4998_v63 = vmul.f32 %v6693_v12, %v11894_v14 }
 0x60c   :  { %6876 = vmatmul.mubr.msk.f32.gmra.mrb[144].mxu0 %vm2434_vm2, %v3828_v25  ;;  %7566 = vrcp.f32 %v3556_v36  ;;  %v4997_v56 = vmul.f32 %v4101_v60, %v11894_v14 }
 0x60d   :  { %v7557_v39 = vpop.eup %7556  ;;  %v3553_v13 = vpop.xlane.xlu1 %3552  ;;  %v5140_v42 = vsel %vm113_vm0, %v4998_v63, 0.0 }
 0x60e   :  { %7568 = vrcp.f32 %v3553_v13  ;;  %v3565_v51 = vpop.xlane.xlu0 %3564  ;;  %v3775_v44 = vmul.f32 %v7557_v39, %v10372_v33  ;;  %v7559_v15 = vpop.eup %7558  ;;  %v5125_v58 = vsel %vm113_vm0, %v4997_v56, 0.0 }
 0x60f   :  { %v6696_v31 = vpop.f32.mrb[82].mxu1  ;;  %v3830_v45 = vmul.f32 %v7559_v15, %v11892_v4 }
 0x610   :  { %v7561_v23 = vpop.eup %7560  ;;  %v4111_v46 = vpop.f32.mrb[83].mxu1  ;;  %6781 = vmatprep.mubr.msk.f32.mxu1 %vm2434_vm2, %v3775_v44 }
 0x611   :  { %v3559_v35 = vpop.xlane.xlu1 %3558  ;;  %6782 = vmatmul.mubr.msk.f32.gmra.mrb[140].mxu1 %vm2434_vm2, %v3776_v5  ;;  %v3829_v26 = vmul.f32 %v7561_v23, %v10375_v34  ;;  %v7563_v33 = vpop.eup %7562  ;;  %v4999_v16 = vmul.f32 %v4111_v46, %v11894_v14 }
 0x612   :  { %7570 = vrcp.f32 %v3559_v35  ;;  %v3571_v54 = vpop.xlane.xlu0 %3570  ;;  %v10617_v22 = vpop.f32.mrb[84].mxu1  ;;  %v3778_v11 = vmul.f32 %v7563_v33, %v11893_v48 }
 0x613   :  { %6878 = vmatprep.mubr.msk.f32.mxu0 %vm2434_vm2, %v3829_v26  ;;  %v10620_v21 = vpop.f32.mrb[85].mxu1  ;;  %7572 = vrcp.f32 %v3565_v51  ;;  %v5155_v15 = vsel %vm113_vm0, %v4999_v16, 0.0 }
 0x614   :  { %6879 = vmatmul.mubr.msk.f32.gmra.mrb[146].mxu0 %vm2434_vm2, %v3830_v45  ;;  %v5001_v46 = vmul.f32 %v10620_v21, %v11894_v14 }
 0x615   :  { %v7565_v62 = vpop.eup %7564  ;;  %v3562_v24 = vpop.xlane.xlu1 %3561 }
 0x616   :  { %7574 = vrcp.f32 %v3562_v24  ;;  %v3777_v53 = vmul.f32 %v7565_v62, %v10390_v41  ;;  %v7567_v34 = vpop.eup %7566  ;;  %v10624_v40 = vpop.f32.mrb[86].mxu1  ;;  %v5185_v48 = vsel %vm113_vm0, %v5001_v46, 0.0 }
 0x617   :  { %v3577_v6 = vpop.xlane.xlu0 %3576  ;;  %v10627_v20 = vpop.f32.mrb[87].mxu1  ;;  %7576 = vrcp.f32 %v3571_v54  ;;  %v3832_v41 = vmul.f32 %v7567_v34, %v10383_v52  ;;  %v5000_v52 = vmul.f32 %v6696_v31, %v11894_v14  ;;  %v5002_v31 = vmul.f32 %v10617_v22, %v11894_v14 }
 0x618   :  { %v7569_v9 = vpop.eup %7568  ;;  %6784 = vmatprep.mubr.msk.f32.mxu1 %vm2434_vm2, %v3777_v53  ;;  %v5004_v56 = vmul.f32 %v10624_v40, %v11894_v14 }
 0x619   :  { %v3568_v18 = vpop.xlane.xlu1 %3567  ;;  %6785 = vmatmul.mubr.msk.f32.gmra.mrb[142].mxu1 %vm2434_vm2, %v3778_v11  ;;  %v3831_v1 = vmul.f32 %v7569_v9, %v10392_v28  ;;  %v5170_v39 = vsel %vm113_vm0, %v5000_v52, 0.0  ;;  %v5200_v24 = vsel %vm113_vm0, %v5002_v31, 0.0  ;;  %v11899_v52 = vld [vmem:[#allocation99_spill] sm:$0xff] }
 0x61a   :  { %7578 = vrcp.f32 %v3568_v18  ;;  %v6705_v47 = vpop.f32.mrb[88].mxu1  ;;  %v5230_v40 = vsel %vm113_vm0, %v5004_v56, 0.0 }
 0x61b   :  { %6881 = vmatprep.mubr.msk.f32.mxu0 %vm2434_vm2, %v3831_v1  ;;  %v5006_v32 = vmul.f32 %v6705_v47, %v11895_v37  ;;  %v4141_v3 = vpop.f32.mrb[89].mxu1  ;;  %7580 = vrcp.f32 %v3577_v6  ;;  %v3583_v57 = vpop.xlane.xlu0 %3582  ;;  %v11896_v6 = vld [vmem:[#allocation96_spill] sm:$0xff]  ;;  %v11897_v1 = vld [vmem:[#allocation94_spill] sm:$0xff] }
 0x61c   :  { %v7571_v50 = vpop.eup %7570  ;;  %6882 = vmatmul.mubr.msk.f32.gmra.mrb[148].mxu0 %vm2434_vm2, %v3832_v41  ;;  %v5005_v10 = vmul.f32 %v4141_v3, %v11895_v37 }
 0x61d   :  { %v3574_v28 = vpop.xlane.xlu1 %3573  ;;  %v3833_v61 = vmul.f32 %v7571_v50, %v10423_v27  ;;  %v5141_v38 = vsel %vm113_vm0, %v5006_v32, 0.0  ;;  %v7573_v0 = vpop.eup %7572  ;;  %v5003_v50 = vmul.f32 %v10627_v20, %v11894_v14 }
 0x61e   :  { %7582 = vrcp.f32 %v3574_v28  ;;  %v10645_v2 = vadd.f32 %v5141_v38, %v5140_v42  ;;  %v5126_v29 = vsel %vm113_vm0, %v5005_v10, 0.0  ;;  %v6708_v55 = vpop.f32.mrb[90].mxu1  ;;  %v3835_v51 = vmul.f32 %v7573_v0, %v10404_v59  ;;  %v11898_v28 = vld [vmem:[#allocation97_spill] sm:$0xff] }
 0x61f   :  { %6884 = vmatprep.mubr.msk.f32.mxu0 %vm2434_vm2, %v3833_v61  ;;  %v10649_v7 = vadd.f32 %v5126_v29, %v5125_v58  ;;  %v5008_v36 = vmul.f32 %v6708_v55, %v11895_v37  ;;  %v4151_v8 = vpop.f32.mrb[91].mxu1  ;;  %v10652_v43 = vpop.f32.mrb[96].mxu0  ;;  %7584 = vrcp.f32 %v3583_v57  ;;  %v5215_v58 = vsel %vm113_vm0, %v5003_v50, 0.0 }
 0x620   :  { %v7575_v27 = vpop.eup %7574  ;;  %v5007_v25 = vmul.f32 %v4151_v8, %v11895_v37  ;;  %v10655_v12 = vpop.f32.mrb[97].mxu0 }
 0x621   :  { %v3580_v19 = vpop.xlane.xlu1 %3579  ;;  %v3834_v60 = vmul.f32 %v7575_v27, %v10414_v30  ;;  %v5171_v13 = vsel %vm113_vm0, %v5008_v36, 0.0  ;;  %v7577_v44 = vpop.eup %7576  ;;  %v11900_v36 = vld [vmem:[#allocation103_spill] sm:$0xff] }
 0x622   :  { %7586 = vrcp.f32 %v3580_v19  ;;  %v10664_v5 = vadd.f32 %v5171_v13, %v5170_v39  ;;  %v5156_v23 = vsel %vm113_vm0, %v5007_v25, 0.0  ;;  %v3837_v33 = vmul.f32 %v7577_v44, %v10420_v49  ;;  %v5367_v19 = vld [vmem:[%s11234_s10 + $0x10] sm:$0xff] }
 0x623   :  { %6885 = vmatmul.mubr.msk.f32.gmra.mrb[150].mxu0 %vm2434_vm2, %v3834_v60  ;;  %v10670_v35 = vadd.f32 %v5156_v23, %v5155_v15  ;;  %v5368_v60 = vld [vmem:[%s11234_s10 + $0x18] sm:$0xff]  ;;  %v11901_v39 = vld [vmem:[#allocation8_spill] sm:$0xff] }
 0x624   :  { %v7579_v30 = vpop.eup %7578  ;;  %v6711_v26 = vpop.f32.mrb[92].mxu1  ;;  %6887 = vmatprep.mubr.msk.f32.mxu0 %vm2434_vm2, %v3835_v51  ;;  %v7039_v44 = vpack.c.bf16 %v5368_v60, %v5367_v19 }
 0x625   :  { %v5010_v59 = vmul.f32 %v6711_v26, %v11895_v37  ;;  %v3586_v54 = vpop.xlane.xlu1 %3585  ;;  %v4161_v4 = vpop.f32.mrb[93].mxu1  ;;  %v3836_v45 = vmul.f32 %v7579_v30, %v10444_v17 }
 0x626   :  { %7588 = vrcp.f32 %v3586_v54  ;;  %v5009_v22 = vmul.f32 %v4161_v4, %v11895_v37  ;;  %v7581_v62 = vpop.eup %7580  ;;  %7040 = vmatprep.subr.bf16.mxu1 %v7039_v44 }
 0x627   :  { %v5201_v21 = vsel %vm113_vm0, %v5010_v59, 0.0  ;;  %v10679_v53 = vpop.f32.mrb[98].mxu0  ;;  %6888 = vmatmul.mubr.msk.f32.gmra.mrb[152].mxu0 %vm2434_vm2, %v3836_v45  ;;  %v3839_v63 = vmul.f32 %v7581_v62, %v11897_v1  ;;  %7042 = vmatpush3.bf16.msra.mxu1 %v7039_v44 }
 0x628   :  { %v7583_v34 = vpop.eup %7582  ;;  %v10683_v11 = vadd.f32 %v5201_v21, %v5200_v24  ;;  %v5186_v17 = vsel %vm113_vm0, %v5009_v22, 0.0  ;;  %v10686_v9 = vpop.f32.mrb[99].mxu0  ;;  %6890 = vmatprep.mubr.msk.f32.mxu0 %vm2434_vm2, %v3837_v33 }
 0x629   :  { %v10689_v49 = vadd.f32 %v5186_v17, %v5185_v48  ;;  %v3838_v18 = vmul.f32 %v7583_v34, %v11896_v6  ;;  %v7585_v41 = vpop.eup %7584  ;;  %v5062_v48 = vmul.f32 %v10652_v43, %v11894_v14  ;;  %v5061_v6 = vmul.f32 %v10655_v12, %v11894_v14 }
 0x62a   :  { %v3841_v38 = vmul.f32 %v7585_v41, %v11899_v52 }
 0x62b   :  { %6891 = vmatmul.mubr.msk.f32.gmra.mrb[154].mxu0 %vm2434_vm2, %v3838_v18  ;;  %v5245_v50 = vsel %vm113_vm0, %v5061_v6, 0.0 }
 0x62c   :  { %v7587_v47 = vpop.eup %7586  ;;  %v6714_v32 = vpop.f32.mrb[94].mxu1  ;;  %6893 = vmatprep.mubr.msk.f32.mxu0 %vm2434_vm2, %v3839_v63 }
 0x62d   :  { %v5012_v3 = vmul.f32 %v6714_v32, %v11895_v37  ;;  %v4171_v10 = vpop.f32.mrb[95].mxu1  ;;  %v3840_v61 = vmul.f32 %v7587_v47, %v11898_v28  ;;  %v5260_v47 = vsel %vm113_vm0, %v5062_v48, 0.0 }
 0x62e   :  { %v5011_v42 = vmul.f32 %v4171_v10, %v11895_v37 }
 0x62f   :  { %v5231_v57 = vsel %vm113_vm0, %v5012_v3, 0.0  ;;  %v10705_v0 = vpop.f32.mrb[100].mxu0  ;;  %6894 = vmatmul.mubr.msk.f32.gmra.mrb[156].mxu0 %vm2434_vm2, %v3840_v61 }
 0x630   :  { %v7589_v20 = vpop.eup %7588  ;;  %v5232_v16 = vadd.f32 %v5231_v57, %v5230_v40  ;;  %v5216_v29 = vsel %vm113_vm0, %v5011_v42, 0.0  ;;  %v10710_v55 = vpop.f32.mrb[101].mxu0  ;;  %6896 = vmatprep.mubr.msk.f32.mxu0 %vm2434_vm2, %v3841_v38  ;;  %v5064_v57 = vmul.f32 %v10679_v53, %v11894_v14 }
 0x631   :  { %v5217_v27 = vadd.f32 %v5216_v29, %v5215_v58  ;;  %v3842_v8 = vmul.f32 %v7589_v20, %v11900_v36  ;;  %v5063_v20 = vmul.f32 %v10686_v9, %v11894_v14  ;;  %v11902_v9 = vld [vmem:[#allocation9_spill] sm:$0xff] }
 0x633   :  { %6897 = vmatmul.mubr.msk.f32.gmra.mrb[158].mxu0 %vm2434_vm2, %v3842_v8  ;;  %v5275_v19 = vsel %vm113_vm0, %v5063_v20, 0.0 }
 0x634   :  { %v6717_v25 = vpop.f32.mrb[96].mxu1 }
 0x635   :  { %v5014_v13 = vmul.f32 %v6717_v25, %v11901_v39  ;;  %v4181_v51 = vpop.f32.mrb[97].mxu1  ;;  %v5290_v25 = vsel %vm113_vm0, %v5064_v57, 0.0 }
 0x636   :  { %v5013_v15 = vmul.f32 %v4181_v51, %v11901_v39 }
 0x637   :  { %v5143_v31 = vsel %vm113_vm0, %v5014_v13, 0.0  ;;  %v10724_v23 = vpop.f32.mrb[102].mxu0 }
 0x638   :  { %v5144_v30 = vadd.f32 %v5143_v31, %v10645_v2  ;;  %v5128_v46 = vsel %vm113_vm0, %v5013_v15, 0.0  ;;  %v10728_v26 = vpop.f32.mrb[103].mxu0  ;;  %v5066_v15 = vmul.f32 %v10705_v0, %v11894_v14 }
 0x639   :  { %v5129_v59 = vadd.f32 %v5128_v46, %v10649_v7  ;;  %v5065_v46 = vmul.f32 %v10710_v55, %v11894_v14 }
 0x63a   :  { %v5320_v0 = vsel %vm113_vm0, %v5066_v15, 0.0 }
 0x63b   :  { %v5305_v55 = vsel %vm113_vm0, %v5065_v46, 0.0 }
 0x63c   :  { %v6720_v54 = vpop.f32.mrb[98].mxu1 }
 0x63d   :  { %v5016_v4 = vmul.f32 %v6720_v54, %v11901_v39  ;;  %v4191_v45 = vpop.f32.mrb[99].mxu1 }
 0x63e   :  { %v5015_v22 = vmul.f32 %v4191_v45, %v11901_v39 }
 0x63f   :  { %v5173_v33 = vsel %vm113_vm0, %v5016_v4, 0.0 }
 0x640   :  { %v10735_v62 = vadd.f32 %v5173_v33, %v10664_v5  ;;  %v5158_v2 = vsel %vm113_vm0, %v5015_v22, 0.0  ;;  %v6723_v24 = vpop.f32.mrb[100].mxu1 }
 0x641   :  { %v10739_v21 = vadd.f32 %v5158_v2, %v10670_v35  ;;  %v5018_v34 = vmul.f32 %v6723_v24, %v11901_v39  ;;  %v4201_v7 = vpop.f32.mrb[101].mxu1 }
 0x642   :  { %v5017_v17 = vmul.f32 %v4201_v7, %v11901_v39 }
 0x643   :  { %v5203_v5 = vsel %vm113_vm0, %v5018_v34, 0.0  ;;  %v6817_v18 = vpop.f32.mrb[104].mxu0 }
 0x644   :  { %v10749_v1 = vadd.f32 %v5203_v5, %v10683_v11  ;;  %v5188_v35 = vsel %vm113_vm0, %v5017_v17, 0.0  ;;  %v5070_v63 = vmul.f32 %v6817_v18, %v11895_v37  ;;  %v4718_v41 = vpop.f32.mrb[105].mxu0 }
 0x645   :  { %v10754_v56 = vadd.f32 %v5188_v35, %v10689_v49  ;;  %v5069_v43 = vmul.f32 %v4718_v41, %v11895_v37 }
 0x646   :  { %v5261_v12 = vsel %vm113_vm0, %v5070_v63, 0.0  ;;  %v5067_v63 = vmul.f32 %v10728_v26, %v11894_v14 }
 0x647   :  { %v10760_v32 = vadd.f32 %v5261_v12, %v5260_v47  ;;  %v5246_v11 = vsel %vm113_vm0, %v5069_v43, 0.0  ;;  %v6726_v3 = vpop.f32.mrb[102].mxu1 }
 0x648   :  { %v10763_v10 = vadd.f32 %v5246_v11, %v5245_v50  ;;  %v5020_v28 = vmul.f32 %v6726_v3, %v11901_v39  ;;  %v4211_v61 = vpop.f32.mrb[103].mxu1 }
 0x649   :  { %v5019_v49 = vmul.f32 %v4211_v61, %v11901_v39 }
 0x64a   :  { %v5233_v42 = vsel %vm113_vm0, %v5020_v28, 0.0 }
 0x64b   :  { %v10768_v52 = vadd.f32 %v5233_v42, %v5232_v16  ;;  %v5218_v38 = vsel %vm113_vm0, %v5019_v49, 0.0  ;;  %v5335_v42 = vsel %vm113_vm0, %v5067_v63, 0.0 }
 0x64c   :  { %v10771_v40 = vadd.f32 %v5218_v38, %v5217_v27 }
 0x64f   :  { %v6820_v58 = vpop.f32.mrb[106].mxu0 }
 0x650   :  { %v5072_v29 = vmul.f32 %v6820_v58, %v11895_v37  ;;  %v4728_v36 = vpop.f32.mrb[107].mxu0 }
 0x651   :  { %v5071_v8 = vmul.f32 %v4728_v36, %v11895_v37 }
 0x652   :  { %v5291_v16 = vsel %vm113_vm0, %v5072_v29, 0.0 }
 0x653   :  { %v10782_v27 = vadd.f32 %v5291_v16, %v5290_v25  ;;  %v5276_v60 = vsel %vm113_vm0, %v5071_v8, 0.0  ;;  %v6729_v53 = vpop.f32.mrb[104].mxu1 }
 0x654   :  { %v10785_v13 = vadd.f32 %v5276_v60, %v5275_v19  ;;  %v5022_v51 = vmul.f32 %v6729_v53, %v11902_v9  ;;  %v4221_v44 = vpop.f32.mrb[105].mxu1 }
 0x655   :  { %v5021_v31 = vmul.f32 %v4221_v44, %v11902_v9 }
 0x656   :  { %v5145_v54 = vsel %vm113_vm0, %v5022_v51, 0.0  ;;  %v6823_v4 = vpop.f32.mrb[108].mxu0 }
 0x657   :  { %v10794_v45 = vadd.f32 %v5145_v54, %v5144_v30  ;;  %v5130_v22 = vsel %vm113_vm0, %v5021_v31, 0.0  ;;  %v5074_v33 = vmul.f32 %v6823_v4, %v11895_v37  ;;  %v4738_v2 = vpop.f32.mrb[109].mxu0 }
 0x658   :  { %v10798_v24 = vadd.f32 %v5130_v22, %v5129_v59  ;;  %v5073_v34 = vmul.f32 %v4738_v2, %v11895_v37  ;;  %v5068_v59 = vmul.f32 %v10724_v23, %v11894_v14 }
 0x659   :  { %v5321_v7 = vsel %vm113_vm0, %v5074_v33, 0.0 }
 0x65a   :  { %v10804_v48 = vadd.f32 %v5321_v7, %v5320_v0  ;;  %v5306_v30 = vsel %vm113_vm0, %v5073_v34, 0.0  ;;  %v5350_v26 = vsel %vm113_vm0, %v5068_v59, 0.0 }
 0x65b   :  { %v10807_v17 = vadd.f32 %v5306_v30, %v5305_v55  ;;  %v6732_v6 = vpop.f32.mrb[106].mxu1  ;;  %v11903_v30 = vld [vmem:[#allocation2_spill] sm:$0xff] }
 0x65c   :  { %v5024_v5 = vmul.f32 %v6732_v6, %v11902_v9  ;;  %v4231_v18 = vpop.f32.mrb[107].mxu1 }
 0x65d   :  { %v5023_v35 = vmul.f32 %v4231_v18, %v11902_v9 }
 0x65e   :  { %v5175_v41 = vsel %vm113_vm0, %v5024_v5, 0.0  ;;  %v6826_v43 = vpop.f32.mrb[110].mxu0 }
 0x65f   :  { %v10817_v47 = vadd.f32 %v5175_v41, %v10735_v62  ;;  %v5160_v12 = vsel %vm113_vm0, %v5023_v35, 0.0  ;;  %v5076_v50 = vmul.f32 %v6826_v43, %v11895_v37  ;;  %v6735_v11 = vpop.f32.mrb[108].mxu1  ;;  %v4748_v3 = vpop.f32.mrb[111].mxu0 }
 0x660   :  { %v10822_v28 = vadd.f32 %v5160_v12, %v10739_v21  ;;  %v5026_v23 = vmul.f32 %v6735_v11, %v11902_v9  ;;  %v5075_v61 = vmul.f32 %v4748_v3, %v11895_v37  ;;  %v4241_v14 = vpop.f32.mrb[109].mxu1 }
 0x661   :  { %v5351_v49 = vsel %vm113_vm0, %v5076_v50, 0.0  ;;  %v5025_v62 = vmul.f32 %v4241_v14, %v11902_v9 }
 0x662   :  { %v5352_v38 = vadd.f32 %v5351_v49, %v5350_v26  ;;  %v5205_v57 = vsel %vm113_vm0, %v5026_v23, 0.0  ;;  %v5336_v20 = vsel %vm113_vm0, %v5075_v61, 0.0 }
 0x663   :  { %v10833_v21 = vadd.f32 %v5205_v57, %v10749_v1  ;;  %v5337_v58 = vadd.f32 %v5336_v20, %v5335_v42  ;;  %v5190_v37 = vsel %vm113_vm0, %v5025_v62, 0.0 }
 0x664   :  { %v10837_v29 = vadd.f32 %v5190_v37, %v10754_v56  ;;  %v6829_v36 = vpop.f32.mrb[112].mxu0 }
 0x665   :  { %v5078_v8 = vmul.f32 %v6829_v36, %v11901_v39  ;;  %v4758_v25 = vpop.f32.mrb[113].mxu0 }
 0x666   :  { %v5077_v16 = vmul.f32 %v4758_v25, %v11901_v39 }
 0x667   :  { %v5263_v19 = vsel %vm113_vm0, %v5078_v8, 0.0 }
 0x668   :  { %v5264_v60 = vadd.f32 %v5263_v19, %v10760_v32  ;;  %v5248_v53 = vsel %vm113_vm0, %v5077_v16, 0.0  ;;  %v6738_v1 = vpop.f32.mrb[110].mxu1 }
 0x669   :  { %v5249_v51 = vadd.f32 %v5248_v53, %v10763_v10  ;;  %v5028_v44 = vmul.f32 %v6738_v1, %v11902_v9  ;;  %v4251_v15 = vpop.f32.mrb[111].mxu1 }
 0x66a   :  { %v5027_v56 = vmul.f32 %v4251_v15, %v11902_v9 }
 0x66b   :  { %v5235_v31 = vsel %vm113_vm0, %v5028_v44, 0.0 }
 0x66c   :  { %v10849_v46 = vadd.f32 %v5235_v31, %v10768_v52  ;;  %v5220_v54 = vsel %vm113_vm0, %v5027_v56, 0.0 }
 0x66d   :  { %v10853_v4 = vadd.f32 %v5220_v54, %v10771_v40 }
 0x670   :  { %v6832_v32 = vpop.f32.mrb[114].mxu0 }
 0x671   :  { %v5080_v22 = vmul.f32 %v6832_v32, %v11901_v39  ;;  %v4768_v33 = vpop.f32.mrb[115].mxu0 }
 0x672   :  { %v5079_v10 = vmul.f32 %v4768_v33, %v11901_v39 }
 0x673   :  { %v5293_v2 = vsel %vm113_vm0, %v5080_v22, 0.0 }
 0x674   :  { %v5294_v34 = vadd.f32 %v5293_v2, %v10782_v27  ;;  %v5278_v0 = vsel %vm113_vm0, %v5079_v10, 0.0  ;;  %v6741_v7 = vpop.f32.mrb[112].mxu1  ;;  %v6835_v52 = vpop.f32.mrb[116].mxu0 }
 0x675   :  { %v5279_v55 = vadd.f32 %v5278_v0, %v10785_v13  ;;  %v5030_v6 = vmul.f32 %v6741_v7, %v11903_v30  ;;  %v5082_v40 = vmul.f32 %v6835_v52, %v11901_v39  ;;  %v4261_v5 = vpop.f32.mrb[113].mxu1  ;;  %v4778_v18 = vpop.f32.mrb[117].mxu0 }
 0x676   :  { %v5029_v59 = vmul.f32 %v4261_v5, %v11903_v30  ;;  %v5081_v35 = vmul.f32 %v4778_v18, %v11901_v39 }
 0x677   :  { %v5147_v63 = vsel %vm113_vm0, %v5030_v6, 0.0  ;;  %v5323_v27 = vsel %vm113_vm0, %v5082_v40, 0.0 }
 0x678   :  { %v10868_v41 = vadd.f32 %v5147_v63, %v10794_v45  ;;  %v5324_v43 = vadd.f32 %v5323_v27, %v10804_v48  ;;  %v5132_v13 = vsel %vm113_vm0, %v5029_v59, 0.0  ;;  %v5308_v12 = vsel %vm113_vm0, %v5081_v35, 0.0  ;;  %v6838_v50 = vpop.f32.mrb[118].mxu0 }
 0x679   :  { %v10874_v11 = vadd.f32 %v5132_v13, %v10798_v24  ;;  %v5309_v3 = vadd.f32 %v5308_v12, %v10807_v17  ;;  %v5084_v23 = vmul.f32 %v6838_v50, %v11901_v39  ;;  %v4788_v61 = vpop.f32.mrb[119].mxu0  ;;  %v11904_v50 = vld [vmem:[#allocation3_spill] sm:$0xff] }
 0x67a   :  { %v5083_v14 = vmul.f32 %v4788_v61, %v11901_v39 }
 0x67b   :  { %v5353_v45 = vsel %vm113_vm0, %v5084_v23, 0.0 }
 0x67c   :  { %v10880_v26 = vadd.f32 %v5353_v45, %v5352_v38  ;;  %v5338_v48 = vsel %vm113_vm0, %v5083_v14, 0.0  ;;  %v6744_v49 = vpop.f32.mrb[114].mxu1 }
 0x67d   :  { %v10883_v62 = vadd.f32 %v5338_v48, %v5337_v58  ;;  %v5032_v42 = vmul.f32 %v6744_v49, %v11903_v30  ;;  %v4271_v24 = vpop.f32.mrb[115].mxu1 }
 0x67e   :  { %v5031_v57 = vmul.f32 %v4271_v24, %v11903_v30 }
 0x67f   :  { %v5177_v17 = vsel %vm113_vm0, %v5032_v42, 0.0  ;;  %v6841_v20 = vpop.f32.mrb[120].mxu0 }
 0x680   :  { %v10889_v37 = vadd.f32 %v5177_v17, %v10817_v47  ;;  %v5162_v39 = vsel %vm113_vm0, %v5031_v57, 0.0  ;;  %v5086_v38 = vmul.f32 %v6841_v20, %v11902_v9  ;;  %v4798_v36 = vpop.f32.mrb[121].mxu0 }
 0x681   :  { %v10894_v8 = vadd.f32 %v5162_v39, %v10822_v28  ;;  %v5085_v58 = vmul.f32 %v4798_v36, %v11902_v9 }
 0x682   :  { %v5265_v25 = vsel %vm113_vm0, %v5086_v38, 0.0 }
 0x683   :  { %v10898_v16 = vadd.f32 %v5265_v25, %v5264_v60  ;;  %v5250_v19 = vsel %vm113_vm0, %v5085_v58, 0.0 }
 0x684   :  { %v10901_v53 = vadd.f32 %v5250_v19, %v5249_v51  ;;  %v6747_v47 = vpop.f32.mrb[116].mxu1 }
 0x685   :  { %v5034_v1 = vmul.f32 %v6747_v47, %v11903_v30  ;;  %v4281_v44 = vpop.f32.mrb[117].mxu1 }
 0x686   :  { %v5033_v15 = vmul.f32 %v4281_v44, %v11903_v30 }
 0x687   :  { %v5207_v56 = vsel %vm113_vm0, %v5034_v1, 0.0  ;;  %v6844_v28 = vpop.f32.mrb[122].mxu0 }
 0x688   :  { %v10907_v31 = vadd.f32 %v5207_v56, %v10833_v21  ;;  %v5192_v54 = vsel %vm113_vm0, %v5033_v15, 0.0  ;;  %v5088_v60 = vmul.f32 %v6844_v28, %v11902_v9  ;;  %v4808_v32 = vpop.f32.mrb[123].mxu0 }
 0x689   :  { %v10912_v51 = vadd.f32 %v5192_v54, %v10837_v29  ;;  %v5087_v22 = vmul.f32 %v4808_v32, %v11902_v9 }
 0x68a   :  { %v5295_v33 = vsel %vm113_vm0, %v5088_v60, 0.0 }
 0x68b   :  { %v10916_v10 = vadd.f32 %v5295_v33, %v5294_v34  ;;  %v5280_v2 = vsel %vm113_vm0, %v5087_v22, 0.0 }
 0x68c   :  { %v10919_v0 = vadd.f32 %v5280_v2, %v5279_v55  ;;  %v6750_v21 = vpop.f32.mrb[118].mxu1 }
 0x68d   :  { %v5036_v7 = vmul.f32 %v6750_v21, %v11903_v30  ;;  %v4291_v52 = vpop.f32.mrb[119].mxu1 }
 0x68e   :  { %v5035_v6 = vmul.f32 %v4291_v52, %v11903_v30 }
 0x68f   :  { %v5237_v40 = vsel %vm113_vm0, %v5036_v7, 0.0  ;;  %v6847_v29 = vpop.f32.mrb[124].mxu0 }
 0x690   :  { %v10925_v5 = vadd.f32 %v5237_v40, %v10849_v46  ;;  %v5222_v18 = vsel %vm113_vm0, %v5035_v6, 0.0  ;;  %v5090_v34 = vmul.f32 %v6847_v29, %v11902_v9  ;;  %v4818_v59 = vpop.f32.mrb[125].mxu0 }
 0x691   :  { %v10930_v55 = vadd.f32 %v5222_v18, %v10853_v4  ;;  %v5089_v35 = vmul.f32 %v4818_v59, %v11902_v9 }
 0x692   :  { %v5325_v63 = vsel %vm113_vm0, %v5090_v34, 0.0 }
 0x693   :  { %v10934_v27 = vadd.f32 %v5325_v63, %v5324_v43  ;;  %v5310_v13 = vsel %vm113_vm0, %v5089_v35, 0.0 }
 0x694   :  { %v10937_v12 = vadd.f32 %v5310_v13, %v5309_v3  ;;  %v6753_v46 = vpop.f32.mrb[120].mxu1 }
 0x695   :  { %v5038_v23 = vmul.f32 %v6753_v46, %v11904_v50  ;;  %v4301_v61 = vpop.f32.mrb[121].mxu1 }
 0x696   :  { %v5037_v14 = vmul.f32 %v4301_v61, %v11904_v50 }
 0x697   :  { %v5149_v45 = vsel %vm113_vm0, %v5038_v23, 0.0  ;;  %v6850_v4 = vpop.f32.mrb[126].mxu0 }
 0x698   :  { %v10943_v48 = vadd.f32 %v5149_v45, %v10868_v41  ;;  %v5134_v49 = vsel %vm113_vm0, %v5037_v14, 0.0  ;;  %v5092_v43 = vmul.f32 %v6850_v4, %v11902_v9  ;;  %v4828_v42 = vpop.f32.mrb[127].mxu0 }
 0x699   :  { %v10948_v3 = vadd.f32 %v5134_v49, %v10874_v11  ;;  %v5091_v24 = vmul.f32 %v4828_v42, %v11902_v9  ;;  %v11905_v49 = vld [vmem:[#allocation4_spill] sm:$0xff] }
 0x69a   :  { %v5355_v57 = vsel %vm113_vm0, %v5092_v43, 0.0 }
 0x69b   :  { %v10953_v17 = vadd.f32 %v5355_v57, %v10880_v26  ;;  %v5340_v20 = vsel %vm113_vm0, %v5091_v24, 0.0 }
 0x69c   :  { %v10957_v41 = vadd.f32 %v5340_v20, %v10883_v62  ;;  %v6756_v39 = vpop.f32.mrb[122].mxu1 }
 0x69d   :  { %v5040_v38 = vmul.f32 %v6756_v39, %v11904_v50  ;;  %v4311_v36 = vpop.f32.mrb[123].mxu1 }
 0x69e   :  { %v5039_v58 = vmul.f32 %v4311_v36, %v11904_v50 }
 0x69f   :  { %v5179_v11 = vsel %vm113_vm0, %v5040_v38, 0.0  ;;  %v6853_v25 = vpop.f32.mrb[128].mxu0 }
 0x6a0   :  { %v10963_v9 = vadd.f32 %v5179_v11, %v10889_v37  ;;  %v5164_v26 = vsel %vm113_vm0, %v5039_v58, 0.0  ;;  %v5094_v19 = vmul.f32 %v6853_v25, %v11903_v30  ;;  %v4838_v47 = vpop.f32.mrb[129].mxu0 }
 0x6a1   :  { %v10968_v62 = vadd.f32 %v5164_v26, %v10894_v8  ;;  %v5093_v1 = vmul.f32 %v4838_v47, %v11903_v30 }
 0x6a2   :  { %v5267_v44 = vsel %vm113_vm0, %v5094_v19, 0.0 }
 0x6a3   :  { %v10973_v15 = vadd.f32 %v5267_v44, %v10898_v16  ;;  %v5252_v56 = vsel %vm113_vm0, %v5093_v1, 0.0 }
 0x6a4   :  { %v10977_v37 = vadd.f32 %v5252_v56, %v10901_v53  ;;  %v6759_v28 = vpop.f32.mrb[124].mxu1 }
 0x6a5   :  { %v5042_v54 = vmul.f32 %v6759_v28, %v11904_v50  ;;  %v4321_v60 = vpop.f32.mrb[125].mxu1 }
 0x6a6   :  { %v5041_v32 = vmul.f32 %v4321_v60, %v11904_v50 }
 0x6a7   :  { %v5209_v8 = vsel %vm113_vm0, %v5042_v54, 0.0  ;;  %v6856_v22 = vpop.f32.mrb[130].mxu0 }
 0x6a8   :  { %v10983_v33 = vadd.f32 %v5209_v8, %v10907_v31  ;;  %v5194_v16 = vsel %vm113_vm0, %v5041_v32, 0.0  ;;  %v5096_v2 = vmul.f32 %v6856_v22, %v11903_v30  ;;  %v4848_v21 = vpop.f32.mrb[131].mxu0 }
 0x6a9   :  { %v10988_v53 = vadd.f32 %v5194_v16, %v10912_v51  ;;  %v5095_v7 = vmul.f32 %v4848_v21, %v11903_v30 }
 0x6aa   :  { %v5297_v52 = vsel %vm113_vm0, %v5096_v2, 0.0 }
 0x6ab   :  { %v10993_v6 = vadd.f32 %v5297_v52, %v10916_v10  ;;  %v5282_v40 = vsel %vm113_vm0, %v5095_v7, 0.0 }
 0x6ac   :  { %v10997_v31 = vadd.f32 %v5282_v40, %v10919_v0  ;;  %v6762_v29 = vpop.f32.mrb[126].mxu1 }
 0x6ad   :  { %v5044_v18 = vmul.f32 %v6762_v29, %v11904_v50  ;;  %v4331_v34 = vpop.f32.mrb[127].mxu1 }
 0x6ae   :  { %v5043_v59 = vmul.f32 %v4331_v34, %v11904_v50 }
 0x6af   :  { %v5239_v51 = vsel %vm113_vm0, %v5044_v18, 0.0  ;;  %v6859_v35 = vpop.f32.mrb[132].mxu0 }
 0x6b0   :  { %v11003_v63 = vadd.f32 %v5239_v51, %v10925_v5  ;;  %v5224_v10 = vsel %vm113_vm0, %v5043_v59, 0.0  ;;  %v5098_v13 = vmul.f32 %v6859_v35, %v11903_v30  ;;  %v4858_v46 = vpop.f32.mrb[133].mxu0 }
 0x6b1   :  { %v11008_v0 = vadd.f32 %v5224_v10, %v10930_v55  ;;  %v5097_v23 = vmul.f32 %v4858_v46, %v11903_v30 }
 0x6b2   :  { %v5327_v61 = vsel %vm113_vm0, %v5098_v13, 0.0 }
 0x6b3   :  { %v11013_v14 = vadd.f32 %v5327_v61, %v10934_v27  ;;  %v5312_v45 = vsel %vm113_vm0, %v5097_v23, 0.0 }
 0x6b4   :  { %v11017_v5 = vadd.f32 %v5312_v45, %v10937_v12  ;;  %v6765_v4 = vpop.f32.mrb[128].mxu1 }
 0x6b5   :  { %v5046_v43 = vmul.f32 %v6765_v4, %v11905_v49  ;;  %v4341_v42 = vpop.f32.mrb[129].mxu1 }
 0x6b6   :  { %v5045_v24 = vmul.f32 %v4341_v42, %v11905_v49 }
 0x6b7   :  { %v5151_v55 = vsel %vm113_vm0, %v5046_v43, 0.0  ;;  %v6862_v57 = vpop.f32.mrb[134].mxu0 }
 0x6b8   :  { %v11023_v20 = vadd.f32 %v5151_v55, %v10943_v48  ;;  %v5136_v27 = vsel %vm113_vm0, %v5045_v24, 0.0  ;;  %v5100_v39 = vmul.f32 %v6862_v57, %v11903_v30  ;;  %v4868_v38 = vpop.f32.mrb[135].mxu0 }
 0x6b9   :  { %v11028_v12 = vadd.f32 %v5136_v27, %v10948_v3  ;;  %v5099_v36 = vmul.f32 %v4868_v38, %v11903_v30  ;;  %v11906_v27 = vld [vmem:[#allocation5_spill] sm:$0xff] }
 0x6ba   :  { %v5357_v58 = vsel %vm113_vm0, %v5100_v39, 0.0 }
 0x6bb   :  { %v11033_v11 = vadd.f32 %v5357_v58, %v10953_v17  ;;  %v5342_v25 = vsel %vm113_vm0, %v5099_v36, 0.0 }
 0x6bc   :  { %v11037_v48 = vadd.f32 %v5342_v25, %v10957_v41  ;;  %v6768_v26 = vpop.f32.mrb[130].mxu1 }
 0x6bd   :  { %v5048_v19 = vmul.f32 %v6768_v26, %v11905_v49  ;;  %v4351_v47 = vpop.f32.mrb[131].mxu1 }
 0x6be   :  { %v5047_v1 = vmul.f32 %v4351_v47, %v11905_v49 }
 0x6bf   :  { %v5181_v3 = vsel %vm113_vm0, %v5048_v19, 0.0  ;;  %v6865_v44 = vpop.f32.mrb[136].mxu0 }
 0x6c0   :  { %v11043_v30 = vadd.f32 %v5181_v3, %v10963_v9  ;;  %v5166_v17 = vsel %vm113_vm0, %v5047_v1, 0.0  ;;  %v5102_v56 = vmul.f32 %v6865_v44, %v11904_v50  ;;  %v4878_v28 = vpop.f32.mrb[137].mxu0 }
 0x6c1   :  { %v11048_v41 = vadd.f32 %v5166_v17, %v10968_v62  ;;  %v5101_v54 = vmul.f32 %v4878_v28, %v11904_v50 }
 0x6c2   :  { %v5269_v60 = vsel %vm113_vm0, %v5102_v56, 0.0 }
 0x6c3   :  { %v11053_v32 = vadd.f32 %v5269_v60, %v10973_v15  ;;  %v5254_v8 = vsel %vm113_vm0, %v5101_v54, 0.0 }
 0x6c4   :  { %v11057_v9 = vadd.f32 %v5254_v8, %v10977_v37  ;;  %v6771_v22 = vpop.f32.mrb[132].mxu1 }
 0x6c5   :  { %v5050_v16 = vmul.f32 %v6771_v22, %v11905_v49  ;;  %v4361_v2 = vpop.f32.mrb[133].mxu1 }
 0x6c6   :  { %v5049_v21 = vmul.f32 %v4361_v2, %v11905_v49 }
 0x6c7   :  { %v5211_v62 = vsel %vm113_vm0, %v5050_v16, 0.0  ;;  %v6868_v7 = vpop.f32.mrb[138].mxu0 }
 0x6c8   :  { %v11063_v52 = vadd.f32 %v5211_v62, %v10983_v33  ;;  %v5196_v15 = vsel %vm113_vm0, %v5049_v21, 0.0  ;;  %v5104_v40 = vmul.f32 %v6868_v7, %v11904_v50  ;;  %v4888_v29 = vpop.f32.mrb[139].mxu0 }
 0x6c9   :  { %v11068_v37 = vadd.f32 %v5196_v15, %v10988_v53  ;;  %v5103_v18 = vmul.f32 %v4888_v29, %v11904_v50 }
 0x6ca   :  { %v5299_v34 = vsel %vm113_vm0, %v5104_v40, 0.0 }
 0x6cb   :  { %v11073_v59 = vadd.f32 %v5299_v34, %v10993_v6  ;;  %v5284_v51 = vsel %vm113_vm0, %v5103_v18, 0.0 }
 0x6cc   :  { %v11077_v33 = vadd.f32 %v5284_v51, %v10997_v31  ;;  %v6774_v35 = vpop.f32.mrb[134].mxu1 }
 0x6cd   :  { %v5052_v10 = vmul.f32 %v6774_v35, %v11905_v49  ;;  %v4371_v13 = vpop.f32.mrb[135].mxu1 }
 0x6ce   :  { %v5051_v46 = vmul.f32 %v4371_v13, %v11905_v49 }
 0x6cf   :  { %v5241_v53 = vsel %vm113_vm0, %v5052_v10, 0.0  ;;  %v6871_v23 = vpop.f32.mrb[140].mxu0 }
 0x6d0   :  { %v11083_v61 = vadd.f32 %v5241_v53, %v11003_v63  ;;  %v5226_v6 = vsel %vm113_vm0, %v5051_v46, 0.0  ;;  %v5106_v45 = vmul.f32 %v6871_v23, %v11904_v50  ;;  %v4898_v4 = vpop.f32.mrb[141].mxu0 }
 0x6d1   :  { %v11088_v31 = vadd.f32 %v5226_v6, %v11008_v0  ;;  %v5105_v43 = vmul.f32 %v4898_v4, %v11904_v50 }
 0x6d2   :  { %v5329_v42 = vsel %vm113_vm0, %v5106_v45, 0.0 }
 0x6d3   :  { %v11093_v24 = vadd.f32 %v5329_v42, %v11013_v14  ;;  %v5314_v55 = vsel %vm113_vm0, %v5105_v43, 0.0 }
 0x6d4   :  { %v11097_v63 = vadd.f32 %v5314_v55, %v11017_v5  ;;  %v6777_v57 = vpop.f32.mrb[136].mxu1 }
 0x6d5   :  { %v5054_v39 = vmul.f32 %v6777_v57, %v11906_v27  ;;  %v4381_v38 = vpop.f32.mrb[137].mxu1 }
 0x6d6   :  { %v5053_v36 = vmul.f32 %v4381_v38, %v11906_v27 }
 0x6d7   :  { %v5153_v0 = vsel %vm113_vm0, %v5054_v39, 0.0  ;;  %v6874_v58 = vpop.f32.mrb[142].mxu0 }
 0x6d8   :  { %v5154_v25 = vadd.f32 %v5153_v0, %v11023_v20  ;;  %v5138_v26 = vsel %vm113_vm0, %v5053_v36, 0.0  ;;  %v5108_v14 = vmul.f32 %v6874_v58, %v11904_v50  ;;  %v4908_v19 = vpop.f32.mrb[143].mxu0 }
 0x6d9   :  { %v5139_v47 = vadd.f32 %v5138_v26, %v11028_v12  ;;  %v5107_v5 = vmul.f32 %v4908_v19, %v11904_v50 }
 0x6da   :  { %v5359_v1 = vsel %vm113_vm0, %v5108_v14, 0.0 }
 0x6db   :  { %v11109_v3 = vadd.f32 %v5359_v1, %v11033_v11  ;;  %v5344_v44 = vsel %vm113_vm0, %v5107_v5, 0.0  ;;  %6907 = vmatprep.mubr.msk.f32.mxu1 %vm113_vm0, %v5139_v47 }
 0x6dc   :  { %v11114_v20 = vadd.f32 %v5344_v44, %v11037_v48  ;;  %v6780_v17 = vpop.f32.mrb[138].mxu1  ;;  %6908 = vmatmul.mubr.msk.f32.vlgmr.msra.gmra.mrb[144].mxu1 %vm113_vm0, %v5154_v25 }
 0x6dd   :  { %v5056_v56 = vmul.f32 %v6780_v17, %v11906_v27  ;;  %v4391_v12 = vpop.f32.mrb[139].mxu1 }
 0x6de   :  { %v5055_v50 = vmul.f32 %v4391_v12, %v11906_v27 }
 0x6df   :  { %v5183_v28 = vsel %vm113_vm0, %v5056_v56, 0.0  ;;  %v6877_v54 = vpop.f32.mrb[144].mxu0 }
 0x6e0   :  { %v5184_v11 = vadd.f32 %v5183_v28, %v11043_v30  ;;  %v5168_v60 = vsel %vm113_vm0, %v5055_v50, 0.0  ;;  %v5110_v8 = vmul.f32 %v6877_v54, %v11905_v49  ;;  %v4918_v22 = vpop.f32.mrb[145].mxu0 }
 0x6e1   :  { %v5169_v48 = vadd.f32 %v5168_v60, %v11048_v41  ;;  %v5109_v16 = vmul.f32 %v4918_v22, %v11905_v49 }
 0x6e2   :  { %v5271_v2 = vsel %vm113_vm0, %v5110_v8, 0.0 }
 0x6e3   :  { %v5272_v21 = vadd.f32 %v5271_v2, %v11053_v32  ;;  %v5256_v62 = vsel %vm113_vm0, %v5109_v16, 0.0  ;;  %6910 = vmatprep.mubr.msk.f32.mxu1 %vm113_vm0, %v5169_v48 }
 0x6e4   :  { %v5257_v7 = vadd.f32 %v5256_v62, %v11057_v9  ;;  %v6783_v30 = vpop.f32.mrb[140].mxu1  ;;  %6911 = vmatmul.mubr.msk.f32.gmra.mrb[146].mxu1 %vm113_vm0, %v5184_v11 }
 0x6e5   :  { %v5058_v15 = vmul.f32 %v6783_v30, %v11906_v27  ;;  %v4401_v40 = vpop.f32.mrb[141].mxu1 }
 0x6e6   :  { %v5057_v41 = vmul.f32 %v4401_v40, %v11906_v27 }
 0x6e7   :  { %v5213_v29 = vsel %vm113_vm0, %v5058_v15, 0.0  ;;  %v6880_v18 = vpop.f32.mrb[146].mxu0 }
 0x6e8   :  { %v5214_v34 = vadd.f32 %v5213_v29, %v11063_v52  ;;  %v5198_v32 = vsel %vm113_vm0, %v5057_v41, 0.0  ;;  %v5112_v51 = vmul.f32 %v6880_v18, %v11905_v49  ;;  %v4928_v35 = vpop.f32.mrb[147].mxu0 }
 0x6e9   :  { %v5199_v9 = vadd.f32 %v5198_v32, %v11068_v37  ;;  %v5111_v10 = vmul.f32 %v4928_v35, %v11905_v49  ;;  %v5970_v35 = vld [vmem:[%s11235_s11] ss:$0 sm:$0xff] }
 0x6ea   :  { %v5301_v13 = vsel %vm113_vm0, %v5112_v51, 0.0 }
 0x6eb   :  { %v5302_v46 = vadd.f32 %v5301_v13, %v11073_v59  ;;  %v5286_v53 = vsel %vm113_vm0, %v5111_v10, 0.0  ;;  %6913 = vmatprep.mubr.msk.f32.mxu1 %vm113_vm0, %v5199_v9 }
 0x6ec   :  { %v5287_v23 = vadd.f32 %v5286_v53, %v11077_v33  ;;  %v6786_v52 = vpop.f32.mrb[142].mxu1  ;;  %6914 = vmatmul.mubr.msk.f32.gmra.mrb[148].mxu1 %vm113_vm0, %v5214_v34 }
 0x6ed   :  { %v5060_v6 = vmul.f32 %v6786_v52, %v11906_v27  ;;  %v4411_v45 = vpop.f32.mrb[143].mxu1 }
 0x6ee   :  { %v5059_v37 = vmul.f32 %v4411_v45, %v11906_v27 }
 0x6ef   :  { %v5243_v4 = vsel %vm113_vm0, %v5060_v6, 0.0  ;;  %v6883_v43 = vpop.f32.mrb[148].mxu0 }
 0x6f0   :  { %v5244_v42 = vadd.f32 %v5243_v4, %v11083_v61  ;;  %v5228_v59 = vsel %vm113_vm0, %v5059_v37, 0.0  ;;  %v5114_v55 = vmul.f32 %v6883_v43, %v11905_v49  ;;  %v4938_v57 = vpop.f32.mrb[149].mxu0 }
 0x6f1   :  { %v5229_v33 = vadd.f32 %v5228_v59, %v11088_v31  ;;  %v5113_v39 = vmul.f32 %v4938_v57, %v11905_v49 }
 0x6f2   :  { %v5331_v38 = vsel %vm113_vm0, %v5114_v55, 0.0 }
 0x6f3   :  { %v5332_v36 = vadd.f32 %v5331_v38, %v11093_v24  ;;  %v5316_v0 = vsel %vm113_vm0, %v5113_v39, 0.0  ;;  %6916 = vmatprep.mubr.msk.f32.mxu1 %vm113_vm0, %v5229_v33 }
 0x6f4   :  { %v5317_v58 = vadd.f32 %v5316_v0, %v11097_v63  ;;  %6917 = vmatmul.mubr.msk.f32.gmra.mrb[150].mxu1 %vm113_vm0, %v5244_v42 }
 0x6f6   :  { %v6886_v61 = vpop.f32.mrb[150].mxu0 }
 0x6f7   :  { %v5116_v25 = vmul.f32 %v6886_v61, %v11905_v49  ;;  %v4948_v26 = vpop.f32.mrb[151].mxu0 }
 0x6f8   :  { %v5115_v31 = vmul.f32 %v4948_v26, %v11905_v49 }
 0x6f9   :  { %v5361_v14 = vsel %vm113_vm0, %v5116_v25, 0.0 }
 0x6fa   :  { %v5362_v19 = vadd.f32 %v5361_v14, %v11109_v3  ;;  %v5346_v24 = vsel %vm113_vm0, %v5115_v31, 0.0  ;;  %v6889_v47 = vpop.f32.mrb[152].mxu0 }
 0x6fb   :  { %v5347_v5 = vadd.f32 %v5346_v24, %v11114_v20  ;;  %v5118_v1 = vmul.f32 %v6889_v47, %v11906_v27  ;;  %v4958_v63 = vpop.f32.mrb[153].mxu0 }
 0x6fc   :  { %v5117_v44 = vmul.f32 %v4958_v63, %v11906_v27 }
 0x6fd   :  { %v5273_v17 = vsel %vm113_vm0, %v5118_v1, 0.0 }
 0x6fe   :  { %v5274_v56 = vadd.f32 %v5273_v17, %v5272_v21  ;;  %v5258_v12 = vsel %vm113_vm0, %v5117_v44, 0.0  ;;  %v6892_v49 = vpop.f32.mrb[154].mxu0 }
 0x6ff   :  { %v5259_v50 = vadd.f32 %v5258_v12, %v5257_v7  ;;  %v5120_v28 = vmul.f32 %v6892_v49, %v11906_v27  ;;  %v4968_v3 = vpop.f32.mrb[155].mxu0 }
 0x700   :  { %v5119_v54 = vmul.f32 %v4968_v3, %v11906_v27 }
 0x701   :  { %v5303_v11 = vsel %vm113_vm0, %v5120_v28, 0.0  ;;  %6919 = vmatprep.mubr.msk.f32.mxu1 %vm113_vm0, %v5259_v50 }
 0x702   :  { %v5304_v20 = vadd.f32 %v5303_v11, %v5302_v46  ;;  %v5288_v60 = vsel %vm113_vm0, %v5119_v54, 0.0  ;;  %v6895_v8 = vpop.f32.mrb[156].mxu0  ;;  %6920 = vmatmul.mubr.msk.f32.gmra.mrb[152].mxu1 %vm113_vm0, %v5274_v56 }
 0x703   :  { %v5289_v22 = vadd.f32 %v5288_v60, %v5287_v23  ;;  %v5122_v48 = vmul.f32 %v6895_v8, %v11906_v27  ;;  %v4978_v16 = vpop.f32.mrb[157].mxu0 }
 0x704   :  { %v5121_v2 = vmul.f32 %v4978_v16, %v11906_v27 }
 0x705   :  { %v5333_v21 = vsel %vm113_vm0, %v5122_v48, 0.0  ;;  %6922 = vmatprep.mubr.msk.f32.mxu1 %vm113_vm0, %v5289_v22 }
 0x706   :  { %v5334_v62 = vadd.f32 %v5333_v21, %v5332_v36  ;;  %v5318_v7 = vsel %vm113_vm0, %v5121_v2, 0.0  ;;  %v6898_v30 = vpop.f32.mrb[158].mxu0  ;;  %6923 = vmatmul.mubr.msk.f32.gmra.mrb[154].mxu1 %vm113_vm0, %v5304_v20 }
 0x707   :  { %v5319_v15 = vadd.f32 %v5318_v7, %v5317_v58  ;;  %v5124_v40 = vmul.f32 %v6898_v30, %v11906_v27  ;;  %v4988_v41 = vpop.f32.mrb[159].mxu0 }
 0x708   :  { %v5123_v29 = vmul.f32 %v4988_v41, %v11906_v27 }
 0x709   :  { %v5363_v18 = vsel %vm113_vm0, %v5124_v40, 0.0  ;;  %6925 = vmatprep.mubr.msk.f32.mxu1 %vm113_vm0, %v5319_v15 }
 0x70a   :  { %v5364_v34 = vadd.f32 %v5363_v18, %v5362_v19  ;;  %v5348_v32 = vsel %vm113_vm0, %v5123_v29, 0.0  ;;  %6926 = vmatmul.mubr.msk.f32.gmra.mrb[156].mxu1 %vm113_vm0, %v5334_v62 }
 0x70b   :  { %v5349_v51 = vadd.f32 %v5348_v32, %v5347_v5 }
 0x70d   :  { %6928 = vmatprep.mubr.msk.f32.mxu1 %vm113_vm0, %v5349_v51 }
 0x70e   :  { %6929 = vmatmul.mubr.msk.f32.gmra.mrb[158].mxu1 %vm113_vm0, %v5364_v34 }
 0x7af   :  { %v6909_v9 = vpop.f32.mrb[144].mxu1 }
 0x7b0   :  { %v5490_v27 = vpop.f32.mrb[145].mxu1  ;;  %v5496_v13 = vadd.f32 %v6909_v9, %v5970_v35 }
 0x7b1   :  { %v5491_v10 = vadd.f32 %v5970_v35, %v5490_v27 }
 0x7b3   :  { %5569 = vxpose.xlu0.b32.start [1/8] (short) (narrow) %v5491_v10, 32 }
 0x7b7   :  { %v6912_v46 = vpop.f32.mrb[146].mxu1  ;;  %5570 = vxpose.xlu0.b32.cont [2/8] (short) (narrow) %v5496_v13, 32 }
 0x7b8   :  { %v5500_v53 = vpop.f32.mrb[147].mxu1  ;;  %v5506_v52 = vadd.f32 %v6912_v46, %v5970_v35 }
 0x7b9   :  { %v5501_v23 = vadd.f32 %v5970_v35, %v5500_v53 }
 0x7bb   :  { %5571 = vxpose.xlu0.b32.cont [3/8] (short) (narrow) %v5501_v23, 32 }
 0x7bf   :  { %v6915_v6 = vpop.f32.mrb[148].mxu1  ;;  %5572 = vxpose.xlu0.b32.cont [4/8] (short) (narrow) %v5506_v52, 32 }
 0x7c0   :  { %v5510_v45 = vpop.f32.mrb[149].mxu1  ;;  %v5516_v4 = vadd.f32 %v6915_v6, %v5970_v35 }
 0x7c1   :  { %v5511_v37 = vadd.f32 %v5970_v35, %v5510_v45 }
 0x7c3   :  { %5573 = vxpose.xlu0.b32.cont [5/8] (short) (narrow) %v5511_v37, 32 }
 0x7c7   :  { %5574 = vxpose.xlu0.b32.cont [6/8] (short) (narrow) %v5516_v4, 32  ;;  %v6918_v43 = vpop.f32.mrb[150].mxu1 }
 0x7c8   :  { %v5520_v42 = vpop.f32.mrb[151].mxu1  ;;  %v5526_v55 = vadd.f32 %v6918_v43, %v5970_v35 }
 0x7c9   :  { %v5521_v59 = vadd.f32 %v5970_v35, %v5520_v42 }
 0x7cb   :  { %5575 = vxpose.xlu0.b32.cont [7/8] (short) (narrow) %v5521_v59, 32 }
 0x7cf   :  { %5576 = vxpose.xlu0.b32.end [8/8] (short) (narrow) %v5526_v55, 32 }
 0x7d5   :  { %v6921_v57 = vpop.f32.mrb[152].mxu1 }
 0x7d6   :  { %v5530_v33 = vpop.f32.mrb[153].mxu1  ;;  %v5536_v0 = vadd.f32 %v6921_v57, %v5970_v35 }
 0x7d7   :  { %v5531_v39 = vadd.f32 %v5970_v35, %v5530_v33 }
 0x7d9   :  { %5601 = vxpose.xlu1.b32.start [1/8] (short) (narrow) %v5531_v39, 32  ;;  %v6924_v38 = vpop.f32.mrb[154].mxu1 }
 0x7da   :  { %v5540_v36 = vpop.f32.mrb[155].mxu1  ;;  %v5546_v19 = vadd.f32 %v6924_v38, %v5970_v35 }
 0x7db   :  { %v5541_v25 = vadd.f32 %v5970_v35, %v5540_v36 }
 0x7dd   :  { %5602 = vxpose.xlu1.b32.cont [2/8] (short) (narrow) %v5536_v0, 32  ;;  %v6927_v58 = vpop.f32.mrb[156].mxu1 }
 0x7de   :  { %v5550_v61 = vpop.f32.mrb[157].mxu1  ;;  %v5556_v47 = vadd.f32 %v6927_v58, %v5970_v35 }
 0x7df   :  { %v5551_v24 = vadd.f32 %v5970_v35, %v5550_v61 }
 0x7e1   :  { %5603 = vxpose.xlu1.b32.cont [3/8] (short) (narrow) %v5541_v25, 32  ;;  %v6930_v26 = vpop.f32.mrb[158].mxu1 }
 0x7e2   :  { %v5566_v31 = vadd.f32 %v6930_v26, %v5970_v35  ;;  %v5560_v14 = vpop.f32.mrb[159].mxu1 }
 0x7e3   :  { %v5561_v5 = vadd.f32 %v5970_v35, %v5560_v14 }
 0x7e5   :  { %5604 = vxpose.xlu1.b32.cont [4/8] (short) (narrow) %v5546_v19, 32 }
 0x7e9   :  { %5605 = vxpose.xlu1.b32.cont [5/8] (short) (narrow) %v5551_v24, 32 }
 0x7ed   :  { %5606 = vxpose.xlu1.b32.cont [6/8] (short) (narrow) %v5556_v47, 32 }
 0x7f1   :  { %5607 = vxpose.xlu1.b32.cont [7/8] (short) (narrow) %v5561_v5, 32 }
 0x7f5   :  { %5608 = vxpose.xlu1.b32.end [8/8] (short) (narrow) %v5566_v31, 32 }
 0x833   :  { %v5585_v1 = vpop.trf.xlu0 }
 0x834   :  { %5633 = vst.msk [vmem:[%s11236_s12] sm:$0xff] %vm2434_vm2, %v5585_v1 }
 0x837   :  { %v5586_v63 = vpop.trf.xlu0 }
 0x838   :  { %5634 = vst.msk [vmem:[%s11236_s12 + $0x8] sm:$0xff] %vm2434_vm2, %v5586_v63 }
 0x83b   :  { %v5587_v44 = vpop.trf.xlu0 }
 0x83c   :  { %5635 = vst.msk [vmem:[%s11236_s12 + $0x10] sm:$0xff] %vm2434_vm2, %v5587_v44 }
 0x83f   :  { %v5588_v17 = vpop.trf.xlu0 }
 0x840   :  { %5636 = vst.msk [vmem:[%s11236_s12 + $0x18] sm:$0xff] %vm2434_vm2, %v5588_v17 }
 0x859   :  { %v5617_v56 = vpop.trf.xlu1 }
 0x85a   :  { %5637 = vst.msk [vmem:[%s11236_s12 + $0x20] sm:$0xff] %vm2434_vm2, %v5617_v56 }
 0x85d   :  { %v5618_v12 = vpop.trf.xlu1 }
 0x85e   :  { %5638 = vst.msk [vmem:[%s11236_s12 + $0x28] sm:$0xff] %vm2434_vm2, %v5618_v12 }
 0x861   :  { %v5619_v49 = vpop.trf.xlu1 }
 0x862   :  { %5639 = vst.msk [vmem:[%s11236_s12 + $0x30] sm:$0xff] %vm2434_vm2, %v5619_v49 }
 0x865   :  { %v5620_v50 = vpop.trf.xlu1 }
 0x866   :  { %5640 = vst.msk [vmem:[%s11236_s12 + $0x38] sm:$0xff] %vm2434_vm2, %v5620_v50 }

</bundles_post_ra>
